<compile_context>
chip_gen: v7x
topology: tpu7x:2x2x1
jax: 0.10.0
libtpu: 0.0.40
codegen_flags: <defaults>
</compile_context>

<pallas_src>
import functools

import jax
import jax.numpy as jnp
from jax.experimental import pallas as pl
from jax.experimental.pallas import tpu as pltpu


# ------------------------------ small helpers ------------------------------ #

def _round_up(x, m):
    return (x + m - 1) // m * m


def _vmem_limit_bytes():
    """75% of physical VMEM (valid on v5e/v6e/v7x), with a safe fallback."""
    try:
        cap = pltpu.get_tpu_info().vmem_capacity_bytes
        return int(cap * 3 // 4)
    except Exception:
        return 48 * 1024 * 1024


VMEM_LIMIT = _vmem_limit_bytes()


def _choose_tk(kp):
    """Pick a K tile so the K grid has 3-4 steps (DMA/compute overlap)."""
    for gk in (4, 3, 2):
        tk = kp // gk
        if kp % gk == 0 and tk % 128 == 0:
            return tk
    return kp


def _choose_tn(cp):
    """Pick a Cout tile <= 256 so v7x's second TensorCore gets work."""
    if cp >= 512:
        return 256
    if cp >= 256:
        return 128
    return cp


# ------------------------------ Pallas kernels ------------------------------ #

def _conv_gemm_bn_relu_kernel(p_ref, w_ref, b_ref, g_ref, bt_ref, o_ref,
                              acc_ref, *, m_true, eps):
    """im2col-GEMM + bias + training-mode BatchNorm + ReLU, fully fused.

    Requires the whole (padded) M axis to be resident in one tile (gm == 1),
    which holds for every layer here (M <= 96), so batch statistics can be
    computed from the f32 accumulator in the final epilogue.

    p_ref  : (TM, TK)  bf16 im2col patch tile
    w_ref  : (TK, TN)  bf16 weight tile
    b_ref  : (1,  TN)  f32 conv bias
    g_ref  : (1,  TN)  f32 BN gamma
    bt_ref : (1,  TN)  f32 BN beta
    o_ref  : (TM, TN)  f32 output tile (post BN+ReLU)
    acc_ref: (TM, TN)  f32 accumulator (VMEM scratch)
    """
    k = pl.program_id(1)

    @pl.when(k == 0)
    def _():
        acc_ref[...] = jnp.zeros_like(acc_ref)

    acc_ref[...] += jnp.dot(p_ref[...], w_ref[...],
                            preferred_element_type=jnp.float32)

    @pl.when(k == pl.num_programs(1) - 1)
    def _():
        y = acc_ref[...] + b_ref[...]
        # Mask padded M rows out of the batch statistics.
        row = jax.lax.broadcasted_iota(jnp.int32, y.shape, 0)
        valid = (row < m_true).astype(jnp.float32)
        inv_m = 1.0 / float(m_true)
        yv = y * valid
        mean = jnp.sum(yv, axis=0, keepdims=True) * inv_m
        var = jnp.maximum(
            jnp.sum(yv * yv, axis=0, keepdims=True) * inv_m - mean * mean, 0.0)
        scale = g_ref[...] * jax.lax.rsqrt(var + eps)
        shift = bt_ref[...] - mean * scale
        o_ref[...] = jnp.maximum(y * scale + shift, 0.0)


def _linear_kernel(x_ref, w_ref, b_ref, o_ref):
    o_ref[...] = (jnp.dot(x_ref[...], w_ref[...],
                          preferred_element_type=jnp.float32) + b_ref[...])


# ------------------------------ Pallas wrappers ----------------------------- #

def conv_gemm_bn_relu(patches_bf16, w_p, b_p, g_p, bt_p, *, m_true, tn, tk,
                      eps=1e-5):
    tm, kp = patches_bf16.shape
    cp = w_p.shape[1]
    gn, gk = cp // tn, kp // tk
    kernel = functools.partial(_conv_gemm_bn_relu_kernel, m_true=m_true,
                               eps=eps)
    return pl.pallas_call(
        kernel,
        out_shape=jax.ShapeDtypeStruct((tm, cp), jnp.float32),
        grid_spec=pltpu.PrefetchScalarGridSpec(
            num_scalar_prefetch=0,
            grid=(gn, gk),
            in_specs=[
                pl.BlockSpec((tm, tk), lambda j, k: (0, k)),
                pl.BlockSpec((tk, tn), lambda j, k: (k, j)),
                pl.BlockSpec((1, tn), lambda j, k: (0, j)),
                pl.BlockSpec((1, tn), lambda j, k: (0, j)),
                pl.BlockSpec((1, tn), lambda j, k: (0, j)),
            ],
            out_specs=pl.BlockSpec((tm, tn), lambda j, k: (0, j)),
            scratch_shapes=[pltpu.VMEM((tm, tn), jnp.float32)],
        ),
        compiler_params=pltpu.CompilerParams(
            dimension_semantics=("parallel", "arbitrary"),
            vmem_limit_bytes=VMEM_LIMIT),
    )(patches_bf16, w_p, b_p, g_p, bt_p)


def linear_pallas(x, packed):
    """x: (B, K) f32; packed weight is pre-padded bf16 (Kp, Np), bias f32."""
    w_p, b_p, nout, kin = packed
    m = x.shape[0]
    kp, np_ = w_p.shape
    mp = _round_up(m, 16)
    x_p = (jnp.zeros((mp, kp), jnp.bfloat16)
           .at[:m, :kin].set(x.astype(jnp.bfloat16)))
    out = pl.pallas_call(
        _linear_kernel,
        out_shape=jax.ShapeDtypeStruct((mp, np_), jnp.float32),
        in_specs=[
            pl.BlockSpec((mp, kp), lambda: (0, 0)),
            pl.BlockSpec((kp, np_), lambda: (0, 0)),
            pl.BlockSpec((1, np_), lambda: (0, 0)),
        ],
        out_specs=pl.BlockSpec((mp, np_), lambda: (0, 0)),
        compiler_params=pltpu.CompilerParams(vmem_limit_bytes=VMEM_LIMIT),
    )(x_p, w_p, b_p)
    return out[:m, :nout]


# ------------------------------- glue (JAX) --------------------------------- #

def im2col_nhwc(x, kh, kw, stride, pad):
    """x: (N, H, W, C) -> patches (N*OH*OW, KH*KW*C), K ordered (kh, kw, cin)."""
    # TODO(synk): gather patches inside the Pallas kernel (pl.Element offsets /
    # VMEM-resident previous activation) to avoid the HBM patch materialization.
    x = jnp.pad(x, ((0, 0), (pad, pad), (pad, pad), (0, 0)))
    n, h, w, c = x.shape
    oh = (h - kh) // stride + 1
    ow = (w - kw) // stride + 1
    cols = []
    for i in range(kh):
        for j in range(kw):
            cols.append(x[:, i:i + stride * oh:stride, j:j + stride * ow:stride, :])
    patches = jnp.stack(cols, axis=-2).reshape(n * oh * ow, kh * kw * c)
    return patches, (n, oh, ow)


def conv_bn_relu(x_nhwc, packed, cfg):
    """Conv2d -> training-mode BatchNorm2d -> ReLU (all fused in one kernel)."""
    w_p, b_p, g_p, bt_p, cout, kflat = packed
    patches, (n, oh, ow) = im2col_nhwc(x_nhwc, cfg["ksize"], cfg["ksize"],
                                       cfg["stride"], cfg["pad"])
    m, k = patches.shape
    kp, cp = w_p.shape
    tm = _round_up(m, 16)                 # bf16 (16, 128) sublane packing
    tk = _choose_tk(kp)
    tn = _choose_tn(cp)
    patches_p = (jnp.zeros((tm, kp), jnp.bfloat16)
                 .at[:m, :k].set(patches.astype(jnp.bfloat16)))
    out = conv_gemm_bn_relu(patches_p, w_p, b_p, g_p, bt_p,
                            m_true=m, tn=tn, tk=tk)
    return out[:m, :cout].reshape(n, oh, ow, cout)


def adaptive_avg_pool2d_nhwc(x, out_h, out_w):
    """PyTorch-style adaptive average pooling (static bins), NHWC."""
    _, h, w, _ = x.shape
    rows = []
    for i in range(out_h):
        h0 = (i * h) // out_h
        h1 = -(-((i + 1) * h) // out_h)
        cols = []
        for j in range(out_w):
            w0 = (j * w) // out_w
            w1 = -(-((j + 1) * w) // out_w)
            cols.append(jnp.mean(x[:, h0:h1, w0:w1, :], axis=(1, 2)))
        rows.append(jnp.stack(cols, axis=1))          # (N, out_w, C)
    return jnp.stack(rows, axis=1)                    # (N, out_h, out_w, C)


# --------------------------- params & pre-packing ---------------------------- #

_CONV_DEFS = [
    # (cin, cout, ksize, stride, pad)
    (192, 512, 4, 2, 1),
    (512, 256, 4, 2, 1),
    (256, 128, 3, 1, 1),
    (128, 64, 3, 1, 1),
]


def pack_conv_layer(w, b, gamma, beta):
    """OIHW weight -> lane-dense bf16 (Kp, Cp); bias/gamma/beta -> f32 (1, Cp)."""
    cout, cin, kh, kw = w.shape
    kflat = cin * kh * kw
    kp = _round_up(kflat, 128)
    cp = _round_up(cout, 128)
    # K ordering = (kh, kw, cin), matching im2col_nhwc.
    w_mat = jnp.transpose(w, (2, 3, 1, 0)).reshape(kflat, cout)
    w_p = (jnp.zeros((kp, cp), jnp.bfloat16)
           .at[:kflat, :cout].set(w_mat.astype(jnp.bfloat16)))
    b_p = jnp.zeros((1, cp), jnp.float32).at[0, :cout].set(b)
    g_p = jnp.zeros((1, cp), jnp.float32).at[0, :cout].set(gamma)
    bt_p = jnp.zeros((1, cp), jnp.float32).at[0, :cout].set(beta)
    return w_p, b_p, g_p, bt_p, cout, kflat


def pack_linear(lw, lb):
    nout, kin = lw.shape
    kp = _round_up(kin, 128)
    np_ = _round_up(nout, 128)
    w_p = (jnp.zeros((kp, np_), jnp.bfloat16)
           .at[:kin, :nout].set(jnp.transpose(lw).astype(jnp.bfloat16)))
    b_p = jnp.zeros((1, np_), jnp.float32).at[0, :nout].set(lb)
    return w_p, b_p, nout, kin


def init_params(key):
    conv_layers = []
    for cin, cout, ks, st, pd in _CONV_DEFS:
        key, kw_, kb_ = jax.random.split(key, 3)
        fan_in = cin * ks * ks
        bound = 1.0 / (fan_in ** 0.5)
        w = jax.random.uniform(kw_, (cout, cin, ks, ks), jnp.float32,
                               -bound, bound)
        b = jax.random.uniform(kb_, (cout,), jnp.float32, -bound, bound)
        gamma = jnp.ones((cout,), jnp.float32)   # nn.BatchNorm2d default weight
        beta = jnp.zeros((cout,), jnp.float32)   # nn.BatchNorm2d default bias
        conv_layers.append((pack_conv_layer(w, b, gamma, beta),
                            dict(ksize=ks, stride=st, pad=pd)))
    key, kw_, kb_ = jax.random.split(key, 3)
    bound = 1.0 / (768.0 ** 0.5)
    lw = jax.random.uniform(kw_, (50, 768), jnp.float32, -bound, bound)
    lb = jax.random.uniform(kb_, (50,), jnp.float32, -bound, bound)
    return conv_layers, pack_linear(lw, lb)


# ----------------------------- forward pass ---------------------------------- #

def feature_regression_forward(x_nchw, params):
    conv_layers, lin_packed = params
    # NCHW (PyTorch convention) -> NHWC for the kernel pipeline.
    x = jnp.transpose(x_nchw, (0, 2, 3, 1)).astype(jnp.float32)
    for packed, cfg in conv_layers:
        x = conv_bn_relu(x, packed, cfg)
    # F.adaptive_avg_pool2d(x, (12, 1)) then reshape(B, -1) in (C, H, W) order.
    x = adaptive_avg_pool2d_nhwc(x, 12, 1)                   # (N, 12, 1, 64)
    n = x.shape[0]
    feat = jnp.transpose(x, (0, 3, 1, 2)).reshape(n, -1)     # (N, 768)
    return linear_pallas(feat, lin_packed)                   # (N, 50)


# ----------------------------------- main ------------------------------------ #

if __name__ == "__main__":
    key = jax.random.PRNGKey(0)
    k_x, k_p = jax.random.split(key)

    # Shapes matching GMM usage: batch=2, 192 input channels, 16x12 spatial.
    x = jax.random.normal(k_x, (2, 192, 16, 12), jnp.float32)
    params = init_params(k_p)

    fwd = jax.jit(lambda inp: feature_regression_forward(inp, params))
    out = jax.block_until_ready(fwd(x))

    # conv: 16x12 -> 8x6 -> 4x3 -> 4x3 -> 4x3; pool -> (12,1); flatten 64*12=768; linear -> 50.
    assert out.shape == (2, 50), out.shape
    assert bool(jnp.all(jnp.isfinite(out)))

    print("KERNEL_OK")
</pallas_src>

<mosaic_0001>
module attributes {stable_mosaic.version = 11 : i64} {
  func.func @_conv_gemm_bn_relu_kernel(%arg0: i32, %arg1: i32, %arg2: memref<96x768xbf16, #tpu.memory_space<vmem>>, %arg3: memref<768x256xbf16, #tpu.memory_space<vmem>>, %arg4: memref<1x256xf32, #tpu.memory_space<vmem>>, %arg5: memref<1x256xf32, #tpu.memory_space<vmem>>, %arg6: memref<1x256xf32, #tpu.memory_space<vmem>>, %arg7: memref<96x256xf32, #tpu.memory_space<vmem>>, %arg8: memref<96x256xf32, #tpu.memory_space<vmem>>) attributes {dimension_semantics = [#tpu.dimension_semantics<parallel>, #tpu.dimension_semantics<arbitrary>], iteration_bounds = array<i64: 2, 4>, scalar_prefetch = 0 : i64, scratch_operands = 1 : i64, tpu.core_type = #tpu.core_type<tc>, window_params = [{transform_indices = @transform_0, window_bounds = array<i64: 96, 768>}, {transform_indices = @transform_1, window_bounds = array<i64: 768, 256>}, {transform_indices = @transform_2, window_bounds = array<i64: 1, 256>}, {transform_indices = @transform_3, window_bounds = array<i64: 1, 256>}, {transform_indices = @transform_4, window_bounds = array<i64: 1, 256>}, {transform_indices = @transform_5, window_bounds = array<i64: 96, 256>}]} {
    %c0_i32 = arith.constant 0 : i32
    %0 = arith.cmpi eq, %arg1, %c0_i32 : i32
    %1 = arith.extui %0 : i1 to i32
    %c0_i32_0 = arith.constant 0 : i32
    %2 = arith.cmpi ne, %1, %c0_i32_0 : i32
    scf.if %2 {
      %cst_9 = arith.constant 0.000000e+00 : f32
      %12 = vector.broadcast %cst_9 : f32 to vector<96x256xf32>
      %c0_10 = arith.constant 0 : index
      %c0_11 = arith.constant 0 : index
      %13 = vector.load %arg8[%c0_10, %c0_11] : memref<96x256xf32, #tpu.memory_space<vmem>>, vector<96x256xf32>
      tpu.vector_store %arg8[%c0_10, %c0_11], %12 {strides = array<i32>} : memref<96x256xf32, #tpu.memory_space<vmem>>, vector<96x256xf32>,
    } else {
    }
    %c0 = arith.constant 0 : index
    %c0_1 = arith.constant 0 : index
    %3 = vector.load %arg8[%c0, %c0_1] : memref<96x256xf32, #tpu.memory_space<vmem>>, vector<96x256xf32>
    %c0_2 = arith.constant 0 : index
    %c0_3 = arith.constant 0 : index
    %4 = vector.load %arg2[%c0_2, %c0_3] : memref<96x768xbf16, #tpu.memory_space<vmem>>, vector<96x768xbf16>
    %c0_4 = arith.constant 0 : index
    %c0_5 = arith.constant 0 : index
    %5 = vector.load %arg3[%c0_4, %c0_5] : memref<768x256xbf16, #tpu.memory_space<vmem>>, vector<768x256xbf16>
    %cst = arith.constant dense<0.000000e+00> : vector<96x256xf32>
    %6 = tpu.matmul %4, %5, %cst {dimension_numbers = #tpu.dot_dimension_numbers<[1], [0], [0], [1], [0, 0, 1, 1], [], []>} : vector<96x768xbf16>, vector<768x256xbf16>, vector<96x256xf32> -> vector<96x256xf32>
    %7 = arith.addf %3, %6 : vector<96x256xf32>
    %c0_6 = arith.constant 0 : index
    %c0_7 = arith.constant 0 : index
    %8 = vector.load %arg8[%c0_6, %c0_7] : memref<96x256xf32, #tpu.memory_space<vmem>>, vector<96x256xf32>
    tpu.vector_store %arg8[%c0_6, %c0_7], %7 {strides = array<i32>} : memref<96x256xf32, #tpu.memory_space<vmem>>, vector<96x256xf32>,
    %c3_i32 = arith.constant 3 : i32
    %9 = arith.cmpi eq, %arg1, %c3_i32 : i32
    %10 = arith.extui %9 : i1 to i32
    %c0_i32_8 = arith.constant 0 : i32
    %11 = arith.cmpi ne, %10, %c0_i32_8 : i32
    scf.if %11 {
      %c0_9 = arith.constant 0 : index
      %c0_10 = arith.constant 0 : index
      %12 = vector.load %arg8[%c0_9, %c0_10] : memref<96x256xf32, #tpu.memory_space<vmem>>, vector<96x256xf32>
      %c0_11 = arith.constant 0 : index
      %c0_12 = arith.constant 0 : index
      %13 = vector.load %arg4[%c0_11, %c0_12] : memref<1x256xf32, #tpu.memory_space<vmem>>, vector<1x256xf32>
      %14 = vector.broadcast %13 : vector<1x256xf32> to vector<96x256xf32>
      %15 = arith.addf %12, %14 : vector<96x256xf32>
      %16 = tpu.iota {dimensions = array<i32: 0>} : vector<96x256xi32>
      %c96_i32 = arith.constant 96 : i32
      %17 = vector.broadcast %c96_i32 : i32 to vector<96x256xi32>
      %18 = arith.cmpi slt, %16, %17 : vector<96x256xi32>
      %19 = arith.extui %18 : vector<96x256xi1> to vector<96x256xi32>
      %20 = arith.sitofp %19 : vector<96x256xi32> to vector<96x256xf32>
      %21 = arith.mulf %15, %20 : vector<96x256xf32>
      %cst_13 = arith.constant dense<0.000000e+00> : vector<256xf32>
      %22 = vector.multi_reduction <add>, %21, %cst_13 [0] : vector<96x256xf32> to vector<256xf32>
      %23 = vector.shape_cast %22 : vector<256xf32> to vector<1x256xf32>
      %cst_14 = arith.constant 0.010416667 : f32
      %24 = vector.broadcast %cst_14 : f32 to vector<1x256xf32>
      %25 = arith.mulf %23, %24 : vector<1x256xf32>
      %26 = arith.mulf %21, %21 : vector<96x256xf32>
      %cst_15 = arith.constant dense<0.000000e+00> : vector<256xf32>
      %27 = vector.multi_reduction <add>, %26, %cst_15 [0] : vector<96x256xf32> to vector<256xf32>
      %28 = vector.shape_cast %27 : vector<256xf32> to vector<1x256xf32>
      %cst_16 = arith.constant 0.010416667 : f32
      %29 = vector.broadcast %cst_16 : f32 to vector<1x256xf32>
      %30 = arith.mulf %28, %29 : vector<1x256xf32>
      %31 = arith.mulf %25, %25 : vector<1x256xf32>
      %32 = arith.subf %30, %31 : vector<1x256xf32>
      %cst_17 = arith.constant 0.000000e+00 : f32
      %33 = vector.broadcast %cst_17 : f32 to vector<1x256xf32>
      %34 = arith.maximumf %32, %33 : vector<1x256xf32>
      %c0_18 = arith.constant 0 : index
      %c0_19 = arith.constant 0 : index
      %35 = vector.load %arg5[%c0_18, %c0_19] : memref<1x256xf32, #tpu.memory_space<vmem>>, vector<1x256xf32>
      %cst_20 = arith.constant 9.99999974E-6 : f32
      %36 = vector.broadcast %cst_20 : f32 to vector<1x256xf32>
      %37 = arith.addf %34, %36 : vector<1x256xf32>
      %38 = math.rsqrt %37 : vector<1x256xf32>
      %39 = arith.mulf %35, %38 : vector<1x256xf32>
      %c0_21 = arith.constant 0 : index
      %c0_22 = arith.constant 0 : index
      %40 = vector.load %arg6[%c0_21, %c0_22] : memref<1x256xf32, #tpu.memory_space<vmem>>, vector<1x256xf32>
      %41 = arith.mulf %25, %39 : vector<1x256xf32>
      %42 = arith.subf %40, %41 : vector<1x256xf32>
      %43 = vector.broadcast %39 : vector<1x256xf32> to vector<96x256xf32>
      %44 = arith.mulf %15, %43 : vector<96x256xf32>
      %45 = vector.broadcast %42 : vector<1x256xf32> to vector<96x256xf32>
      %46 = arith.addf %44, %45 : vector<96x256xf32>
      %cst_23 = arith.constant 0.000000e+00 : f32
      %47 = vector.broadcast %cst_23 : f32 to vector<96x256xf32>
      %48 = arith.maximumf %46, %47 : vector<96x256xf32>
      %c0_24 = arith.constant 0 : index
      %c0_25 = arith.constant 0 : index
      %49 = vector.load %arg7[%c0_24, %c0_25] : memref<96x256xf32, #tpu.memory_space<vmem>>, vector<96x256xf32>
      tpu.vector_store %arg7[%c0_24, %c0_25], %48 {strides = array<i32>} : memref<96x256xf32, #tpu.memory_space<vmem>>, vector<96x256xf32>,
    } else {
    }
    return
  }
  func.func @transform_0(%arg0: i32, %arg1: i32) -> (i32, i32) {
    %c0_i32 = arith.constant 0 : i32
    %c0_i32_0 = arith.constant 0 : i32
    return %c0_i32, %arg1 : i32, i32
  }
  func.func @transform_1(%arg0: i32, %arg1: i32) -> (i32, i32) {
    %c0_i32 = arith.constant 0 : i32
    return %arg1, %arg0 : i32, i32
  }
  func.func @transform_2(%arg0: i32, %arg1: i32) -> (i32, i32) {
    %c0_i32 = arith.constant 0 : i32
    %c0_i32_0 = arith.constant 0 : i32
    return %c0_i32, %arg0 : i32, i32
  }
  func.func @transform_3(%arg0: i32, %arg1: i32) -> (i32, i32) {
    %c0_i32 = arith.constant 0 : i32
    %c0_i32_0 = arith.constant 0 : i32
    return %c0_i32, %arg0 : i32, i32
  }
  func.func @transform_4(%arg0: i32, %arg1: i32) -> (i32, i32) {
    %c0_i32 = arith.constant 0 : i32
    %c0_i32_0 = arith.constant 0 : i32
    return %c0_i32, %arg0 : i32, i32
  }
  func.func @transform_5(%arg0: i32, %arg1: i32) -> (i32, i32) {
    %c0_i32 = arith.constant 0 : i32
    %c0_i32_0 = arith.constant 0 : i32
    return %c0_i32, %arg0 : i32, i32
  }
}

module attributes {stable_mosaic.version = 11 : i64} {
  func.func @_conv_gemm_bn_relu_kernel(%arg0: i32, %arg1: i32, %arg2: memref<32x2048xbf16, #tpu.memory_space<vmem>>, %arg3: memref<2048x128xbf16, #tpu.memory_space<vmem>>, %arg4: memref<1x128xf32, #tpu.memory_space<vmem>>, %arg5: memref<1x128xf32, #tpu.memory_space<vmem>>, %arg6: memref<1x128xf32, #tpu.memory_space<vmem>>, %arg7: memref<32x128xf32, #tpu.memory_space<vmem>>, %arg8: memref<32x128xf32, #tpu.memory_space<vmem>>) attributes {dimension_semantics = [#tpu.dimension_semantics<parallel>, #tpu.dimension_semantics<arbitrary>], iteration_bounds = array<i64: 2, 4>, scalar_prefetch = 0 : i64, scratch_operands = 1 : i64, tpu.core_type = #tpu.core_type<tc>, window_params = [{transform_indices = @transform_0, window_bounds = array<i64: 32, 2048>}, {transform_indices = @transform_1, window_bounds = array<i64: 2048, 128>}, {transform_indices = @transform_2, window_bounds = array<i64: 1, 128>}, {transform_indices = @transform_3, window_bounds = array<i64: 1, 128>}, {transform_indices = @transform_4, window_bounds = array<i64: 1, 128>}, {transform_indices = @transform_5, window_bounds = array<i64: 32, 128>}]} {
    %c0_i32 = arith.constant 0 : i32
    %0 = arith.cmpi eq, %arg1, %c0_i32 : i32
    %1 = arith.extui %0 : i1 to i32
    %c0_i32_0 = arith.constant 0 : i32
    %2 = arith.cmpi ne, %1, %c0_i32_0 : i32
    scf.if %2 {
      %cst_9 = arith.constant 0.000000e+00 : f32
      %12 = vector.broadcast %cst_9 : f32 to vector<32x128xf32>
      %c0_10 = arith.constant 0 : index
      %c0_11 = arith.constant 0 : index
      %13 = vector.load %arg8[%c0_10, %c0_11] : memref<32x128xf32, #tpu.memory_space<vmem>>, vector<32x128xf32>
      tpu.vector_store %arg8[%c0_10, %c0_11], %12 {strides = array<i32>} : memref<32x128xf32, #tpu.memory_space<vmem>>, vector<32x128xf32>,
    } else {
    }
    %c0 = arith.constant 0 : index
    %c0_1 = arith.constant 0 : index
    %3 = vector.load %arg8[%c0, %c0_1] : memref<32x128xf32, #tpu.memory_space<vmem>>, vector<32x128xf32>
    %c0_2 = arith.constant 0 : index
    %c0_3 = arith.constant 0 : index
    %4 = vector.load %arg2[%c0_2, %c0_3] : memref<32x2048xbf16, #tpu.memory_space<vmem>>, vector<32x2048xbf16>
    %c0_4 = arith.constant 0 : index
    %c0_5 = arith.constant 0 : index
    %5 = vector.load %arg3[%c0_4, %c0_5] : memref<2048x128xbf16, #tpu.memory_space<vmem>>, vector<2048x128xbf16>
    %cst = arith.constant dense<0.000000e+00> : vector<32x128xf32>
    %6 = tpu.matmul %4, %5, %cst {dimension_numbers = #tpu.dot_dimension_numbers<[1], [0], [0], [1], [0, 0, 1, 1], [], []>} : vector<32x2048xbf16>, vector<2048x128xbf16>, vector<32x128xf32> -> vector<32x128xf32>
    %7 = arith.addf %3, %6 : vector<32x128xf32>
    %c0_6 = arith.constant 0 : index
    %c0_7 = arith.constant 0 : index
    %8 = vector.load %arg8[%c0_6, %c0_7] : memref<32x128xf32, #tpu.memory_space<vmem>>, vector<32x128xf32>
    tpu.vector_store %arg8[%c0_6, %c0_7], %7 {strides = array<i32>} : memref<32x128xf32, #tpu.memory_space<vmem>>, vector<32x128xf32>,
    %c3_i32 = arith.constant 3 : i32
    %9 = arith.cmpi eq, %arg1, %c3_i32 : i32
    %10 = arith.extui %9 : i1 to i32
    %c0_i32_8 = arith.constant 0 : i32
    %11 = arith.cmpi ne, %10, %c0_i32_8 : i32
    scf.if %11 {
      %c0_9 = arith.constant 0 : index
      %c0_10 = arith.constant 0 : index
      %12 = vector.load %arg8[%c0_9, %c0_10] : memref<32x128xf32, #tpu.memory_space<vmem>>, vector<32x128xf32>
      %c0_11 = arith.constant 0 : index
      %c0_12 = arith.constant 0 : index
      %13 = vector.load %arg4[%c0_11, %c0_12] : memref<1x128xf32, #tpu.memory_space<vmem>>, vector<1x128xf32>
      %14 = vector.broadcast %13 : vector<1x128xf32> to vector<32x128xf32>
      %15 = arith.addf %12, %14 : vector<32x128xf32>
      %16 = tpu.iota {dimensions = array<i32: 0>} : vector<32x128xi32>
      %c24_i32 = arith.constant 24 : i32
      %17 = vector.broadcast %c24_i32 : i32 to vector<32x128xi32>
      %18 = arith.cmpi slt, %16, %17 : vector<32x128xi32>
      %19 = arith.extui %18 : vector<32x128xi1> to vector<32x128xi32>
      %20 = arith.sitofp %19 : vector<32x128xi32> to vector<32x128xf32>
      %21 = arith.mulf %15, %20 : vector<32x128xf32>
      %cst_13 = arith.constant dense<0.000000e+00> : vector<128xf32>
      %22 = vector.multi_reduction <add>, %21, %cst_13 [0] : vector<32x128xf32> to vector<128xf32>
      %23 = vector.shape_cast %22 : vector<128xf32> to vector<1x128xf32>
      %cst_14 = arith.constant 0.0416666679 : f32
      %24 = vector.broadcast %cst_14 : f32 to vector<1x128xf32>
      %25 = arith.mulf %23, %24 : vector<1x128xf32>
      %26 = arith.mulf %21, %21 : vector<32x128xf32>
      %cst_15 = arith.constant dense<0.000000e+00> : vector<128xf32>
      %27 = vector.multi_reduction <add>, %26, %cst_15 [0] : vector<32x128xf32> to vector<128xf32>
      %28 = vector.shape_cast %27 : vector<128xf32> to vector<1x128xf32>
      %cst_16 = arith.constant 0.0416666679 : f32
      %29 = vector.broadcast %cst_16 : f32 to vector<1x128xf32>
      %30 = arith.mulf %28, %29 : vector<1x128xf32>
      %31 = arith.mulf %25, %25 : vector<1x128xf32>
      %32 = arith.subf %30, %31 : vector<1x128xf32>
      %cst_17 = arith.constant 0.000000e+00 : f32
      %33 = vector.broadcast %cst_17 : f32 to vector<1x128xf32>
      %34 = arith.maximumf %32, %33 : vector<1x128xf32>
      %c0_18 = arith.constant 0 : index
      %c0_19 = arith.constant 0 : index
      %35 = vector.load %arg5[%c0_18, %c0_19] : memref<1x128xf32, #tpu.memory_space<vmem>>, vector<1x128xf32>
      %cst_20 = arith.constant 9.99999974E-6 : f32
      %36 = vector.broadcast %cst_20 : f32 to vector<1x128xf32>
      %37 = arith.addf %34, %36 : vector<1x128xf32>
      %38 = math.rsqrt %37 : vector<1x128xf32>
      %39 = arith.mulf %35, %38 : vector<1x128xf32>
      %c0_21 = arith.constant 0 : index
      %c0_22 = arith.constant 0 : index
      %40 = vector.load %arg6[%c0_21, %c0_22] : memref<1x128xf32, #tpu.memory_space<vmem>>, vector<1x128xf32>
      %41 = arith.mulf %25, %39 : vector<1x128xf32>
      %42 = arith.subf %40, %41 : vector<1x128xf32>
      %43 = vector.broadcast %39 : vector<1x128xf32> to vector<32x128xf32>
      %44 = arith.mulf %15, %43 : vector<32x128xf32>
      %45 = vector.broadcast %42 : vector<1x128xf32> to vector<32x128xf32>
      %46 = arith.addf %44, %45 : vector<32x128xf32>
      %cst_23 = arith.constant 0.000000e+00 : f32
      %47 = vector.broadcast %cst_23 : f32 to vector<32x128xf32>
      %48 = arith.maximumf %46, %47 : vector<32x128xf32>
      %c0_24 = arith.constant 0 : index
      %c0_25 = arith.constant 0 : index
      %49 = vector.load %arg7[%c0_24, %c0_25] : memref<32x128xf32, #tpu.memory_space<vmem>>, vector<32x128xf32>
      tpu.vector_store %arg7[%c0_24, %c0_25], %48 {strides = array<i32>} : memref<32x128xf32, #tpu.memory_space<vmem>>, vector<32x128xf32>,
    } else {
    }
    return
  }
  func.func @transform_0(%arg0: i32, %arg1: i32) -> (i32, i32) {
    %c0_i32 = arith.constant 0 : i32
    %c0_i32_0 = arith.constant 0 : i32
    return %c0_i32, %arg1 : i32, i32
  }
  func.func @transform_1(%arg0: i32, %arg1: i32) -> (i32, i32) {
    %c0_i32 = arith.constant 0 : i32
    return %arg1, %arg0 : i32, i32
  }
  func.func @transform_2(%arg0: i32, %arg1: i32) -> (i32, i32) {
    %c0_i32 = arith.constant 0 : i32
    %c0_i32_0 = arith.constant 0 : i32
    return %c0_i32, %arg0 : i32, i32
  }
  func.func @transform_3(%arg0: i32, %arg1: i32) -> (i32, i32) {
    %c0_i32 = arith.constant 0 : i32
    %c0_i32_0 = arith.constant 0 : i32
    return %c0_i32, %arg0 : i32, i32
  }
  func.func @transform_4(%arg0: i32, %arg1: i32) -> (i32, i32) {
    %c0_i32 = arith.constant 0 : i32
    %c0_i32_0 = arith.constant 0 : i32
    return %c0_i32, %arg0 : i32, i32
  }
  func.func @transform_5(%arg0: i32, %arg1: i32) -> (i32, i32) {
    %c0_i32 = arith.constant 0 : i32
    %c0_i32_0 = arith.constant 0 : i32
    return %c0_i32, %arg0 : i32, i32
  }
}

module attributes {stable_mosaic.version = 11 : i64} {
  func.func @_conv_gemm_bn_relu_kernel(%arg0: i32, %arg1: i32, %arg2: memref<32x768xbf16, #tpu.memory_space<vmem>>, %arg3: memref<768x128xbf16, #tpu.memory_space<vmem>>, %arg4: memref<1x128xf32, #tpu.memory_space<vmem>>, %arg5: memref<1x128xf32, #tpu.memory_space<vmem>>, %arg6: memref<1x128xf32, #tpu.memory_space<vmem>>, %arg7: memref<32x128xf32, #tpu.memory_space<vmem>>, %arg8: memref<32x128xf32, #tpu.memory_space<vmem>>) attributes {dimension_semantics = [#tpu.dimension_semantics<parallel>, #tpu.dimension_semantics<arbitrary>], iteration_bounds = array<i64: 1, 3>, scalar_prefetch = 0 : i64, scratch_operands = 1 : i64, tpu.core_type = #tpu.core_type<tc>, window_params = [{transform_indices = @transform_0, window_bounds = array<i64: 32, 768>}, {transform_indices = @transform_1, window_bounds = array<i64: 768, 128>}, {transform_indices = @transform_2, window_bounds = array<i64: 1, 128>}, {transform_indices = @transform_3, window_bounds = array<i64: 1, 128>}, {transform_indices = @transform_4, window_bounds = array<i64: 1, 128>}, {transform_indices = @transform_5, window_bounds = array<i64: 32, 128>}]} {
    %c0_i32 = arith.constant 0 : i32
    %0 = arith.cmpi eq, %arg1, %c0_i32 : i32
    %1 = arith.extui %0 : i1 to i32
    %c0_i32_0 = arith.constant 0 : i32
    %2 = arith.cmpi ne, %1, %c0_i32_0 : i32
    scf.if %2 {
      %cst_9 = arith.constant 0.000000e+00 : f32
      %12 = vector.broadcast %cst_9 : f32 to vector<32x128xf32>
      %c0_10 = arith.constant 0 : index
      %c0_11 = arith.constant 0 : index
      %13 = vector.load %arg8[%c0_10, %c0_11] : memref<32x128xf32, #tpu.memory_space<vmem>>, vector<32x128xf32>
      tpu.vector_store %arg8[%c0_10, %c0_11], %12 {strides = array<i32>} : memref<32x128xf32, #tpu.memory_space<vmem>>, vector<32x128xf32>,
    } else {
    }
    %c0 = arith.constant 0 : index
    %c0_1 = arith.constant 0 : index
    %3 = vector.load %arg8[%c0, %c0_1] : memref<32x128xf32, #tpu.memory_space<vmem>>, vector<32x128xf32>
    %c0_2 = arith.constant 0 : index
    %c0_3 = arith.constant 0 : index
    %4 = vector.load %arg2[%c0_2, %c0_3] : memref<32x768xbf16, #tpu.memory_space<vmem>>, vector<32x768xbf16>
    %c0_4 = arith.constant 0 : index
    %c0_5 = arith.constant 0 : index
    %5 = vector.load %arg3[%c0_4, %c0_5] : memref<768x128xbf16, #tpu.memory_space<vmem>>, vector<768x128xbf16>
    %cst = arith.constant dense<0.000000e+00> : vector<32x128xf32>
    %6 = tpu.matmul %4, %5, %cst {dimension_numbers = #tpu.dot_dimension_numbers<[1], [0], [0], [1], [0, 0, 1, 1], [], []>} : vector<32x768xbf16>, vector<768x128xbf16>, vector<32x128xf32> -> vector<32x128xf32>
    %7 = arith.addf %3, %6 : vector<32x128xf32>
    %c0_6 = arith.constant 0 : index
    %c0_7 = arith.constant 0 : index
    %8 = vector.load %arg8[%c0_6, %c0_7] : memref<32x128xf32, #tpu.memory_space<vmem>>, vector<32x128xf32>
    tpu.vector_store %arg8[%c0_6, %c0_7], %7 {strides = array<i32>} : memref<32x128xf32, #tpu.memory_space<vmem>>, vector<32x128xf32>,
    %c2_i32 = arith.constant 2 : i32
    %9 = arith.cmpi eq, %arg1, %c2_i32 : i32
    %10 = arith.extui %9 : i1 to i32
    %c0_i32_8 = arith.constant 0 : i32
    %11 = arith.cmpi ne, %10, %c0_i32_8 : i32
    scf.if %11 {
      %c0_9 = arith.constant 0 : index
      %c0_10 = arith.constant 0 : index
      %12 = vector.load %arg8[%c0_9, %c0_10] : memref<32x128xf32, #tpu.memory_space<vmem>>, vector<32x128xf32>
      %c0_11 = arith.constant 0 : index
      %c0_12 = arith.constant 0 : index
      %13 = vector.load %arg4[%c0_11, %c0_12] : memref<1x128xf32, #tpu.memory_space<vmem>>, vector<1x128xf32>
      %14 = vector.broadcast %13 : vector<1x128xf32> to vector<32x128xf32>
      %15 = arith.addf %12, %14 : vector<32x128xf32>
      %16 = tpu.iota {dimensions = array<i32: 0>} : vector<32x128xi32>
      %c24_i32 = arith.constant 24 : i32
      %17 = vector.broadcast %c24_i32 : i32 to vector<32x128xi32>
      %18 = arith.cmpi slt, %16, %17 : vector<32x128xi32>
      %19 = arith.extui %18 : vector<32x128xi1> to vector<32x128xi32>
      %20 = arith.sitofp %19 : vector<32x128xi32> to vector<32x128xf32>
      %21 = arith.mulf %15, %20 : vector<32x128xf32>
      %cst_13 = arith.constant dense<0.000000e+00> : vector<128xf32>
      %22 = vector.multi_reduction <add>, %21, %cst_13 [0] : vector<32x128xf32> to vector<128xf32>
      %23 = vector.shape_cast %22 : vector<128xf32> to vector<1x128xf32>
      %cst_14 = arith.constant 0.0416666679 : f32
      %24 = vector.broadcast %cst_14 : f32 to vector<1x128xf32>
      %25 = arith.mulf %23, %24 : vector<1x128xf32>
      %26 = arith.mulf %21, %21 : vector<32x128xf32>
      %cst_15 = arith.constant dense<0.000000e+00> : vector<128xf32>
      %27 = vector.multi_reduction <add>, %26, %cst_15 [0] : vector<32x128xf32> to vector<128xf32>
      %28 = vector.shape_cast %27 : vector<128xf32> to vector<1x128xf32>
      %cst_16 = arith.constant 0.0416666679 : f32
      %29 = vector.broadcast %cst_16 : f32 to vector<1x128xf32>
      %30 = arith.mulf %28, %29 : vector<1x128xf32>
      %31 = arith.mulf %25, %25 : vector<1x128xf32>
      %32 = arith.subf %30, %31 : vector<1x128xf32>
      %cst_17 = arith.constant 0.000000e+00 : f32
      %33 = vector.broadcast %cst_17 : f32 to vector<1x128xf32>
      %34 = arith.maximumf %32, %33 : vector<1x128xf32>
      %c0_18 = arith.constant 0 : index
      %c0_19 = arith.constant 0 : index
      %35 = vector.load %arg5[%c0_18, %c0_19] : memref<1x128xf32, #tpu.memory_space<vmem>>, vector<1x128xf32>
      %cst_20 = arith.constant 9.99999974E-6 : f32
      %36 = vector.broadcast %cst_20 : f32 to vector<1x128xf32>
      %37 = arith.addf %34, %36 : vector<1x128xf32>
      %38 = math.rsqrt %37 : vector<1x128xf32>
      %39 = arith.mulf %35, %38 : vector<1x128xf32>
      %c0_21 = arith.constant 0 : index
      %c0_22 = arith.constant 0 : index
      %40 = vector.load %arg6[%c0_21, %c0_22] : memref<1x128xf32, #tpu.memory_space<vmem>>, vector<1x128xf32>
      %41 = arith.mulf %25, %39 : vector<1x128xf32>
      %42 = arith.subf %40, %41 : vector<1x128xf32>
      %43 = vector.broadcast %39 : vector<1x128xf32> to vector<32x128xf32>
      %44 = arith.mulf %15, %43 : vector<32x128xf32>
      %45 = vector.broadcast %42 : vector<1x128xf32> to vector<32x128xf32>
      %46 = arith.addf %44, %45 : vector<32x128xf32>
      %cst_23 = arith.constant 0.000000e+00 : f32
      %47 = vector.broadcast %cst_23 : f32 to vector<32x128xf32>
      %48 = arith.maximumf %46, %47 : vector<32x128xf32>
      %c0_24 = arith.constant 0 : index
      %c0_25 = arith.constant 0 : index
      %49 = vector.load %arg7[%c0_24, %c0_25] : memref<32x128xf32, #tpu.memory_space<vmem>>, vector<32x128xf32>
      tpu.vector_store %arg7[%c0_24, %c0_25], %48 {strides = array<i32>} : memref<32x128xf32, #tpu.memory_space<vmem>>, vector<32x128xf32>,
    } else {
    }
    return
  }
  func.func @transform_0(%arg0: i32, %arg1: i32) -> (i32, i32) {
    %c0_i32 = arith.constant 0 : i32
    %c0_i32_0 = arith.constant 0 : i32
    return %c0_i32, %arg1 : i32, i32
  }
  func.func @transform_1(%arg0: i32, %arg1: i32) -> (i32, i32) {
    %c0_i32 = arith.constant 0 : i32
    return %arg1, %arg0 : i32, i32
  }
  func.func @transform_2(%arg0: i32, %arg1: i32) -> (i32, i32) {
    %c0_i32 = arith.constant 0 : i32
    %c0_i32_0 = arith.constant 0 : i32
    return %c0_i32, %arg0 : i32, i32
  }
  func.func @transform_3(%arg0: i32, %arg1: i32) -> (i32, i32) {
    %c0_i32 = arith.constant 0 : i32
    %c0_i32_0 = arith.constant 0 : i32
    return %c0_i32, %arg0 : i32, i32
  }
  func.func @transform_4(%arg0: i32, %arg1: i32) -> (i32, i32) {
    %c0_i32 = arith.constant 0 : i32
    %c0_i32_0 = arith.constant 0 : i32
    return %c0_i32, %arg0 : i32, i32
  }
  func.func @transform_5(%arg0: i32, %arg1: i32) -> (i32, i32) {
    %c0_i32 = arith.constant 0 : i32
    %c0_i32_0 = arith.constant 0 : i32
    return %c0_i32, %arg0 : i32, i32
  }
}

module attributes {stable_mosaic.version = 11 : i64} {
  func.func @_conv_gemm_bn_relu_kernel(%arg0: i32, %arg1: i32, %arg2: memref<32x384xbf16, #tpu.memory_space<vmem>>, %arg3: memref<384x128xbf16, #tpu.memory_space<vmem>>, %arg4: memref<1x128xf32, #tpu.memory_space<vmem>>, %arg5: memref<1x128xf32, #tpu.memory_space<vmem>>, %arg6: memref<1x128xf32, #tpu.memory_space<vmem>>, %arg7: memref<32x128xf32, #tpu.memory_space<vmem>>, %arg8: memref<32x128xf32, #tpu.memory_space<vmem>>) attributes {dimension_semantics = [#tpu.dimension_semantics<parallel>, #tpu.dimension_semantics<arbitrary>], iteration_bounds = array<i64: 1, 3>, scalar_prefetch = 0 : i64, scratch_operands = 1 : i64, tpu.core_type = #tpu.core_type<tc>, window_params = [{transform_indices = @transform_0, window_bounds = array<i64: 32, 384>}, {transform_indices = @transform_1, window_bounds = array<i64: 384, 128>}, {transform_indices = @transform_2, window_bounds = array<i64: 1, 128>}, {transform_indices = @transform_3, window_bounds = array<i64: 1, 128>}, {transform_indices = @transform_4, window_bounds = array<i64: 1, 128>}, {transform_indices = @transform_5, window_bounds = array<i64: 32, 128>}]} {
    %c0_i32 = arith.constant 0 : i32
    %0 = arith.cmpi eq, %arg1, %c0_i32 : i32
    %1 = arith.extui %0 : i1 to i32
    %c0_i32_0 = arith.constant 0 : i32
    %2 = arith.cmpi ne, %1, %c0_i32_0 : i32
    scf.if %2 {
      %cst_9 = arith.constant 0.000000e+00 : f32
      %12 = vector.broadcast %cst_9 : f32 to vector<32x128xf32>
      %c0_10 = arith.constant 0 : index
      %c0_11 = arith.constant 0 : index
      %13 = vector.load %arg8[%c0_10, %c0_11] : memref<32x128xf32, #tpu.memory_space<vmem>>, vector<32x128xf32>
      tpu.vector_store %arg8[%c0_10, %c0_11], %12 {strides = array<i32>} : memref<32x128xf32, #tpu.memory_space<vmem>>, vector<32x128xf32>,
    } else {
    }
    %c0 = arith.constant 0 : index
    %c0_1 = arith.constant 0 : index
    %3 = vector.load %arg8[%c0, %c0_1] : memref<32x128xf32, #tpu.memory_space<vmem>>, vector<32x128xf32>
    %c0_2 = arith.constant 0 : index
    %c0_3 = arith.constant 0 : index
    %4 = vector.load %arg2[%c0_2, %c0_3] : memref<32x384xbf16, #tpu.memory_space<vmem>>, vector<32x384xbf16>
    %c0_4 = arith.constant 0 : index
    %c0_5 = arith.constant 0 : index
    %5 = vector.load %arg3[%c0_4, %c0_5] : memref<384x128xbf16, #tpu.memory_space<vmem>>, vector<384x128xbf16>
    %cst = arith.constant dense<0.000000e+00> : vector<32x128xf32>
    %6 = tpu.matmul %4, %5, %cst {dimension_numbers = #tpu.dot_dimension_numbers<[1], [0], [0], [1], [0, 0, 1, 1], [], []>} : vector<32x384xbf16>, vector<384x128xbf16>, vector<32x128xf32> -> vector<32x128xf32>
    %7 = arith.addf %3, %6 : vector<32x128xf32>
    %c0_6 = arith.constant 0 : index
    %c0_7 = arith.constant 0 : index
    %8 = vector.load %arg8[%c0_6, %c0_7] : memref<32x128xf32, #tpu.memory_space<vmem>>, vector<32x128xf32>
    tpu.vector_store %arg8[%c0_6, %c0_7], %7 {strides = array<i32>} : memref<32x128xf32, #tpu.memory_space<vmem>>, vector<32x128xf32>,
    %c2_i32 = arith.constant 2 : i32
    %9 = arith.cmpi eq, %arg1, %c2_i32 : i32
    %10 = arith.extui %9 : i1 to i32
    %c0_i32_8 = arith.constant 0 : i32
    %11 = arith.cmpi ne, %10, %c0_i32_8 : i32
    scf.if %11 {
      %c0_9 = arith.constant 0 : index
      %c0_10 = arith.constant 0 : index
      %12 = vector.load %arg8[%c0_9, %c0_10] : memref<32x128xf32, #tpu.memory_space<vmem>>, vector<32x128xf32>
      %c0_11 = arith.constant 0 : index
      %c0_12 = arith.constant 0 : index
      %13 = vector.load %arg4[%c0_11, %c0_12] : memref<1x128xf32, #tpu.memory_space<vmem>>, vector<1x128xf32>
      %14 = vector.broadcast %13 : vector<1x128xf32> to vector<32x128xf32>
      %15 = arith.addf %12, %14 : vector<32x128xf32>
      %16 = tpu.iota {dimensions = array<i32: 0>} : vector<32x128xi32>
      %c24_i32 = arith.constant 24 : i32
      %17 = vector.broadcast %c24_i32 : i32 to vector<32x128xi32>
      %18 = arith.cmpi slt, %16, %17 : vector<32x128xi32>
      %19 = arith.extui %18 : vector<32x128xi1> to vector<32x128xi32>
      %20 = arith.sitofp %19 : vector<32x128xi32> to vector<32x128xf32>
      %21 = arith.mulf %15, %20 : vector<32x128xf32>
      %cst_13 = arith.constant dense<0.000000e+00> : vector<128xf32>
      %22 = vector.multi_reduction <add>, %21, %cst_13 [0] : vector<32x128xf32> to vector<128xf32>
      %23 = vector.shape_cast %22 : vector<128xf32> to vector<1x128xf32>
      %cst_14 = arith.constant 0.0416666679 : f32
      %24 = vector.broadcast %cst_14 : f32 to vector<1x128xf32>
      %25 = arith.mulf %23, %24 : vector<1x128xf32>
      %26 = arith.mulf %21, %21 : vector<32x128xf32>
      %cst_15 = arith.constant dense<0.000000e+00> : vector<128xf32>
      %27 = vector.multi_reduction <add>, %26, %cst_15 [0] : vector<32x128xf32> to vector<128xf32>
      %28 = vector.shape_cast %27 : vector<128xf32> to vector<1x128xf32>
      %cst_16 = arith.constant 0.0416666679 : f32
      %29 = vector.broadcast %cst_16 : f32 to vector<1x128xf32>
      %30 = arith.mulf %28, %29 : vector<1x128xf32>
      %31 = arith.mulf %25, %25 : vector<1x128xf32>
      %32 = arith.subf %30, %31 : vector<1x128xf32>
      %cst_17 = arith.constant 0.000000e+00 : f32
      %33 = vector.broadcast %cst_17 : f32 to vector<1x128xf32>
      %34 = arith.maximumf %32, %33 : vector<1x128xf32>
      %c0_18 = arith.constant 0 : index
      %c0_19 = arith.constant 0 : index
      %35 = vector.load %arg5[%c0_18, %c0_19] : memref<1x128xf32, #tpu.memory_space<vmem>>, vector<1x128xf32>
      %cst_20 = arith.constant 9.99999974E-6 : f32
      %36 = vector.broadcast %cst_20 : f32 to vector<1x128xf32>
      %37 = arith.addf %34, %36 : vector<1x128xf32>
      %38 = math.rsqrt %37 : vector<1x128xf32>
      %39 = arith.mulf %35, %38 : vector<1x128xf32>
      %c0_21 = arith.constant 0 : index
      %c0_22 = arith.constant 0 : index
      %40 = vector.load %arg6[%c0_21, %c0_22] : memref<1x128xf32, #tpu.memory_space<vmem>>, vector<1x128xf32>
      %41 = arith.mulf %25, %39 : vector<1x128xf32>
      %42 = arith.subf %40, %41 : vector<1x128xf32>
      %43 = vector.broadcast %39 : vector<1x128xf32> to vector<32x128xf32>
      %44 = arith.mulf %15, %43 : vector<32x128xf32>
      %45 = vector.broadcast %42 : vector<1x128xf32> to vector<32x128xf32>
      %46 = arith.addf %44, %45 : vector<32x128xf32>
      %cst_23 = arith.constant 0.000000e+00 : f32
      %47 = vector.broadcast %cst_23 : f32 to vector<32x128xf32>
      %48 = arith.maximumf %46, %47 : vector<32x128xf32>
      %c0_24 = arith.constant 0 : index
      %c0_25 = arith.constant 0 : index
      %49 = vector.load %arg7[%c0_24, %c0_25] : memref<32x128xf32, #tpu.memory_space<vmem>>, vector<32x128xf32>
      tpu.vector_store %arg7[%c0_24, %c0_25], %48 {strides = array<i32>} : memref<32x128xf32, #tpu.memory_space<vmem>>, vector<32x128xf32>,
    } else {
    }
    return
  }
  func.func @transform_0(%arg0: i32, %arg1: i32) -> (i32, i32) {
    %c0_i32 = arith.constant 0 : i32
    %c0_i32_0 = arith.constant 0 : i32
    return %c0_i32, %arg1 : i32, i32
  }
  func.func @transform_1(%arg0: i32, %arg1: i32) -> (i32, i32) {
    %c0_i32 = arith.constant 0 : i32
    return %arg1, %arg0 : i32, i32
  }
  func.func @transform_2(%arg0: i32, %arg1: i32) -> (i32, i32) {
    %c0_i32 = arith.constant 0 : i32
    %c0_i32_0 = arith.constant 0 : i32
    return %c0_i32, %arg0 : i32, i32
  }
  func.func @transform_3(%arg0: i32, %arg1: i32) -> (i32, i32) {
    %c0_i32 = arith.constant 0 : i32
    %c0_i32_0 = arith.constant 0 : i32
    return %c0_i32, %arg0 : i32, i32
  }
  func.func @transform_4(%arg0: i32, %arg1: i32) -> (i32, i32) {
    %c0_i32 = arith.constant 0 : i32
    %c0_i32_0 = arith.constant 0 : i32
    return %c0_i32, %arg0 : i32, i32
  }
  func.func @transform_5(%arg0: i32, %arg1: i32) -> (i32, i32) {
    %c0_i32 = arith.constant 0 : i32
    %c0_i32_0 = arith.constant 0 : i32
    return %c0_i32, %arg0 : i32, i32
  }
}

module attributes {stable_mosaic.version = 11 : i64} {
  func.func @_linear_kernel(%arg0: memref<16x768xbf16, #tpu.memory_space<vmem>>, %arg1: memref<768x128xbf16, #tpu.memory_space<vmem>>, %arg2: memref<1x128xf32, #tpu.memory_space<vmem>>, %arg3: memref<16x128xf32, #tpu.memory_space<vmem>>) attributes {dimension_semantics = [], scalar_prefetch = 0 : i64, scratch_operands = 0 : i64, tpu.core_type = #tpu.core_type<tc>} {
    %c0 = arith.constant 0 : index
    %c0_0 = arith.constant 0 : index
    %0 = vector.load %arg0[%c0, %c0_0] : memref<16x768xbf16, #tpu.memory_space<vmem>>, vector<16x768xbf16>
    %c0_1 = arith.constant 0 : index
    %c0_2 = arith.constant 0 : index
    %1 = vector.load %arg1[%c0_1, %c0_2] : memref<768x128xbf16, #tpu.memory_space<vmem>>, vector<768x128xbf16>
    %cst = arith.constant dense<0.000000e+00> : vector<16x128xf32>
    %2 = tpu.matmul %0, %1, %cst {dimension_numbers = #tpu.dot_dimension_numbers<[1], [0], [0], [1], [0, 0, 1, 1], [], []>} : vector<16x768xbf16>, vector<768x128xbf16>, vector<16x128xf32> -> vector<16x128xf32>
    %c0_3 = arith.constant 0 : index
    %c0_4 = arith.constant 0 : index
    %3 = vector.load %arg2[%c0_3, %c0_4] : memref<1x128xf32, #tpu.memory_space<vmem>>, vector<1x128xf32>
    %4 = vector.broadcast %3 : vector<1x128xf32> to vector<16x128xf32>
    %5 = arith.addf %2, %4 : vector<16x128xf32>
    %c0_5 = arith.constant 0 : index
    %c0_6 = arith.constant 0 : index
    %6 = vector.load %arg3[%c0_5, %c0_6] : memref<16x128xf32, #tpu.memory_space<vmem>>, vector<16x128xf32>
    tpu.vector_store %arg3[%c0_5, %c0_6], %5 {strides = array<i32>} : memref<16x128xf32, #tpu.memory_space<vmem>>, vector<16x128xf32>,
    return
  }
}

</mosaic_0001>

<bundles_post_ra>
// kernel: _lambda_.5
= control target key start
LH: loop header
LB: loop body
LE: loop exit
PB: predicated region body
PF: predicated region fallthrough
CT: control target
= control target key end

     0   :  { %s4150_s0 = inlined_call_operand.vmem [shape: bf16[96,3072], index: 0, kind: input, shape index: {}]   ;;  %s4151_s1 = inlined_call_operand.vmem [shape: bf16[3072,512], index: 1, kind: input, shape index: {}]   ;;  %s4152_s2 = inlined_call_operand.vmem [shape: f32[1,512], index: 2, kind: input, shape index: {}]   ;;  %s4153_s3 = inlined_call_operand.vmem [shape: f32[1,512], index: 3, kind: input, shape index: {}]   ;;  %s4154_s4 = inlined_call_operand.vmem [shape: f32[1,512], index: 4, kind: input, shape index: {}]   ;;  %s4155_s5 = inlined_call_operand.vmem [shape: f32[96,512], index: 5, kind: output, shape index: {}]  }
   0x1   :  { %4159 = sst [smem:[#allocation9_spill]] %s4150_s0 }
   0x2   :  { %4160 = sst [smem:[#allocation10_spill]] %s4151_s1 }
   0x3   :  { %s3235_s18 = smov 0   ;;  %s3237_s19 = smov 0  }
   0x4   :  { %s3239_s20 = smov 0   ;;  %s3241_s21 = smov 0  }
   0x5   :  { %s3243_s22 = smov 0   ;;  %s3245_s23 = smov 0  }
   0x6   :  { %s3247_s24 = smov 0   ;;  %s3249_s25 = smov 0  }
   0x7   :  { %s3251_s26 = smov 0   ;;  %s3253_s27 = smov 0  }
   0x8   :  { %s3255_s28 = smov 0  }
   0x9 LB: > { %4161 = sst [smem:[#allocation6_spill]] %s3197_s27  ;;  %s2585_s29 = sadd.s32 4294967295, %s3201_s28   ;;  %s3201_s28 = sphi %s3255_s28, %s15_s28   ;;  %s3197_s27 = sphi %s3253_s27, %s4171_s27   ;;  %s3193_s26 = sphi %s3251_s26, %s4179_s26   ;;  %s3189_s25 = sphi %s3249_s25, %s4169_s25   ;;  %s3185_s24 = sphi %s3247_s24, %s4178_s24   ;;  %s3181_s23 = sphi %s3245_s23, %s4177_s23   ;;  %s3177_s22 = sphi %s3243_s22, %s4176_s22   ;;  %s3173_s21 = sphi %s3241_s21, %s4175_s21   ;;  %s3169_s20 = sphi %s3239_s20, %s4174_s20   ;;  %s3165_s19 = sphi %s3237_s19, %s4173_s19   ;;  %s3161_s18 = sphi %s3235_s18, %s4172_s18  }
   0xa   : > { %s24_s30 = sadd.s32 1, %s3193_s26  ;;  %s27_s6 = sadd.s32 1, %s3197_s27 }
   0xb   : > { %p25_p0 = scmp.ge.s32.totalorder %s24_s30, 4  ;;  %s34_s7 = sadd.s32 1, %s3181_s23 }
   0xc   : > { %p41_p1 = scmp.ne.s32.totalorder %s3181_s23, %s3177_s22  ;;  %p42_p2 = scmp.eq.s32.totalorder %s3201_s28, 0 }
   0xd   : > { %s4181_s30 = smov (%p25_p0, %s24_s30), 0  ;;  %s4183_s6 = smov (!%p25_p0, %s27_s6), %s3197_s27 }
   0xe   : > { %4162 = sst [smem:[#allocation7_spill]] %s4181_s30  ;;  %s31_s8 = ssub.s32 %s3193_s26, %s4181_s30 }
   0xf   : > { %p29_p3 = scmp.ge.s32.totalorder %s4183_s6, 2  ;;  %p32_p4 = scmp.eq.s32.totalorder %s31_s8, 0 }
  0x10   : > { %p3302_p5 = por %p42_p2, %p41_p1  ;;  %s62_s10 = sadd.s32 1, %s3173_s21 }
  0x11   : > { %s4185_s6 = smov (%p29_p3, %s4183_s6), 0  ;;  %p69_p6 = scmp.ne.s32.totalorder %s3173_s21, %s3169_s20 }
  0x12   : > { %4164 = sst [smem:[#allocation8_spill]] %s4185_s6  ;;  %s58_s12 = ssub.s32 %s3197_s27, %s4185_s6 }
  0x13   : > { %s3310_s11 = scalar_select %p32_p4, %s3181_s23, %s34_s7  }
  0x14   : > { %s59_s13 = sor.u32 %s58_s12, %s31_s8  ;;  %p164_p7 = scmp.eq.s32.totalorder %s58_s12, 0 }
  0x15   : > { %p60_p8 = scmp.eq.s32.totalorder %s59_s13, 0  ;;  %p3316_p9 = por %p69_p6, %p42_p2 }
  0x16   : > { %s166_s15 = sadd.s32 1, %s3165_s19  ;;  %p176_p10 = scmp.ne.s32.totalorder %s3165_s19, %s3161_s18 }
  0x17   : > { %s3324_s16 = scalar_select %p60_p8, %s3173_s21, %s62_s10  }
  0x18   : > { %s3327_s17 = scalar_select %p164_p7, %s3165_s19, %s166_s15  }
  0x19   : > { %p177_p11 = scmp.eq.s32.totalorder %s2585_s29, 7  ;;  %p2588_p13 = scmp.ge.s32.totalorder %s3201_s28, 8 }
  0x1b   : > { %p3329_p12 = por %p177_p11, %p176_p10  ;;  %199 = sbr.rel (%p2588_p13) target bundleno = 119 (0x77), region = 16 }
  0x22   : > { %202 = sbr.rel (!%p3302_p5) target bundleno = 61 (0x3d), region = 20  ;;  %s204_s7 = sand.u32 (%p3302_p5), 1, %s3181_s23  }
  0x23   : > { %s2735_s8 = smul.u32 (%p3302_p5), 24, %s3193_s26  ;;  %s4167_s0 = sld [smem:[#allocation9_spill]] (%p3302_p5) }
  0x24   : > { %s2818_s12 = smul.u32 (%p3302_p5), 288, %s204_s7 }
  0x26   : > { %s3346_s29 = scalar_lea.vmem (%p3302_p5), [#allocation3], %s2818_s12 }
  0x29   : > { %s3341_s15 = scalar_lea.vmem %s4167_s0, %s2735_s8 }
  0x2a   : > { %v222_v0 = vld [vmem:[%s3341_s15] sm:$0xff]  ;;  %v224_v1 = vld [vmem:[%s3341_s15 + $0x8] sm:$0xff]  ;;  %v226_v2 = vld [vmem:[%s3341_s15 + $0x10] sm:$0xff] }
  0x2b   : > { %223 = vst [vmem:[%s3346_s29] sm:$0xff] %v222_v0  ;;  %225 = vst [vmem:[%s3346_s29 + $0x8] sm:$0xff] %v224_v1  ;;  %v228_v3 = vld [vmem:[%s3341_s15 + $0x60] sm:$0xff]  ;;  %v230_v4 = vld [vmem:[%s3341_s15 + $0x68] sm:$0xff] }
  0x2c   : > { %227 = vst [vmem:[%s3346_s29 + $0x10] sm:$0xff] %v226_v2  ;;  %v232_v5 = vld [vmem:[%s3341_s15 + $0x70] sm:$0xff]  ;;  %229 = vst [vmem:[%s3346_s29 + $0x18] sm:$0xff] %v228_v3  ;;  %v234_v6 = vld [vmem:[%s3341_s15 + $0xc0] sm:$0xff] }
  0x2d   : > { %231 = vst [vmem:[%s3346_s29 + $0x20] sm:$0xff] %v230_v4  ;;  %233 = vst [vmem:[%s3346_s29 + $0x28] sm:$0xff] %v232_v5  ;;  %v236_v7 = vld [vmem:[%s3341_s15 + $0xc8] sm:$0xff]  ;;  %v238_v8 = vld [vmem:[%s3341_s15 + $0xd0] sm:$0xff] }
  0x2e   : > { %235 = vst [vmem:[%s3346_s29 + $0x30] sm:$0xff] %v234_v6  ;;  %237 = vst [vmem:[%s3346_s29 + $0x38] sm:$0xff] %v236_v7  ;;  %v240_v9 = vld [vmem:[%s3341_s15 + $0x120] sm:$0xff]  ;;  %v242_v10 = vld [vmem:[%s3341_s15 + $0x128] sm:$0xff] }
  0x2f   : > { %239 = vst [vmem:[%s3346_s29 + $0x40] sm:$0xff] %v238_v8  ;;  %v244_v11 = vld [vmem:[%s3341_s15 + $0x130] sm:$0xff]  ;;  %241 = vst [vmem:[%s3346_s29 + $0x48] sm:$0xff] %v240_v9  ;;  %v246_v12 = vld [vmem:[%s3341_s15 + $0x180] sm:$0xff] }
  0x30   : > { %243 = vst [vmem:[%s3346_s29 + $0x50] sm:$0xff] %v242_v10  ;;  %245 = vst [vmem:[%s3346_s29 + $0x58] sm:$0xff] %v244_v11  ;;  %v248_v13 = vld [vmem:[%s3341_s15 + $0x188] sm:$0xff]  ;;  %v250_v14 = vld [vmem:[%s3341_s15 + $0x190] sm:$0xff] }
  0x31   : > { %247 = vst [vmem:[%s3346_s29 + $0x60] sm:$0xff] %v246_v12  ;;  %249 = vst [vmem:[%s3346_s29 + $0x68] sm:$0xff] %v248_v13  ;;  %v252_v15 = vld [vmem:[%s3341_s15 + $0x1e0] sm:$0xff]  ;;  %v254_v16 = vld [vmem:[%s3341_s15 + $0x1e8] sm:$0xff] }
  0x32   : > { %251 = vst [vmem:[%s3346_s29 + $0x70] sm:$0xff] %v250_v14  ;;  %v256_v17 = vld [vmem:[%s3341_s15 + $0x1f0] sm:$0xff]  ;;  %253 = vst [vmem:[%s3346_s29 + $0x78] sm:$0xff] %v252_v15  ;;  %v258_v18 = vld [vmem:[%s3341_s15 + $0x240] sm:$0xff] }
  0x33   : > { %255 = vst [vmem:[%s3346_s29 + $0x80] sm:$0xff] %v254_v16  ;;  %257 = vst [vmem:[%s3346_s29 + $0x88] sm:$0xff] %v256_v17  ;;  %v260_v19 = vld [vmem:[%s3341_s15 + $0x248] sm:$0xff]  ;;  %v262_v20 = vld [vmem:[%s3341_s15 + $0x250] sm:$0xff] }
  0x34   : > { %259 = vst [vmem:[%s3346_s29 + $0x90] sm:$0xff] %v258_v18  ;;  %261 = vst [vmem:[%s3346_s29 + $0x98] sm:$0xff] %v260_v19  ;;  %v264_v21 = vld [vmem:[%s3341_s15 + $0x2a0] sm:$0xff]  ;;  %v266_v22 = vld [vmem:[%s3341_s15 + $0x2a8] sm:$0xff] }
  0x35   : > { %263 = vst [vmem:[%s3346_s29 + $0xa0] sm:$0xff] %v262_v20  ;;  %v268_v23 = vld [vmem:[%s3341_s15 + $0x2b0] sm:$0xff]  ;;  %265 = vst [vmem:[%s3346_s29 + $0xa8] sm:$0xff] %v264_v21  ;;  %v270_v24 = vld [vmem:[%s3341_s15 + $0x300] sm:$0xff] }
  0x36   : > { %267 = vst [vmem:[%s3346_s29 + $0xb0] sm:$0xff] %v266_v22  ;;  %269 = vst [vmem:[%s3346_s29 + $0xb8] sm:$0xff] %v268_v23  ;;  %v272_v25 = vld [vmem:[%s3341_s15 + $0x308] sm:$0xff]  ;;  %v274_v26 = vld [vmem:[%s3341_s15 + $0x310] sm:$0xff] }
  0x37   : > { %271 = vst [vmem:[%s3346_s29 + $0xc0] sm:$0xff] %v270_v24  ;;  %273 = vst [vmem:[%s3346_s29 + $0xc8] sm:$0xff] %v272_v25  ;;  %v276_v27 = vld [vmem:[%s3341_s15 + $0x360] sm:$0xff]  ;;  %v278_v28 = vld [vmem:[%s3341_s15 + $0x368] sm:$0xff] }
  0x38   : > { %275 = vst [vmem:[%s3346_s29 + $0xd0] sm:$0xff] %v274_v26  ;;  %v280_v29 = vld [vmem:[%s3341_s15 + $0x370] sm:$0xff]  ;;  %277 = vst [vmem:[%s3346_s29 + $0xd8] sm:$0xff] %v276_v27  ;;  %v282_v30 = vld [vmem:[%s3341_s15 + $0x3c0] sm:$0xff] }
  0x39   : > { %279 = vst [vmem:[%s3346_s29 + $0xe0] sm:$0xff] %v278_v28  ;;  %281 = vst [vmem:[%s3346_s29 + $0xe8] sm:$0xff] %v280_v29  ;;  %v284_v31 = vld [vmem:[%s3341_s15 + $0x3c8] sm:$0xff]  ;;  %v286_v32 = vld [vmem:[%s3341_s15 + $0x3d0] sm:$0xff] }
  0x3a   : > { %283 = vst [vmem:[%s3346_s29 + $0xf0] sm:$0xff] %v282_v30  ;;  %285 = vst [vmem:[%s3346_s29 + $0xf8] sm:$0xff] %v284_v31  ;;  %v288_v33 = vld [vmem:[%s3341_s15 + $0x420] sm:$0xff]  ;;  %v290_v34 = vld [vmem:[%s3341_s15 + $0x428] sm:$0xff] }
  0x3b   : > { %287 = vst [vmem:[%s3346_s29 + $0x100] sm:$0xff] %v286_v32  ;;  %v292_v35 = vld [vmem:[%s3341_s15 + $0x430] sm:$0xff]  ;;  %289 = vst [vmem:[%s3346_s29 + $0x108] sm:$0xff] %v288_v33 }
  0x3c   : > { %291 = vst [vmem:[%s3346_s29 + $0x110] sm:$0xff] %v290_v34  ;;  %293 = vst [vmem:[%s3346_s29 + $0x118] sm:$0xff] %v292_v35 }
  0x3d PF: > { %299 = sbr.rel (!%p3316_p9) target bundleno = 119 (0x77), region = 43  ;;  %s301_s9 = sand.u32 (%p3316_p9), 1, %s3173_s21  }
  0x3e   : > { %s2819_s7 = smul.u32 (%p3316_p9), 768, %s301_s9  ;;  %s2590_s8 = sshll.u32 (%p3316_p9), %s3197_s27, 1 }
  0x3f   : > { %s2736_s12 = smul.u32 (%p3316_p9), 384, %s3193_s26  ;;  %s4168_s1 = sld [smem:[#allocation10_spill]] (%p3316_p9) }
  0x40   : > { %s3430_s14 = scalar_lea.vmem (%p3316_p9), [#allocation4], %s2819_s7 }
  0x41   : > { %s307_s10 = sadd.s32 (%p3316_p9), %s2736_s12, %s2590_s8 }
  0x42   : > { %s2592_s13 = sshll.u32 (%p3316_p9), %s307_s10, 2 }
  0x45   : > { %s3425_s15 = scalar_lea.vmem %s4168_s1, %s2592_s13 }
  0x46   : > { %v527_v36 = vld [vmem:[%s3425_s15] sm:$0xff]  ;;  %v529_v37 = vld [vmem:[%s3425_s15 + $0x10] sm:$0xff] }
  0x47   : > { %v531_v38 = vld [vmem:[%s3425_s15 + $0x20] sm:$0xff]  ;;  %528 = vst [vmem:[%s3430_s14] sm:$0xff] %v527_v36  ;;  %530 = vst [vmem:[%s3430_s14 + $0x8] sm:$0xff] %v529_v37  ;;  %v533_v39 = vld [vmem:[%s3425_s15 + $0x30] sm:$0xff] }
  0x48   : > { %532 = vst [vmem:[%s3430_s14 + $0x10] sm:$0xff] %v531_v38  ;;  %v535_v40 = vld [vmem:[%s3425_s15 + $0x40] sm:$0xff]  ;;  %v537_v41 = vld [vmem:[%s3425_s15 + $0x50] sm:$0xff]  ;;  %534 = vst [vmem:[%s3430_s14 + $0x18] sm:$0xff] %v533_v39 }
  0x49   : > { %536 = vst [vmem:[%s3430_s14 + $0x20] sm:$0xff] %v535_v40  ;;  %538 = vst [vmem:[%s3430_s14 + $0x28] sm:$0xff] %v537_v41  ;;  %v539_v42 = vld [vmem:[%s3425_s15 + $0x60] sm:$0xff]  ;;  %v541_v43 = vld [vmem:[%s3425_s15 + $0x70] sm:$0xff] }
  0x4a   : > { %v543_v44 = vld [vmem:[%s3425_s15 + $0x80] sm:$0xff]  ;;  %540 = vst [vmem:[%s3430_s14 + $0x30] sm:$0xff] %v539_v42  ;;  %542 = vst [vmem:[%s3430_s14 + $0x38] sm:$0xff] %v541_v43  ;;  %v545_v45 = vld [vmem:[%s3425_s15 + $0x90] sm:$0xff] }
  0x4b   : > { %544 = vst [vmem:[%s3430_s14 + $0x40] sm:$0xff] %v543_v44  ;;  %v547_v46 = vld [vmem:[%s3425_s15 + $0xa0] sm:$0xff]  ;;  %v549_v47 = vld [vmem:[%s3425_s15 + $0xb0] sm:$0xff]  ;;  %546 = vst [vmem:[%s3430_s14 + $0x48] sm:$0xff] %v545_v45 }
  0x4c   : > { %548 = vst [vmem:[%s3430_s14 + $0x50] sm:$0xff] %v547_v46  ;;  %550 = vst [vmem:[%s3430_s14 + $0x58] sm:$0xff] %v549_v47  ;;  %v551_v48 = vld [vmem:[%s3425_s15 + $0xc0] sm:$0xff]  ;;  %v553_v49 = vld [vmem:[%s3425_s15 + $0xd0] sm:$0xff] }
  0x4d   : > { %v555_v50 = vld [vmem:[%s3425_s15 + $0xe0] sm:$0xff]  ;;  %552 = vst [vmem:[%s3430_s14 + $0x60] sm:$0xff] %v551_v48  ;;  %554 = vst [vmem:[%s3430_s14 + $0x68] sm:$0xff] %v553_v49  ;;  %v557_v51 = vld [vmem:[%s3425_s15 + $0xf0] sm:$0xff] }
  0x4e   : > { %556 = vst [vmem:[%s3430_s14 + $0x70] sm:$0xff] %v555_v50  ;;  %v559_v52 = vld [vmem:[%s3425_s15 + $0x100] sm:$0xff]  ;;  %v561_v53 = vld [vmem:[%s3425_s15 + $0x110] sm:$0xff]  ;;  %558 = vst [vmem:[%s3430_s14 + $0x78] sm:$0xff] %v557_v51 }
  0x4f   : > { %560 = vst [vmem:[%s3430_s14 + $0x80] sm:$0xff] %v559_v52  ;;  %562 = vst [vmem:[%s3430_s14 + $0x88] sm:$0xff] %v561_v53  ;;  %v563_v54 = vld [vmem:[%s3425_s15 + $0x120] sm:$0xff]  ;;  %v565_v55 = vld [vmem:[%s3425_s15 + $0x130] sm:$0xff] }
  0x50   : > { %v567_v56 = vld [vmem:[%s3425_s15 + $0x140] sm:$0xff]  ;;  %564 = vst [vmem:[%s3430_s14 + $0x90] sm:$0xff] %v563_v54  ;;  %566 = vst [vmem:[%s3430_s14 + $0x98] sm:$0xff] %v565_v55  ;;  %v569_v57 = vld [vmem:[%s3425_s15 + $0x150] sm:$0xff] }
  0x51   : > { %568 = vst [vmem:[%s3430_s14 + $0xa0] sm:$0xff] %v567_v56  ;;  %v571_v58 = vld [vmem:[%s3425_s15 + $0x160] sm:$0xff]  ;;  %v573_v59 = vld [vmem:[%s3425_s15 + $0x170] sm:$0xff]  ;;  %570 = vst [vmem:[%s3430_s14 + $0xa8] sm:$0xff] %v569_v57 }
  0x52   : > { %572 = vst [vmem:[%s3430_s14 + $0xb0] sm:$0xff] %v571_v58  ;;  %574 = vst [vmem:[%s3430_s14 + $0xb8] sm:$0xff] %v573_v59  ;;  %v575_v60 = vld [vmem:[%s3425_s15 + $0x180] sm:$0xff]  ;;  %v577_v61 = vld [vmem:[%s3425_s15 + $0x190] sm:$0xff] }
  0x53   : > { %v579_v62 = vld [vmem:[%s3425_s15 + $0x1a0] sm:$0xff]  ;;  %576 = vst [vmem:[%s3430_s14 + $0xc0] sm:$0xff] %v575_v60  ;;  %578 = vst [vmem:[%s3430_s14 + $0xc8] sm:$0xff] %v577_v61  ;;  %v581_v63 = vld [vmem:[%s3425_s15 + $0x1b0] sm:$0xff] }
  0x54   : > { %580 = vst [vmem:[%s3430_s14 + $0xd0] sm:$0xff] %v579_v62  ;;  %v583_v0 = vld [vmem:[%s3425_s15 + $0x1c0] sm:$0xff]  ;;  %v585_v1 = vld [vmem:[%s3425_s15 + $0x1d0] sm:$0xff]  ;;  %582 = vst [vmem:[%s3430_s14 + $0xd8] sm:$0xff] %v581_v63 }
  0x55   : > { %584 = vst [vmem:[%s3430_s14 + $0xe0] sm:$0xff] %v583_v0  ;;  %586 = vst [vmem:[%s3430_s14 + $0xe8] sm:$0xff] %v585_v1  ;;  %v587_v2 = vld [vmem:[%s3425_s15 + $0x1e0] sm:$0xff]  ;;  %v589_v3 = vld [vmem:[%s3425_s15 + $0x1f0] sm:$0xff] }
  0x56   : > { %v591_v4 = vld [vmem:[%s3425_s15 + $0x200] sm:$0xff]  ;;  %588 = vst [vmem:[%s3430_s14 + $0xf0] sm:$0xff] %v587_v2  ;;  %590 = vst [vmem:[%s3430_s14 + $0xf8] sm:$0xff] %v589_v3  ;;  %v593_v5 = vld [vmem:[%s3425_s15 + $0x210] sm:$0xff] }
  0x57   : > { %592 = vst [vmem:[%s3430_s14 + $0x100] sm:$0xff] %v591_v4  ;;  %v595_v6 = vld [vmem:[%s3425_s15 + $0x220] sm:$0xff]  ;;  %v597_v7 = vld [vmem:[%s3425_s15 + $0x230] sm:$0xff]  ;;  %594 = vst [vmem:[%s3430_s14 + $0x108] sm:$0xff] %v593_v5 }
  0x58   : > { %596 = vst [vmem:[%s3430_s14 + $0x110] sm:$0xff] %v595_v6  ;;  %598 = vst [vmem:[%s3430_s14 + $0x118] sm:$0xff] %v597_v7  ;;  %v599_v8 = vld [vmem:[%s3425_s15 + $0x240] sm:$0xff]  ;;  %v601_v9 = vld [vmem:[%s3425_s15 + $0x250] sm:$0xff] }
  0x59   : > { %v603_v10 = vld [vmem:[%s3425_s15 + $0x260] sm:$0xff]  ;;  %600 = vst [vmem:[%s3430_s14 + $0x120] sm:$0xff] %v599_v8  ;;  %602 = vst [vmem:[%s3430_s14 + $0x128] sm:$0xff] %v601_v9  ;;  %v605_v11 = vld [vmem:[%s3425_s15 + $0x270] sm:$0xff] }
  0x5a   : > { %604 = vst [vmem:[%s3430_s14 + $0x130] sm:$0xff] %v603_v10  ;;  %v607_v12 = vld [vmem:[%s3425_s15 + $0x280] sm:$0xff]  ;;  %v609_v13 = vld [vmem:[%s3425_s15 + $0x290] sm:$0xff]  ;;  %606 = vst [vmem:[%s3430_s14 + $0x138] sm:$0xff] %v605_v11 }
  0x5b   : > { %608 = vst [vmem:[%s3430_s14 + $0x140] sm:$0xff] %v607_v12  ;;  %610 = vst [vmem:[%s3430_s14 + $0x148] sm:$0xff] %v609_v13  ;;  %v611_v14 = vld [vmem:[%s3425_s15 + $0x2a0] sm:$0xff]  ;;  %v613_v15 = vld [vmem:[%s3425_s15 + $0x2b0] sm:$0xff] }
  0x5c   : > { %v615_v16 = vld [vmem:[%s3425_s15 + $0x2c0] sm:$0xff]  ;;  %612 = vst [vmem:[%s3430_s14 + $0x150] sm:$0xff] %v611_v14  ;;  %614 = vst [vmem:[%s3430_s14 + $0x158] sm:$0xff] %v613_v15  ;;  %v617_v17 = vld [vmem:[%s3425_s15 + $0x2d0] sm:$0xff] }
  0x5d   : > { %616 = vst [vmem:[%s3430_s14 + $0x160] sm:$0xff] %v615_v16  ;;  %v619_v18 = vld [vmem:[%s3425_s15 + $0x2e0] sm:$0xff]  ;;  %v621_v19 = vld [vmem:[%s3425_s15 + $0x2f0] sm:$0xff]  ;;  %618 = vst [vmem:[%s3430_s14 + $0x168] sm:$0xff] %v617_v17 }
  0x5e   : > { %620 = vst [vmem:[%s3430_s14 + $0x170] sm:$0xff] %v619_v18  ;;  %622 = vst [vmem:[%s3430_s14 + $0x178] sm:$0xff] %v621_v19  ;;  %v623_v20 = vld [vmem:[%s3425_s15 + $0x300] sm:$0xff]  ;;  %v625_v21 = vld [vmem:[%s3425_s15 + $0x310] sm:$0xff] }
  0x5f   : > { %v627_v22 = vld [vmem:[%s3425_s15 + $0x320] sm:$0xff]  ;;  %624 = vst [vmem:[%s3430_s14 + $0x180] sm:$0xff] %v623_v20  ;;  %626 = vst [vmem:[%s3430_s14 + $0x188] sm:$0xff] %v625_v21  ;;  %v629_v23 = vld [vmem:[%s3425_s15 + $0x330] sm:$0xff] }
  0x60   : > { %628 = vst [vmem:[%s3430_s14 + $0x190] sm:$0xff] %v627_v22  ;;  %v631_v24 = vld [vmem:[%s3425_s15 + $0x340] sm:$0xff]  ;;  %v633_v25 = vld [vmem:[%s3425_s15 + $0x350] sm:$0xff]  ;;  %630 = vst [vmem:[%s3430_s14 + $0x198] sm:$0xff] %v629_v23 }
  0x61   : > { %632 = vst [vmem:[%s3430_s14 + $0x1a0] sm:$0xff] %v631_v24  ;;  %634 = vst [vmem:[%s3430_s14 + $0x1a8] sm:$0xff] %v633_v25  ;;  %v635_v26 = vld [vmem:[%s3425_s15 + $0x360] sm:$0xff]  ;;  %v637_v27 = vld [vmem:[%s3425_s15 + $0x370] sm:$0xff] }
  0x62   : > { %v639_v28 = vld [vmem:[%s3425_s15 + $0x380] sm:$0xff]  ;;  %636 = vst [vmem:[%s3430_s14 + $0x1b0] sm:$0xff] %v635_v26  ;;  %638 = vst [vmem:[%s3430_s14 + $0x1b8] sm:$0xff] %v637_v27  ;;  %v641_v29 = vld [vmem:[%s3425_s15 + $0x390] sm:$0xff] }
  0x63   : > { %640 = vst [vmem:[%s3430_s14 + $0x1c0] sm:$0xff] %v639_v28  ;;  %v643_v30 = vld [vmem:[%s3425_s15 + $0x3a0] sm:$0xff]  ;;  %v645_v31 = vld [vmem:[%s3425_s15 + $0x3b0] sm:$0xff]  ;;  %642 = vst [vmem:[%s3430_s14 + $0x1c8] sm:$0xff] %v641_v29 }
  0x64   : > { %644 = vst [vmem:[%s3430_s14 + $0x1d0] sm:$0xff] %v643_v30  ;;  %646 = vst [vmem:[%s3430_s14 + $0x1d8] sm:$0xff] %v645_v31  ;;  %v647_v32 = vld [vmem:[%s3425_s15 + $0x3c0] sm:$0xff]  ;;  %v649_v33 = vld [vmem:[%s3425_s15 + $0x3d0] sm:$0xff] }
  0x65   : > { %v651_v34 = vld [vmem:[%s3425_s15 + $0x3e0] sm:$0xff]  ;;  %648 = vst [vmem:[%s3430_s14 + $0x1e0] sm:$0xff] %v647_v32  ;;  %650 = vst [vmem:[%s3430_s14 + $0x1e8] sm:$0xff] %v649_v33  ;;  %v653_v35 = vld [vmem:[%s3425_s15 + $0x3f0] sm:$0xff] }
  0x66   : > { %652 = vst [vmem:[%s3430_s14 + $0x1f0] sm:$0xff] %v651_v34  ;;  %v655_v36 = vld [vmem:[%s3425_s15 + $0x400] sm:$0xff]  ;;  %v657_v37 = vld [vmem:[%s3425_s15 + $0x410] sm:$0xff]  ;;  %654 = vst [vmem:[%s3430_s14 + $0x1f8] sm:$0xff] %v653_v35 }
  0x67   : > { %656 = vst [vmem:[%s3430_s14 + $0x200] sm:$0xff] %v655_v36  ;;  %658 = vst [vmem:[%s3430_s14 + $0x208] sm:$0xff] %v657_v37  ;;  %v659_v38 = vld [vmem:[%s3425_s15 + $0x420] sm:$0xff]  ;;  %v661_v39 = vld [vmem:[%s3425_s15 + $0x430] sm:$0xff] }
  0x68   : > { %v663_v40 = vld [vmem:[%s3425_s15 + $0x440] sm:$0xff]  ;;  %660 = vst [vmem:[%s3430_s14 + $0x210] sm:$0xff] %v659_v38  ;;  %662 = vst [vmem:[%s3430_s14 + $0x218] sm:$0xff] %v661_v39  ;;  %v665_v41 = vld [vmem:[%s3425_s15 + $0x450] sm:$0xff] }
  0x69   : > { %664 = vst [vmem:[%s3430_s14 + $0x220] sm:$0xff] %v663_v40  ;;  %v667_v42 = vld [vmem:[%s3425_s15 + $0x460] sm:$0xff]  ;;  %v669_v43 = vld [vmem:[%s3425_s15 + $0x470] sm:$0xff]  ;;  %666 = vst [vmem:[%s3430_s14 + $0x228] sm:$0xff] %v665_v41 }
  0x6a   : > { %668 = vst [vmem:[%s3430_s14 + $0x230] sm:$0xff] %v667_v42  ;;  %670 = vst [vmem:[%s3430_s14 + $0x238] sm:$0xff] %v669_v43  ;;  %v671_v44 = vld [vmem:[%s3425_s15 + $0x480] sm:$0xff]  ;;  %v673_v45 = vld [vmem:[%s3425_s15 + $0x490] sm:$0xff] }
  0x6b   : > { %v675_v46 = vld [vmem:[%s3425_s15 + $0x4a0] sm:$0xff]  ;;  %672 = vst [vmem:[%s3430_s14 + $0x240] sm:$0xff] %v671_v44  ;;  %674 = vst [vmem:[%s3430_s14 + $0x248] sm:$0xff] %v673_v45  ;;  %v677_v47 = vld [vmem:[%s3425_s15 + $0x4b0] sm:$0xff] }
  0x6c   : > { %676 = vst [vmem:[%s3430_s14 + $0x250] sm:$0xff] %v675_v46  ;;  %v679_v48 = vld [vmem:[%s3425_s15 + $0x4c0] sm:$0xff]  ;;  %v681_v49 = vld [vmem:[%s3425_s15 + $0x4d0] sm:$0xff]  ;;  %678 = vst [vmem:[%s3430_s14 + $0x258] sm:$0xff] %v677_v47 }
  0x6d   : > { %680 = vst [vmem:[%s3430_s14 + $0x260] sm:$0xff] %v679_v48  ;;  %682 = vst [vmem:[%s3430_s14 + $0x268] sm:$0xff] %v681_v49  ;;  %v683_v50 = vld [vmem:[%s3425_s15 + $0x4e0] sm:$0xff]  ;;  %v685_v51 = vld [vmem:[%s3425_s15 + $0x4f0] sm:$0xff] }
  0x6e   : > { %v687_v52 = vld [vmem:[%s3425_s15 + $0x500] sm:$0xff]  ;;  %684 = vst [vmem:[%s3430_s14 + $0x270] sm:$0xff] %v683_v50  ;;  %686 = vst [vmem:[%s3430_s14 + $0x278] sm:$0xff] %v685_v51  ;;  %v689_v53 = vld [vmem:[%s3425_s15 + $0x510] sm:$0xff] }
  0x6f   : > { %688 = vst [vmem:[%s3430_s14 + $0x280] sm:$0xff] %v687_v52  ;;  %v691_v54 = vld [vmem:[%s3425_s15 + $0x520] sm:$0xff]  ;;  %v693_v55 = vld [vmem:[%s3425_s15 + $0x530] sm:$0xff]  ;;  %690 = vst [vmem:[%s3430_s14 + $0x288] sm:$0xff] %v689_v53 }
  0x70   : > { %692 = vst [vmem:[%s3430_s14 + $0x290] sm:$0xff] %v691_v54  ;;  %694 = vst [vmem:[%s3430_s14 + $0x298] sm:$0xff] %v693_v55  ;;  %v695_v56 = vld [vmem:[%s3425_s15 + $0x540] sm:$0xff]  ;;  %v697_v57 = vld [vmem:[%s3425_s15 + $0x550] sm:$0xff] }
  0x71   : > { %v699_v58 = vld [vmem:[%s3425_s15 + $0x560] sm:$0xff]  ;;  %696 = vst [vmem:[%s3430_s14 + $0x2a0] sm:$0xff] %v695_v56  ;;  %698 = vst [vmem:[%s3430_s14 + $0x2a8] sm:$0xff] %v697_v57  ;;  %v701_v59 = vld [vmem:[%s3425_s15 + $0x570] sm:$0xff] }
  0x72   : > { %700 = vst [vmem:[%s3430_s14 + $0x2b0] sm:$0xff] %v699_v58  ;;  %v703_v60 = vld [vmem:[%s3425_s15 + $0x580] sm:$0xff]  ;;  %v705_v61 = vld [vmem:[%s3425_s15 + $0x590] sm:$0xff]  ;;  %702 = vst [vmem:[%s3430_s14 + $0x2b8] sm:$0xff] %v701_v59 }
  0x73   : > { %704 = vst [vmem:[%s3430_s14 + $0x2c0] sm:$0xff] %v703_v60  ;;  %706 = vst [vmem:[%s3430_s14 + $0x2c8] sm:$0xff] %v705_v61  ;;  %v707_v62 = vld [vmem:[%s3425_s15 + $0x5a0] sm:$0xff]  ;;  %v709_v63 = vld [vmem:[%s3425_s15 + $0x5b0] sm:$0xff] }
  0x74   : > { %v711_v0 = vld [vmem:[%s3425_s15 + $0x5c0] sm:$0xff]  ;;  %708 = vst [vmem:[%s3430_s14 + $0x2d0] sm:$0xff] %v707_v62  ;;  %710 = vst [vmem:[%s3430_s14 + $0x2d8] sm:$0xff] %v709_v63  ;;  %v713_v1 = vld [vmem:[%s3425_s15 + $0x5d0] sm:$0xff] }
  0x75   : > { %712 = vst [vmem:[%s3430_s14 + $0x2e0] sm:$0xff] %v711_v0  ;;  %v715_v2 = vld [vmem:[%s3425_s15 + $0x5e0] sm:$0xff]  ;;  %v717_v3 = vld [vmem:[%s3425_s15 + $0x5f0] sm:$0xff]  ;;  %714 = vst [vmem:[%s3430_s14 + $0x2e8] sm:$0xff] %v713_v1 }
  0x76   : > { %716 = vst [vmem:[%s3430_s14 + $0x2f0] sm:$0xff] %v715_v2  ;;  %718 = vst [vmem:[%s3430_s14 + $0x2f8] sm:$0xff] %v717_v3 }
  0x77 PF: > { %p2593_p0 = scmp.ge.s32.totalorder %s3201_s28, 1  ;;  %p747_p1 = scmp.lt.s32.totalorder %s3201_s28, 9 }
  0x79   : > { %p748_p2 = pnand %p2593_p0, %p747_p1 }
  0x7a   : > { %s754_s0 = sand.u32 (!%p748_p2), 1, %s3177_s22   ;;  %s761_s6 = sand.u32 (!%p748_p2), 1, %s3169_s20  }
  0x7b   : > { %751 = sbr.rel (%p748_p2) target bundleno = 625 (0x271), region = 93  ;;  %s800_s9 = sand.u32 (!%p748_p2), 1, %s3161_s18  }
  0x7c   : > { %s2820_s29 = smul.u32 (!%p748_p2), 288, %s754_s0  ;;  %s2594_s8 = sshll.u32 (!%p748_p2), %s3189_s25, 1 }
  0x7d   : > { %s2821_s7 = smul.u32 (!%p748_p2), 768, %s761_s6  ;;  %p807_p3 = scmp.lt.s32.totalorder (!%p748_p2), %s2594_s8, 3 }
  0x7e   : > { %s2822_s12 = smul.u32 (!%p748_p2), 192, %s800_s9  ;;  %s3641_s6 = scalar_lea.vmem (!%p748_p2), [#allocation3], %s2820_s29 }
  0x7f   : > { %s3643_s9 = scalar_lea.vmem (!%p748_p2), [#allocation4], %s2821_s7  ;;  %p2597_p4 = scmp.ne.s32.totalorder (!%p748_p2), %s3185_s24, 0 }
  0x80   : > { %s3645_s27 = scalar_lea.vmem (!%p748_p2), [#allocation5], %s2822_s12 }
  0x82   : > { %s4187_s8 = smov (!%p807_p3, %s2594_s8), 3  ;;  %825 = sbr.rel (%p2597_p4) target bundleno = 144 (0x90), region = 105 }
  0x83   : > { %s809_s15 = scalar_lea.vmem %s4152_s2, %s4187_s8  ;;  %s814_s22 = scalar_lea.vmem %s4153_s3, %s4187_s8  ;;  %v3203_v4 = vmov (!%p2597_p4), 0.0  }
  0x84   : > { %s819_s18 = scalar_lea.vmem %s4154_s4, %s4187_s8  ;;  %826 = vst [vmem:[#allocation2] sm:$0xff] (!%p2597_p4), %v3203_v4  ;;  %827 = vst [vmem:[#allocation2 + $0x8] sm:$0xff] (!%p2597_p4), %v3203_v4 }
  0x85   : > { %828 = vst [vmem:[#allocation2 + $0x10] sm:$0xff] (!%p2597_p4), %v3203_v4  ;;  %829 = vst [vmem:[#allocation2 + $0x18] sm:$0xff] (!%p2597_p4), %v3203_v4 }
  0x86   : > { %830 = vst [vmem:[#allocation2 + $0x20] sm:$0xff] (!%p2597_p4), %v3203_v4  ;;  %831 = vst [vmem:[#allocation2 + $0x28] sm:$0xff] (!%p2597_p4), %v3203_v4 }
  0x87   : > { %832 = vst [vmem:[#allocation2 + $0x30] sm:$0xff] (!%p2597_p4), %v3203_v4  ;;  %833 = vst [vmem:[#allocation2 + $0x38] sm:$0xff] (!%p2597_p4), %v3203_v4 }
  0x88   : > { %834 = vst [vmem:[#allocation2 + $0x40] sm:$0xff] (!%p2597_p4), %v3203_v4  ;;  %835 = vst [vmem:[#allocation2 + $0x48] sm:$0xff] (!%p2597_p4), %v3203_v4 }
  0x89   : > { %836 = vst [vmem:[#allocation2 + $0x50] sm:$0xff] %v3203_v4  ;;  %837 = vst [vmem:[#allocation2 + $0x58] sm:$0xff] %v3203_v4 }
  0x8a   : > { %838 = vst [vmem:[#allocation2 + $0x60] sm:$0xff] %v3203_v4  ;;  %839 = vst [vmem:[#allocation2 + $0x68] sm:$0xff] %v3203_v4 }
  0x8b   : > { %840 = vst [vmem:[#allocation2 + $0x70] sm:$0xff] %v3203_v4  ;;  %841 = vst [vmem:[#allocation2 + $0x78] sm:$0xff] %v3203_v4 }
  0x8c   : > { %842 = vst [vmem:[#allocation2 + $0x80] sm:$0xff] %v3203_v4  ;;  %843 = vst [vmem:[#allocation2 + $0x88] sm:$0xff] %v3203_v4 }
  0x8d   : > { %844 = vst [vmem:[#allocation2 + $0x90] sm:$0xff] %v3203_v4  ;;  %845 = vst [vmem:[#allocation2 + $0x98] sm:$0xff] %v3203_v4 }
  0x8e   : > { %846 = vst [vmem:[#allocation2 + $0xa0] sm:$0xff] %v3203_v4  ;;  %847 = vst [vmem:[#allocation2 + $0xa8] sm:$0xff] %v3203_v4 }
  0x8f   : > { %848 = vst [vmem:[#allocation2 + $0xb0] sm:$0xff] %v3203_v4  ;;  %849 = vst [vmem:[#allocation2 + $0xb8] sm:$0xff] %v3203_v4 }
  0x90 PF: > { %v2913_v5 = vld [vmem:[%s3643_s9 + $0x4] ss:$8 sps:$4 sm:$0xff]   ;;  %v2917_v7 = vld [vmem:[%s3643_s9] ss:$8 sps:$4 sm:$0xff]   ;;  %v2919_v9 = vld [vmem:[%s3643_s9 + $0x14] ss:$8 sps:$4 sm:$0xff]  }
  0x91   : > { %v2915_v6 = vld [vmem:[%s3643_s9 + $0x104] ss:$8 sps:$4 sm:$0xff]   ;;  %1666 = vmatprep.subr.bf16.mxu1 %v2913_v5  ;;  %v2918_v8 = vld [vmem:[%s3643_s9 + $0x100] ss:$8 sps:$4 sm:$0xff]   ;;  %v2921_v10 = vld [vmem:[%s3643_s9 + $0x114] ss:$8 sps:$4 sm:$0xff]  }
  0x92   : > { %1759 = vmatprep.subr.bf16.mxu0 %v2915_v6  ;;  %1667 = vmatpush1.bf16.msra.mxu1 %v2917_v7  ;;  %v2923_v11 = vld [vmem:[%s3643_s9 + $0x10] ss:$8 sps:$4 sm:$0xff]   ;;  %v2925_v13 = vld [vmem:[%s3643_s9 + $0x24] ss:$8 sps:$4 sm:$0xff]   ;;  %v2929_v15 = vld [vmem:[%s3643_s9 + $0x20] ss:$8 sps:$4 sm:$0xff]  }
  0x93   : > { %1760 = vmatpush1.bf16.msra.mxu0 %v2918_v8  ;;  %1668 = vmatprep.subr.bf16.mxu1 %v2919_v9  ;;  %v2924_v12 = vld [vmem:[%s3643_s9 + $0x110] ss:$8 sps:$4 sm:$0xff]   ;;  %v2927_v14 = vld [vmem:[%s3643_s9 + $0x124] ss:$8 sps:$4 sm:$0xff]   ;;  %v2930_v16 = vld [vmem:[%s3643_s9 + $0x120] ss:$8 sps:$4 sm:$0xff]  }
  0x94   : > { %1761 = vmatprep.subr.bf16.mxu0 %v2921_v10  ;;  %v2931_v17 = vld [vmem:[%s3643_s9 + $0x34] ss:$8 sps:$4 sm:$0xff]   ;;  %v2935_v19 = vld [vmem:[%s3643_s9 + $0x30] ss:$8 sps:$4 sm:$0xff]   ;;  %v2937_v21 = vld [vmem:[%s3643_s9 + $0x44] ss:$8 sps:$4 sm:$0xff]  }
  0x95   : > { %v2933_v18 = vld [vmem:[%s3643_s9 + $0x134] ss:$8 sps:$4 sm:$0xff]   ;;  %v2936_v20 = vld [vmem:[%s3643_s9 + $0x130] ss:$8 sps:$4 sm:$0xff]   ;;  %v2939_v22 = vld [vmem:[%s3643_s9 + $0x144] ss:$8 sps:$4 sm:$0xff]  }
  0x96   : > { %1669 = vmatpush1.bf16.msra.mxu1 %v2923_v11  ;;  %v2941_v23 = vld [vmem:[%s3643_s9 + $0x40] ss:$8 sps:$4 sm:$0xff]   ;;  %v2943_v25 = vld [vmem:[%s3643_s9 + $0x54] ss:$8 sps:$4 sm:$0xff]   ;;  %v2947_v27 = vld [vmem:[%s3643_s9 + $0x50] ss:$8 sps:$4 sm:$0xff]  }
  0x97   : > { %1762 = vmatpush1.bf16.msra.mxu0 %v2924_v12  ;;  %1670 = vmatprep.subr.bf16.mxu1 %v2925_v13  ;;  %v2942_v24 = vld [vmem:[%s3643_s9 + $0x140] ss:$8 sps:$4 sm:$0xff]   ;;  %v2945_v26 = vld [vmem:[%s3643_s9 + $0x154] ss:$8 sps:$4 sm:$0xff]   ;;  %v2948_v28 = vld [vmem:[%s3643_s9 + $0x150] ss:$8 sps:$4 sm:$0xff]  }
  0x98   : > { %1763 = vmatprep.subr.bf16.mxu0 %v2927_v14  ;;  %v2949_v29 = vld [vmem:[%s3643_s9 + $0x64] ss:$8 sps:$4 sm:$0xff]   ;;  %v2953_v31 = vld [vmem:[%s3643_s9 + $0x60] ss:$8 sps:$4 sm:$0xff]   ;;  %v2955_v33 = vld [vmem:[%s3643_s9 + $0x74] ss:$8 sps:$4 sm:$0xff]  }
  0x99   : > { %v2951_v30 = vld [vmem:[%s3643_s9 + $0x164] ss:$8 sps:$4 sm:$0xff]   ;;  %v2954_v32 = vld [vmem:[%s3643_s9 + $0x160] ss:$8 sps:$4 sm:$0xff]   ;;  %v2957_v34 = vld [vmem:[%s3643_s9 + $0x174] ss:$8 sps:$4 sm:$0xff]  }
  0x9a   : > { %1671 = vmatpush1.bf16.msra.mxu1 %v2929_v15  ;;  %v2959_v35 = vld [vmem:[%s3643_s9 + $0x70] ss:$8 sps:$4 sm:$0xff]   ;;  %v2961_v37 = vld [vmem:[%s3643_s9 + $0x84] ss:$8 sps:$4 sm:$0xff]   ;;  %v2965_v39 = vld [vmem:[%s3643_s9 + $0x80] ss:$8 sps:$4 sm:$0xff]  }
  0x9b   : > { %1764 = vmatpush1.bf16.msra.mxu0 %v2930_v16  ;;  %1672 = vmatprep.subr.bf16.mxu1 %v2931_v17  ;;  %v2960_v36 = vld [vmem:[%s3643_s9 + $0x170] ss:$8 sps:$4 sm:$0xff]   ;;  %v2963_v38 = vld [vmem:[%s3643_s9 + $0x184] ss:$8 sps:$4 sm:$0xff]   ;;  %v2966_v40 = vld [vmem:[%s3643_s9 + $0x180] ss:$8 sps:$4 sm:$0xff]  }
  0x9c   : > { %1765 = vmatprep.subr.bf16.mxu0 %v2933_v18  ;;  %v2967_v41 = vld [vmem:[%s3643_s9 + $0x94] ss:$8 sps:$4 sm:$0xff]   ;;  %v2971_v43 = vld [vmem:[%s3643_s9 + $0x90] ss:$8 sps:$4 sm:$0xff]   ;;  %v2973_v45 = vld [vmem:[%s3643_s9 + $0xa4] ss:$8 sps:$4 sm:$0xff]  }
  0x9d   : > { %v2969_v42 = vld [vmem:[%s3643_s9 + $0x194] ss:$8 sps:$4 sm:$0xff]   ;;  %v2972_v44 = vld [vmem:[%s3643_s9 + $0x190] ss:$8 sps:$4 sm:$0xff]   ;;  %v2975_v46 = vld [vmem:[%s3643_s9 + $0x1a4] ss:$8 sps:$4 sm:$0xff]  }
  0x9e   : > { %1673 = vmatpush1.bf16.msra.mxu1 %v2935_v19  ;;  %v2977_v47 = vld [vmem:[%s3643_s9 + $0xa0] ss:$8 sps:$4 sm:$0xff]   ;;  %v2979_v49 = vld [vmem:[%s3643_s9 + $0xb4] ss:$8 sps:$4 sm:$0xff]   ;;  %v2983_v51 = vld [vmem:[%s3643_s9 + $0xb0] ss:$8 sps:$4 sm:$0xff]  }
  0x9f   : > { %1766 = vmatpush1.bf16.msra.mxu0 %v2936_v20  ;;  %1674 = vmatprep.subr.bf16.mxu1 %v2937_v21  ;;  %v2978_v48 = vld [vmem:[%s3643_s9 + $0x1a0] ss:$8 sps:$4 sm:$0xff]   ;;  %v2981_v50 = vld [vmem:[%s3643_s9 + $0x1b4] ss:$8 sps:$4 sm:$0xff]   ;;  %v2984_v52 = vld [vmem:[%s3643_s9 + $0x1b0] ss:$8 sps:$4 sm:$0xff]  }
  0xa0   : > { %1767 = vmatprep.subr.bf16.mxu0 %v2939_v22  ;;  %v2985_v53 = vld [vmem:[%s3643_s9 + $0xc4] ss:$8 sps:$4 sm:$0xff]   ;;  %v2989_v57 = vld [vmem:[%s3643_s9 + $0xc0] ss:$8 sps:$4 sm:$0xff]   ;;  %v2991_v59 = vld [vmem:[%s3643_s9 + $0xd4] ss:$8 sps:$4 sm:$0xff]  }
  0xa1   : > { %v3011_v54 = vld [vmem:[%s3641_s6 + $0x4] ss:$24 sps:$4 sm:$0xff]   ;;  %v2990_v58 = vld [vmem:[%s3643_s9 + $0x1c0] ss:$8 sps:$4 sm:$0xff]   ;;  %v2995_v61 = vld [vmem:[%s3643_s9 + $0xd0] ss:$8 sps:$4 sm:$0xff]  }
  0xa2   : > { %1675 = vmatpush1.bf16.msra.mxu1 %v2941_v23  ;;  %v2987_v55 = vld [vmem:[%s3643_s9 + $0x1c4] ss:$8 sps:$4 sm:$0xff]   ;;  %1698 = vmatprep.mubr.bf16.mxu1 %v3011_v54  ;;  %v2993_v60 = vld [vmem:[%s3643_s9 + $0x1d4] ss:$8 sps:$4 sm:$0xff]   ;;  %v2996_v62 = vld [vmem:[%s3643_s9 + $0x1d0] ss:$8 sps:$4 sm:$0xff]  }
  0xa3   : > { %1768 = vmatpush1.bf16.msra.mxu0 %v2942_v24  ;;  %1676 = vmatprep.subr.bf16.mxu1 %v2943_v25  ;;  %v3014_v56 = vld [vmem:[%s3641_s6 + $0xc] ss:$24 sps:$4 sm:$0xff]   ;;  %v3001_v1 = vld [vmem:[%s3643_s9 + $0xe0] ss:$8 sps:$4 sm:$0xff]   ;;  %v3003_v3 = vld [vmem:[%s3643_s9 + $0xf4] ss:$8 sps:$4 sm:$0xff]  }
  0xa4   : > { %1769 = vmatprep.subr.bf16.mxu0 %v2945_v26  ;;  %1791 = vmatprep.mubr.bf16.mxu0 %v3014_v56  ;;  %v2997_v63 = vld [vmem:[%s3643_s9 + $0xe4] ss:$8 sps:$4 sm:$0xff]   ;;  %v3002_v2 = vld [vmem:[%s3643_s9 + $0x1e0] ss:$8 sps:$4 sm:$0xff]   ;;  %v3005_v4 = vld [vmem:[%s3643_s9 + $0x1f4] ss:$8 sps:$4 sm:$0xff]  }
  0xa5   : > { %v2999_v0 = vld [vmem:[%s3643_s9 + $0x1e4] ss:$8 sps:$4 sm:$0xff]   ;;  %v3007_v5 = vld [vmem:[%s3643_s9 + $0xf0] ss:$8 sps:$4 sm:$0xff]   ;;  %v3012_v9 = vld [vmem:[%s3641_s6 + $0x8] ss:$24 sps:$4 sm:$0xff]  }
  0xa6   : > { %1677 = vmatpush1.bf16.msra.mxu1 %v2947_v27  ;;  %v3008_v6 = vld [vmem:[%s3643_s9 + $0x1f0] ss:$8 sps:$4 sm:$0xff]   ;;  %v3017_v7 = vld [vmem:[%s3643_s9 + $0x204] ss:$8 sps:$4 sm:$0xff]   ;;  %v3015_v10 = vld [vmem:[%s3643_s9 + $0x200] ss:$8 sps:$4 sm:$0xff]  }
  0xa7   : > { %1770 = vmatpush1.bf16.msra.mxu0 %v2948_v28  ;;  %1678 = vmatprep.subr.bf16.mxu1 %v2949_v29  ;;  %v3009_v8 = vld [vmem:[%s3641_s6] ss:$24 sps:$4 sm:$0xff]   ;;  %v3020_v11 = vld [vmem:[%s3643_s9 + $0x214] ss:$8 sps:$4 sm:$0xff]   ;;  %v3023_v15 = vld [vmem:[%s3643_s9 + $0x224] ss:$8 sps:$4 sm:$0xff]  }
  0xa8   : > { %1771 = vmatprep.subr.bf16.mxu0 %v2951_v30  ;;  %v3030_v12 = vld [vmem:[%s3641_s6 + $0x34] ss:$24 sps:$4 sm:$0xff]   ;;  %v3018_v14 = vld [vmem:[%s3643_s9 + $0x210] ss:$8 sps:$4 sm:$0xff]   ;;  %v3021_v16 = vld [vmem:[%s3643_s9 + $0x220] ss:$8 sps:$4 sm:$0xff]  }
  0xa9   : > { %v3032_v13 = vld [vmem:[%s3641_s6 + $0x3c] ss:$24 sps:$4 sm:$0xff]   ;;  %v3037_v17 = vld [vmem:[%s3641_s6 + $0x30] ss:$24 sps:$4 sm:$0xff]   ;;  %v3044_v21 = vld [vmem:[%s3641_s6 + $0x6c] ss:$24 sps:$4 sm:$0xff]  }
  0xaa   : > { %1679 = vmatpush1.bf16.msra.mxu1 %v2953_v31  ;;  %v3038_v18 = vld [vmem:[%s3641_s6 + $0x38] ss:$24 sps:$4 sm:$0xff]   ;;  %v3026_v19 = vld [vmem:[%s3643_s9 + $0x234] ss:$8 sps:$4 sm:$0xff]   ;;  %v3029_v23 = vld [vmem:[%s3643_s9 + $0x244] ss:$8 sps:$4 sm:$0xff]  }
  0xab   : > { %1772 = vmatpush1.bf16.msra.mxu0 %v2954_v32  ;;  %1680 = vmatprep.subr.bf16.mxu1 %v2955_v33  ;;  %v3042_v20 = vld [vmem:[%s3641_s6 + $0x64] ss:$24 sps:$4 sm:$0xff]   ;;  %v3024_v22 = vld [vmem:[%s3643_s9 + $0x230] ss:$8 sps:$4 sm:$0xff]   ;;  %v3050_v25 = vld [vmem:[%s3641_s6 + $0x68] ss:$24 sps:$4 sm:$0xff]  }
  0xac   : > { %1773 = vmatprep.subr.bf16.mxu0 %v2957_v34  ;;  %v3049_v24 = vld [vmem:[%s3641_s6 + $0x60] ss:$24 sps:$4 sm:$0xff]   ;;  %v3036_v27 = vld [vmem:[%s3643_s9 + $0x254] ss:$8 sps:$4 sm:$0xff]   ;;  %v3041_v31 = vld [vmem:[%s3643_s9 + $0x264] ss:$8 sps:$4 sm:$0xff]  }
  0xad   : > { %v3027_v26 = vld [vmem:[%s3643_s9 + $0x240] ss:$8 sps:$4 sm:$0xff]   ;;  %v3054_v28 = vld [vmem:[%s3641_s6 + $0x94] ss:$24 sps:$4 sm:$0xff]   ;;  %v3034_v30 = vld [vmem:[%s3643_s9 + $0x250] ss:$8 sps:$4 sm:$0xff]  }
  0xae   : > { %1681 = vmatpush1.bf16.msra.mxu1 %v2959_v35  ;;  %v3056_v29 = vld [vmem:[%s3641_s6 + $0x9c] ss:$24 sps:$4 sm:$0xff]   ;;  %v3061_v32 = vld [vmem:[%s3641_s6 + $0x90] ss:$24 sps:$4 sm:$0xff]   ;;  %p2730_p5 = scmp.ne.s32.totalorder %s3185_s24, 3 }
  0xaf   : > { %1774 = vmatpush1.bf16.msra.mxu0 %v2960_v36  ;;  %1682 = vmatprep.subr.bf16.mxu1 %v2961_v37  ;;  %v3062_v33 = vld [vmem:[%s3641_s6 + $0x98] ss:$24 sps:$4 sm:$0xff]   ;;  %v3039_v34 = vld [vmem:[%s3643_s9 + $0x260] ss:$8 sps:$4 sm:$0xff]   ;;  %v3048_v35 = vld [vmem:[%s3643_s9 + $0x274] ss:$8 sps:$4 sm:$0xff]  }
  0xb0   : > { %1775 = vmatprep.subr.bf16.mxu0 %v2963_v38  ;;  %v3066_v36 = vld [vmem:[%s3641_s6 + $0xc4] ss:$24 sps:$4 sm:$0xff]   ;;  %v3046_v38 = vld [vmem:[%s3643_s9 + $0x270] ss:$8 sps:$4 sm:$0xff]   ;;  %v3075_v56 = vld [vmem:[%s3643_s9 + $0x2c0] ss:$8 sps:$4 sm:$0xff]  }
  0xb1   : > { %v3068_v37 = vld [vmem:[%s3641_s6 + $0xcc] ss:$24 sps:$4 sm:$0xff]   ;;  %v3070_v54 = vld [vmem:[%s3643_s9 + $0x2b0] ss:$8 sps:$4 sm:$0xff]  }
  0xb2   : > { %1683 = vmatpush1.bf16.msra.mxu1 %v2965_v39  ;;  %v3053_v39 = vld [vmem:[%s3643_s9 + $0x284] ss:$8 sps:$4 sm:$0xff]  }
  0xb3   : > { %1776 = vmatpush1.bf16.msra.mxu0 %v2966_v40  ;;  %1684 = vmatprep.subr.bf16.mxu1 %v2967_v41  ;;  %v3073_v40 = vld [vmem:[%s3641_s6 + $0xc0] ss:$24 sps:$4 sm:$0xff]  }
  0xb4   : > { %1777 = vmatprep.subr.bf16.mxu0 %v2969_v42  ;;  %v3074_v41 = vld [vmem:[%s3641_s6 + $0xc8] ss:$24 sps:$4 sm:$0xff]  }
  0xb5   : > { %v3051_v42 = vld [vmem:[%s3643_s9 + $0x280] ss:$8 sps:$4 sm:$0xff]  }
  0xb6   : > { %1685 = vmatpush1.bf16.msra.mxu1 %v2971_v43  ;;  %v3060_v43 = vld [vmem:[%s3643_s9 + $0x294] ss:$8 sps:$4 sm:$0xff]  }
  0xb7   : > { %1778 = vmatpush1.bf16.msra.mxu0 %v2972_v44  ;;  %1686 = vmatprep.subr.bf16.mxu1 %v2973_v45  ;;  %v3078_v44 = vld [vmem:[%s3641_s6 + $0xf4] ss:$24 sps:$4 sm:$0xff]  }
  0xb8   : > { %1779 = vmatprep.subr.bf16.mxu0 %v2975_v46  ;;  %v3080_v45 = vld [vmem:[%s3641_s6 + $0xfc] ss:$24 sps:$4 sm:$0xff]   ;;  %v3058_v46 = vld [vmem:[%s3643_s9 + $0x290] ss:$8 sps:$4 sm:$0xff]  }
  0xba   : > { %1687 = vmatpush1.bf16.msra.mxu1 %v2977_v47  ;;  %v3065_v47 = vld [vmem:[%s3643_s9 + $0x2a4] ss:$8 sps:$4 sm:$0xff]  }
  0xbb   : > { %1780 = vmatpush1.bf16.msra.mxu0 %v2978_v48  ;;  %1688 = vmatprep.subr.bf16.mxu1 %v2979_v49  ;;  %v3085_v48 = vld [vmem:[%s3641_s6 + $0xf0] ss:$24 sps:$4 sm:$0xff]  }
  0xbc   : > { %1781 = vmatprep.subr.bf16.mxu0 %v2981_v50  ;;  %v3086_v49 = vld [vmem:[%s3641_s6 + $0xf8] ss:$24 sps:$4 sm:$0xff]   ;;  %v3063_v50 = vld [vmem:[%s3643_s9 + $0x2a0] ss:$8 sps:$4 sm:$0xff]  }
  0xbe   : > { %1689 = vmatpush1.bf16.msra.mxu1 %v2983_v51  ;;  %v3072_v51 = vld [vmem:[%s3643_s9 + $0x2b4] ss:$8 sps:$4 sm:$0xff]  }
  0xbf   : > { %1782 = vmatpush1.bf16.msra.mxu0 %v2984_v52  ;;  %1690 = vmatprep.subr.bf16.mxu1 %v2985_v53  ;;  %v3095_v52 = vld [vmem:[%s3641_s6 + $0x14] ss:$24 sps:$4 sm:$0xff]   ;;  %v3098_v53 = vld [vmem:[%s3641_s6 + $0xa4] ss:$24 sps:$4 sm:$0xff]  }
  0xc0   : > { %1783 = vmatprep.subr.bf16.mxu0 %v2987_v55  ;;  %v3077_v55 = vld [vmem:[%s3643_s9 + $0x2c4] ss:$8 sps:$4 sm:$0xff]  }
  0xc2   : > { %1691 = vmatpush1.bf16.msra.mxu1 %v2989_v57  ;;  %v3084_v57 = vld [vmem:[%s3643_s9 + $0x2d4] ss:$8 sps:$4 sm:$0xff]  }
  0xc3   : > { %1784 = vmatpush1.bf16.msra.mxu0 %v2990_v58  ;;  %1692 = vmatprep.subr.bf16.mxu1 %v2991_v59  ;;  %v3082_v58 = vld [vmem:[%s3643_s9 + $0x2d0] ss:$8 sps:$4 sm:$0xff]   ;;  %v3089_v59 = vld [vmem:[%s3643_s9 + $0x2e4] ss:$8 sps:$4 sm:$0xff]  }
  0xc4   : > { %1785 = vmatprep.subr.bf16.mxu0 %v2993_v60  ;;  %v3087_v60 = vld [vmem:[%s3643_s9 + $0x2e0] ss:$8 sps:$4 sm:$0xff]  }
  0xc6   : > { %1693 = vmatpush1.bf16.msra.mxu1 %v2995_v61  ;;  %v3092_v61 = vld [vmem:[%s3643_s9 + $0x2f4] ss:$8 sps:$4 sm:$0xff]  }
  0xc7   : > { %1786 = vmatpush1.bf16.msra.mxu0 %v2996_v62  ;;  %1694 = vmatprep.subr.bf16.mxu1 %v2997_v63  ;;  %v3090_v62 = vld [vmem:[%s3643_s9 + $0x2f0] ss:$8 sps:$4 sm:$0xff]  }
  0xc8   : > { %1787 = vmatprep.subr.bf16.mxu0 %v2999_v0  ;;  %v3093_v63 = vld [vmem:[%s3641_s6 + $0x10] ss:$24 sps:$4 sm:$0xff]   ;;  %v3096_v0 = vld [vmem:[%s3641_s6 + $0xa0] ss:$24 sps:$4 sm:$0xff]  }
  0xca   : > { %1695 = vmatpush1.bf16.msra.mxu1 %v3001_v1  ;;  %v3099_v1 = vld [vmem:[%s3641_s6 + $0x44] ss:$24 sps:$4 sm:$0xff]  }
  0xcb   : > { %1788 = vmatpush1.bf16.msra.mxu0 %v3002_v2  ;;  %1696 = vmatprep.subr.bf16.mxu1 %v3003_v3  ;;  %v3101_v2 = vld [vmem:[%s3641_s6 + $0xd4] ss:$24 sps:$4 sm:$0xff]   ;;  %v3103_v3 = vld [vmem:[%s3641_s6 + $0x40] ss:$24 sps:$4 sm:$0xff]  }
  0xcc   : > { %1789 = vmatprep.subr.bf16.mxu0 %v3005_v4  ;;  %v3104_v4 = vld [vmem:[%s3641_s6 + $0xd0] ss:$24 sps:$4 sm:$0xff]  }
  0xce   : > { %1697 = vmatpush1.bf16.msra.mxu1 %v3007_v5  ;;  %v3105_v5 = vld [vmem:[%s3641_s6 + $0x74] ss:$24 sps:$4 sm:$0xff]  }
  0xcf   : > { %1790 = vmatpush1.bf16.msra.mxu0 %v3008_v6  ;;  %2738 = vmatprep.subr.bf16.mxu1 %v3017_v7  ;;  %v3107_v6 = vld [vmem:[%s3641_s6 + $0x104] ss:$24 sps:$4 sm:$0xff]  }
  0xd0   : > { %1852 = vmatprep.subr.bf16.mxu0 %v3017_v7  ;;  %v3109_v7 = vld [vmem:[%s3641_s6 + $0x70] ss:$24 sps:$4 sm:$0xff]  }
  0xd1   : > { %1699 = vmatmul.mubr.bf16.vlgmr.msra.gmra.mrb[0].mxu1 %v3009_v8  ;;  %v3110_v8 = vld [vmem:[%s3641_s6 + $0x100] ss:$24 sps:$4 sm:$0xff]  }
  0xd2   : > { %1792 = vmatmul.mubr.bf16.vlgmr.msra.gmra.mrb[0].mxu0 %v3012_v9  ;;  %2754 = vmatpush1.bf16.msra.mxu1 %v3015_v10 }
  0xd3   : > { %1853 = vmatpush1.bf16.msra.mxu0 %v3015_v10  ;;  %2739 = vmatprep.subr.bf16.mxu1 %v3020_v11 }
  0xd4   : > { %1854 = vmatprep.subr.bf16.mxu0 %v3020_v11  ;;  %1708 = vmatprep.mubr.bf16.mxu1 %v3030_v12 }
  0xd5   : > { %1801 = vmatprep.mubr.bf16.mxu0 %v3032_v13 }
  0xd6   : > { %2755 = vmatpush1.bf16.msra.mxu1 %v3018_v14 }
  0xd7   : > { %1855 = vmatpush1.bf16.msra.mxu0 %v3018_v14  ;;  %2740 = vmatprep.subr.bf16.mxu1 %v3023_v15 }
  0xd8   : > { %1856 = vmatprep.subr.bf16.mxu0 %v3023_v15 }
  0xd9   : > { %1709 = vmatmul.mubr.bf16.gmra.mrb[4].mxu1 %v3037_v17 }
  0xda   : > { %1802 = vmatmul.mubr.bf16.gmra.mrb[4].mxu0 %v3038_v18  ;;  %2756 = vmatpush1.bf16.msra.mxu1 %v3021_v16 }
  0xdb   : > { %1857 = vmatpush1.bf16.msra.mxu0 %v3021_v16  ;;  %2741 = vmatprep.subr.bf16.mxu1 %v3026_v19 }
  0xdc   : > { %1858 = vmatprep.subr.bf16.mxu0 %v3026_v19  ;;  %1718 = vmatprep.mubr.bf16.mxu1 %v3042_v20 }
  0xdd   : > { %1811 = vmatprep.mubr.bf16.mxu0 %v3044_v21 }
  0xde   : > { %2757 = vmatpush1.bf16.msra.mxu1 %v3024_v22 }
  0xdf   : > { %1859 = vmatpush1.bf16.msra.mxu0 %v3024_v22  ;;  %2742 = vmatprep.subr.bf16.mxu1 %v3029_v23 }
  0xe0   : > { %1860 = vmatprep.subr.bf16.mxu0 %v3029_v23 }
  0xe1   : > { %1719 = vmatmul.mubr.bf16.gmra.mrb[8].mxu1 %v3049_v24 }
  0xe2   : > { %1812 = vmatmul.mubr.bf16.gmra.mrb[8].mxu0 %v3050_v25  ;;  %2758 = vmatpush1.bf16.msra.mxu1 %v3027_v26 }
  0xe3   : > { %1861 = vmatpush1.bf16.msra.mxu0 %v3027_v26  ;;  %2743 = vmatprep.subr.bf16.mxu1 %v3036_v27 }
  0xe4   : > { %1862 = vmatprep.subr.bf16.mxu0 %v3036_v27  ;;  %1728 = vmatprep.mubr.bf16.mxu1 %v3054_v28 }
  0xe5   : > { %1821 = vmatprep.mubr.bf16.mxu0 %v3056_v29 }
  0xe6   : > { %2759 = vmatpush1.bf16.msra.mxu1 %v3034_v30 }
  0xe7   : > { %1863 = vmatpush1.bf16.msra.mxu0 %v3034_v30  ;;  %2744 = vmatprep.subr.bf16.mxu1 %v3041_v31 }
  0xe8   : > { %1864 = vmatprep.subr.bf16.mxu0 %v3041_v31 }
  0xe9   : > { %1729 = vmatmul.mubr.bf16.gmra.mrb[12].mxu1 %v3061_v32 }
  0xea   : > { %1822 = vmatmul.mubr.bf16.gmra.mrb[12].mxu0 %v3062_v33  ;;  %2760 = vmatpush1.bf16.msra.mxu1 %v3039_v34 }
  0xeb   : > { %1865 = vmatpush1.bf16.msra.mxu0 %v3039_v34  ;;  %2745 = vmatprep.subr.bf16.mxu1 %v3048_v35 }
  0xec   : > { %1866 = vmatprep.subr.bf16.mxu0 %v3048_v35  ;;  %1738 = vmatprep.mubr.bf16.mxu1 %v3066_v36 }
  0xed   : > { %1831 = vmatprep.mubr.bf16.mxu0 %v3068_v37 }
  0xee   : > { %2761 = vmatpush1.bf16.msra.mxu1 %v3046_v38 }
  0xef   : > { %1867 = vmatpush1.bf16.msra.mxu0 %v3046_v38  ;;  %2746 = vmatprep.subr.bf16.mxu1 %v3053_v39 }
  0xf0   : > { %1868 = vmatprep.subr.bf16.mxu0 %v3053_v39 }
  0xf1   : > { %1739 = vmatmul.mubr.bf16.gmra.mrb[16].mxu1 %v3073_v40 }
  0xf2   : > { %1832 = vmatmul.mubr.bf16.gmra.mrb[16].mxu0 %v3074_v41  ;;  %2762 = vmatpush1.bf16.msra.mxu1 %v3051_v42 }
  0xf3   : > { %1869 = vmatpush1.bf16.msra.mxu0 %v3051_v42  ;;  %2747 = vmatprep.subr.bf16.mxu1 %v3060_v43 }
  0xf4   : > { %1870 = vmatprep.subr.bf16.mxu0 %v3060_v43  ;;  %1748 = vmatprep.mubr.bf16.mxu1 %v3078_v44 }
  0xf5   : > { %1841 = vmatprep.mubr.bf16.mxu0 %v3080_v45 }
  0xf6   : > { %2763 = vmatpush1.bf16.msra.mxu1 %v3058_v46 }
  0xf7   : > { %1871 = vmatpush1.bf16.msra.mxu0 %v3058_v46  ;;  %2748 = vmatprep.subr.bf16.mxu1 %v3065_v47 }
  0xf8   : > { %1872 = vmatprep.subr.bf16.mxu0 %v3065_v47 }
  0xf9   : > { %1749 = vmatmul.mubr.bf16.gmra.mrb[20].mxu1 %v3085_v48 }
  0xfa   : > { %1842 = vmatmul.mubr.bf16.gmra.mrb[20].mxu0 %v3086_v49  ;;  %2764 = vmatpush1.bf16.msra.mxu1 %v3063_v50 }
  0xfb   : > { %1873 = vmatpush1.bf16.msra.mxu0 %v3063_v50  ;;  %2749 = vmatprep.subr.bf16.mxu1 %v3072_v51 }
  0xfc   : > { %1874 = vmatprep.subr.bf16.mxu0 %v3072_v51  ;;  %1884 = vmatprep.mubr.bf16.mxu0 %v3095_v52 }
  0xfd   : > { %1914 = vmatprep.mubr.bf16.mxu1 %v3098_v53 }
  0xfe   : > { %2765 = vmatpush1.bf16.msra.mxu1 %v3070_v54 }
  0xff   : > { %1875 = vmatpush1.bf16.msra.mxu0 %v3070_v54  ;;  %2750 = vmatprep.subr.bf16.mxu1 %v3077_v55 }
 0x100   : > { %1876 = vmatprep.subr.bf16.mxu0 %v3077_v55 }
 0x102   : > { %2766 = vmatpush1.bf16.msra.mxu1 %v3075_v56 }
 0x103   : > { %1877 = vmatpush1.bf16.msra.mxu0 %v3075_v56  ;;  %2751 = vmatprep.subr.bf16.mxu1 %v3084_v57 }
 0x104   : > { %1878 = vmatprep.subr.bf16.mxu0 %v3084_v57  ;;  %v850_v57 = vld [vmem:[#allocation2] sm:$0xff] }
 0x106   : > { %2767 = vmatpush1.bf16.msra.mxu1 %v3082_v58 }
 0x107   : > { %1879 = vmatpush1.bf16.msra.mxu0 %v3082_v58  ;;  %2752 = vmatprep.subr.bf16.mxu1 %v3089_v59 }
 0x108   : > { %1880 = vmatprep.subr.bf16.mxu0 %v3089_v59  ;;  %v862_v59 = vld [vmem:[#allocation2 + $0x60] sm:$0xff] }
 0x10a   : > { %2768 = vmatpush1.bf16.msra.mxu1 %v3087_v60 }
 0x10b   : > { %1881 = vmatpush1.bf16.msra.mxu0 %v3087_v60  ;;  %2753 = vmatprep.subr.bf16.mxu1 %v3092_v61 }
 0x10c   : > { %1882 = vmatprep.subr.bf16.mxu0 %v3092_v61 }
 0x10e   : > { %2769 = vmatpush1.bf16.msra.mxu1 %v3090_v62 }
 0x10f   : > { %1883 = vmatpush1.bf16.msra.mxu0 %v3090_v62 }
 0x111   : > { %1915 = vmatmul.mubr.bf16.vlgmr.msra.gmra.mrb[24].mxu1 %v3096_v0 }
 0x112   : > { %1885 = vmatmul.mubr.bf16.vlgmr.msra.gmra.mrb[0].mxu0 %v3093_v63  ;;  %1924 = vmatprep.mubr.bf16.mxu1 %v3101_v2  ;;  %v851_v63 = vld [vmem:[#allocation2 + $0x8] sm:$0xff] }
 0x113   : > { %1894 = vmatprep.mubr.bf16.mxu0 %v3099_v1  ;;  %v863_v1 = vld [vmem:[#allocation2 + $0x68] sm:$0xff] }
 0x119   : > { %1925 = vmatmul.mubr.bf16.gmra.mrb[28].mxu1 %v3104_v4 }
 0x11a   : > { %1895 = vmatmul.mubr.bf16.gmra.mrb[4].mxu0 %v3103_v3  ;;  %1934 = vmatprep.mubr.bf16.mxu1 %v3107_v6 }
 0x11b   : > { %1904 = vmatprep.mubr.bf16.mxu0 %v3105_v5  ;;  %v852_v5 = vld [vmem:[#allocation2 + $0x10] sm:$0xff] }
 0x121   : > { %1935 = vmatmul.mubr.bf16.gmra.mrb[32].mxu1 %v3110_v8 }
 0x122   : > { %1905 = vmatmul.mubr.bf16.gmra.mrb[8].mxu0 %v3109_v7  ;;  %v864_v7 = vld [vmem:[#allocation2 + $0x70] sm:$0xff] }
 0x1a4   : > { %v1700_v9 = vpop.f32.mrb[0].mxu1 }
 0x1a5   : > { %v1702_v10 = vpop.f32.mrb[1].mxu1 }
 0x1a6   : > { %v3780_v11 = vpop.f32.mrb[2].mxu1 }
 0x1a7   : > { %v3782_v12 = vpop.f32.mrb[3].mxu1 }
 0x1ac   : > { %v3784_v13 = vpop.f32.mrb[4].mxu1 }
 0x1ad   : > { %v3786_v14 = vpop.f32.mrb[5].mxu1 }
 0x1ae   : > { %v3788_v15 = vpop.f32.mrb[6].mxu1 }
 0x1af   : > { %v3790_v16 = vpop.f32.mrb[7].mxu1 }
 0x1b4   : > { %v3792_v17 = vpop.f32.mrb[8].mxu1 }
 0x1b5   : > { %v3794_v18 = vpop.f32.mrb[9].mxu1 }
 0x1b6   : > { %v3796_v19 = vpop.f32.mrb[10].mxu1 }
 0x1b7   : > { %v3798_v20 = vpop.f32.mrb[11].mxu1 }
 0x1bc   : > { %v1730_v21 = vpop.f32.mrb[12].mxu1 }
 0x1bd   : > { %v1823_v22 = vpop.f32.mrb[12].mxu0  ;;  %v1732_v24 = vpop.f32.mrb[13].mxu1 }
 0x1be   : > { %v1824_v23 = vadd.f32 %v1823_v22, %v1730_v21  ;;  %v1825_v25 = vpop.f32.mrb[13].mxu0  ;;  %v1734_v27 = vpop.f32.mrb[14].mxu1 }
 0x1bf   : > { %v1826_v26 = vadd.f32 %v1825_v25, %v1732_v24  ;;  %v1827_v28 = vpop.f32.mrb[14].mxu0  ;;  %v1736_v30 = vpop.f32.mrb[15].mxu1 }
 0x1c0   : > { %v1828_v29 = vadd.f32 %v1827_v28, %v1734_v27  ;;  %v1829_v31 = vpop.f32.mrb[15].mxu0  ;;  %v853_v27 = vld [vmem:[#allocation2 + $0x18] sm:$0xff] }
 0x1c1   : > { %v1830_v32 = vadd.f32 %v1829_v31, %v1736_v30  ;;  %v865_v30 = vld [vmem:[#allocation2 + $0x78] sm:$0xff] }
 0x1c4   : > { %v1740_v33 = vpop.f32.mrb[16].mxu1 }
 0x1c5   : > { %v1833_v34 = vpop.f32.mrb[16].mxu0  ;;  %v1742_v36 = vpop.f32.mrb[17].mxu1 }
 0x1c6   : > { %v3800_v35 = vadd.f32 %v1833_v34, %v1740_v33  ;;  %v1835_v37 = vpop.f32.mrb[17].mxu0  ;;  %v1744_v39 = vpop.f32.mrb[18].mxu1 }
 0x1c7   : > { %v3802_v38 = vadd.f32 %v1835_v37, %v1742_v36  ;;  %v1837_v40 = vpop.f32.mrb[18].mxu0  ;;  %v1746_v42 = vpop.f32.mrb[19].mxu1 }
 0x1c8   : > { %v3804_v41 = vadd.f32 %v1837_v40, %v1744_v39  ;;  %v1839_v43 = vpop.f32.mrb[19].mxu0  ;;  %v866_v39 = vld [vmem:[#allocation2 + $0x80] sm:$0xff] }
 0x1c9   : > { %v3806_v44 = vadd.f32 %v1839_v43, %v1746_v42 }
 0x1cc   : > { %v1750_v45 = vpop.f32.mrb[20].mxu1 }
 0x1cd   : > { %v1843_v46 = vpop.f32.mrb[20].mxu0  ;;  %v1752_v48 = vpop.f32.mrb[21].mxu1 }
 0x1ce   : > { %v3808_v47 = vadd.f32 %v1843_v46, %v1750_v45  ;;  %v1845_v49 = vpop.f32.mrb[21].mxu0  ;;  %v1754_v51 = vpop.f32.mrb[22].mxu1  ;;  %v867_v45 = vld [vmem:[#allocation2 + $0x88] sm:$0xff] }
 0x1cf   : > { %v3810_v50 = vadd.f32 %v1845_v49, %v1752_v48  ;;  %v1847_v52 = vpop.f32.mrb[22].mxu0  ;;  %v1756_v54 = vpop.f32.mrb[23].mxu1 }
 0x1d0   : > { %v3812_v53 = vadd.f32 %v1847_v52, %v1754_v51  ;;  %v1849_v55 = vpop.f32.mrb[23].mxu0  ;;  %v856_v51 = vld [vmem:[#allocation2 + $0x30] sm:$0xff] }
 0x1d1   : > { %v3814_v56 = vadd.f32 %v1849_v55, %v1756_v54  ;;  %v868_v54 = vld [vmem:[#allocation2 + $0x90] sm:$0xff] }
 0x1e4   : > { %v1916_v60 = vpop.f32.mrb[24].mxu1 }
 0x1e5   : > { %v1886_v58 = vpop.f32.mrb[0].mxu0  ;;  %v1917_v62 = vadd.f32 %v1916_v60, %v1824_v23  ;;  %v1918_v2 = vpop.f32.mrb[25].mxu1  ;;  %v857_v60 = vld [vmem:[#allocation2 + $0x38] sm:$0xff] }
 0x1e6   : > { %v2770_v61 = vadd.f32 %v1886_v58, %v1700_v9  ;;  %v1888_v0 = vpop.f32.mrb[1].mxu0  ;;  %v1919_v4 = vadd.f32 %v1918_v2, %v1826_v26  ;;  %v1920_v8 = vpop.f32.mrb[26].mxu1 }
 0x1e7   : > { %v2771_v3 = vadd.f32 %v1888_v0, %v1702_v10  ;;  %v1890_v6 = vpop.f32.mrb[2].mxu0  ;;  %v1957_v22 = vadd.f32 %v1917_v62, %v862_v59  ;;  %v1921_v25 = vadd.f32 %v1920_v8, %v1828_v29  ;;  %v1922_v9 = vpop.f32.mrb[27].mxu1 }
 0x1e8   : > { %v1945_v21 = vadd.f32 %v2770_v61, %v850_v57  ;;  %v2772_v24 = vadd.f32 %v1890_v6, %v3780_v11  ;;  %v1892_v28 = vpop.f32.mrb[3].mxu0  ;;  %v1958_v31 = vadd.f32 %v1919_v4, %v863_v1  ;;  %v1923_v34 = vadd.f32 %v1922_v9, %v1830_v32  ;;  %v854_v11 = vld [vmem:[#allocation2 + $0x20] sm:$0xff]  ;;  %v855_v32 = vld [vmem:[#allocation2 + $0x28] sm:$0xff]  ;;  %v869_v61 = vld [vmem:[#allocation2 + $0x98] sm:$0xff] }
 0x1e9   : > { %v1946_v23 = vadd.f32 %v2771_v3, %v851_v63  ;;  %v2773_v33 = vadd.f32 %v1892_v28, %v3782_v12  ;;  %1981 = vst [vmem:[#allocation2 + $0x60] sm:$0xff] %v1957_v22  ;;  %v1959_v26 = vadd.f32 %v1921_v25, %v864_v7  ;;  %v859_v7 = vld [vmem:[#allocation2 + $0x48] sm:$0xff] }
 0x1ea   : > { %1969 = vst [vmem:[#allocation2] sm:$0xff] %v1945_v21  ;;  %v1947_v10 = vadd.f32 %v2772_v24, %v852_v5  ;;  %1982 = vst [vmem:[#allocation2 + $0x68] sm:$0xff] %v1958_v31  ;;  %v1960_v37 = vadd.f32 %v1923_v34, %v865_v30  ;;  %v870_v5 = vld [vmem:[#allocation2 + $0xa0] sm:$0xff]  ;;  %v871_v21 = vld [vmem:[#allocation2 + $0xa8] sm:$0xff] }
 0x1eb   : > { %1970 = vst [vmem:[#allocation2 + $0x8] sm:$0xff] %v1946_v23  ;;  %v1948_v36 = vadd.f32 %v2773_v33, %v853_v27  ;;  %1983 = vst [vmem:[#allocation2 + $0x70] sm:$0xff] %v1959_v26  ;;  %v860_v27 = vld [vmem:[#allocation2 + $0x50] sm:$0xff]  ;;  %v861_v34 = vld [vmem:[#allocation2 + $0x58] sm:$0xff] }
 0x1ec   : > { %1971 = vst [vmem:[#allocation2 + $0x10] sm:$0xff] %v1947_v10  ;;  %1984 = vst [vmem:[#allocation2 + $0x78] sm:$0xff] %v1960_v37  ;;  %v1926_v40 = vpop.f32.mrb[28].mxu1  ;;  %v872_v30 = vld [vmem:[#allocation2 + $0xb0] sm:$0xff]  ;;  %v873_v10 = vld [vmem:[#allocation2 + $0xb8] sm:$0xff] }
 0x1ed   : > { %1972 = vst [vmem:[#allocation2 + $0x18] sm:$0xff] %v1948_v36  ;;  %v1896_v29 = vpop.f32.mrb[4].mxu0  ;;  %v1927_v12 = vadd.f32 %v1926_v40, %v3800_v35  ;;  %v1928_v46 = vpop.f32.mrb[29].mxu1 }
 0x1ee   : > { %v2774_v42 = vadd.f32 %v1896_v29, %v3784_v13  ;;  %v1898_v43 = vpop.f32.mrb[5].mxu0  ;;  %v1929_v49 = vadd.f32 %v1928_v46, %v3802_v38  ;;  %v1930_v55 = vpop.f32.mrb[30].mxu1 }
 0x1ef   : > { %v2775_v48 = vadd.f32 %v1898_v43, %v3786_v14  ;;  %v1900_v52 = vpop.f32.mrb[6].mxu0  ;;  %v1961_v58 = vadd.f32 %v1927_v12, %v866_v39  ;;  %v1931_v13 = vadd.f32 %v1930_v55, %v3804_v41  ;;  %v1932_v62 = vpop.f32.mrb[31].mxu1  ;;  %v858_v41 = vld [vmem:[#allocation2 + $0x40] sm:$0xff] }
 0x1f0   : > { %v1949_v57 = vadd.f32 %v2774_v42, %v854_v11  ;;  %v2776_v59 = vadd.f32 %v1900_v52, %v3788_v15  ;;  %v1902_v35 = vpop.f32.mrb[7].mxu0  ;;  %v1962_v0 = vadd.f32 %v1929_v49, %v867_v45  ;;  %v1933_v38 = vadd.f32 %v1932_v62, %v3806_v44  ;;  %v2021_v42 = vld [vmem:[%s809_s15] sm:$0x3] (!%p2730_p5) }
 0x1f1   : > { %v1950_v63 = vadd.f32 %v2775_v48, %v855_v32  ;;  %v2777_v14 = vadd.f32 %v1902_v35, %v3790_v16  ;;  %1985 = vst [vmem:[#allocation2 + $0x80] sm:$0xff] %v1961_v58  ;;  %v1963_v2 = vadd.f32 %v1931_v13, %v868_v54  ;;  %v1997_v12 = vld [vmem:[#allocation2] sm:$0xff] (!%p2730_p5) }
 0x1f2   : > { %1973 = vst [vmem:[#allocation2 + $0x20] sm:$0xff] %v1949_v57  ;;  %v1951_v1 = vadd.f32 %v2776_v59, %v856_v51  ;;  %1986 = vst [vmem:[#allocation2 + $0x88] sm:$0xff] %v1962_v0  ;;  %v1964_v15 = vadd.f32 %v1933_v38, %v869_v61  ;;  %v1998_v45 = vld [vmem:[#allocation2 + $0x8] sm:$0xff] (!%p2730_p5) }
 0x1f3   : > { %1974 = vst [vmem:[#allocation2 + $0x28] sm:$0xff] %v1950_v63  ;;  %v1952_v3 = vadd.f32 %v2777_v14, %v857_v60  ;;  %1987 = vst [vmem:[#allocation2 + $0x90] sm:$0xff] %v1963_v2  ;;  %v1999_v46 = vld [vmem:[#allocation2 + $0x10] sm:$0xff] (!%p2730_p5)  ;;  %v2009_v2 = vld [vmem:[#allocation2 + $0x60] sm:$0xff] (!%p2730_p5) }
 0x1f4   : > { %1975 = vst [vmem:[#allocation2 + $0x30] sm:$0xff] %v1951_v1  ;;  %1988 = vst [vmem:[#allocation2 + $0x98] sm:$0xff] %v1964_v15  ;;  %v1936_v6 = vpop.f32.mrb[32].mxu1  ;;  %v2000_v48 = vld [vmem:[#allocation2 + $0x18] sm:$0xff] (!%p2730_p5) }
 0x1f5   : > { %1976 = vst [vmem:[#allocation2 + $0x38] sm:$0xff] %v1952_v3  ;;  %v1906_v4 = vpop.f32.mrb[8].mxu0  ;;  %v1937_v44 = vadd.f32 %v1936_v6, %v3808_v47  ;;  %v1938_v22 = vpop.f32.mrb[33].mxu1  ;;  %v2010_v3 = vld [vmem:[#allocation2 + $0x68] sm:$0xff] (!%p2730_p5) }
 0x1f6   : > { %v2778_v16 = vadd.f32 %v1906_v4, %v3792_v17  ;;  %v1908_v8 = vpop.f32.mrb[9].mxu0  ;;  %v1939_v25 = vadd.f32 %v1938_v22, %v3810_v50  ;;  %v1940_v9 = vpop.f32.mrb[34].mxu1 }
 0x1f7   : > { %v2779_v24 = vadd.f32 %v1908_v8, %v3794_v18  ;;  %v1910_v28 = vpop.f32.mrb[10].mxu0  ;;  %v1965_v31 = vadd.f32 %v1937_v44, %v870_v5  ;;  %v1941_v17 = vadd.f32 %v1940_v9, %v3812_v53  ;;  %v1942_v26 = vpop.f32.mrb[35].mxu1  ;;  %1996 = sbr.rel (%p2730_p5) target bundleno = 611 (0x263), region = 109  ;;  %v2023_v53 = vlaneseq (!%p2730_p5)  ;;  %v2011_v8 = vld [vmem:[#allocation2 + $0x70] sm:$0xff] (!%p2730_p5) }
 0x1f8   : > { %v1953_v23 = vadd.f32 %v2778_v16, %v858_v41  ;;  %v2780_v33 = vadd.f32 %v1910_v28, %v3796_v19  ;;  %v1912_v47 = vpop.f32.mrb[11].mxu0  ;;  %v1966_v37 = vadd.f32 %v1939_v25, %v871_v21  ;;  %v1943_v50 = vadd.f32 %v1942_v26, %v3814_v56  ;;  %v2012_v21 = vld [vmem:[#allocation2 + $0x78] sm:$0xff] (!%p2730_p5)  ;;  %v2013_v9 = vld [vmem:[#allocation2 + $0x80] sm:$0xff] (!%p2730_p5) }
 0x1f9   : > { %v1954_v36 = vadd.f32 %v2779_v24, %v859_v7  ;;  %v2781_v18 = vadd.f32 %v1912_v47, %v3798_v20  ;;  %1989 = vst [vmem:[#allocation2 + $0xa0] sm:$0xff] %v1965_v31  ;;  %v1967_v29 = vadd.f32 %v1941_v17, %v872_v30  ;;  %v3835_v20 = vshrl.u32 (!%p2730_p5), %v2023_v53, 7  ;;  %v2001_v49 = vld [vmem:[#allocation2 + $0x20] sm:$0xff] (!%p2730_p5) }
 0x1fa   : > { %1977 = vst [vmem:[#allocation2 + $0x40] sm:$0xff] %v1953_v23  ;;  %v1955_v11 = vadd.f32 %v2780_v33, %v860_v27  ;;  %1990 = vst [vmem:[#allocation2 + $0xa8] sm:$0xff] %v1966_v37  ;;  %v1968_v19 = vadd.f32 %v1943_v50, %v873_v10  ;;  %v2002_v51 = vld [vmem:[#allocation2 + $0x28] sm:$0xff] (!%p2730_p5)  ;;  %v2015_v37 = vld [vmem:[#allocation2 + $0x90] sm:$0xff] (!%p2730_p5) }
 0x1fb   : > { %1978 = vst [vmem:[#allocation2 + $0x48] sm:$0xff] %v1954_v36  ;;  %v1956_v39 = vadd.f32 %v2781_v18, %v861_v34  ;;  %1991 = vst [vmem:[#allocation2 + $0xb0] sm:$0xff] %v1967_v29  ;;  %v3838_v56 = vsub.s32 (!%p2730_p5), 0, %v3835_v20  ;;  %v3841_v40 = vsub.s32 (!%p2730_p5), 1, %v3835_v20  ;;  %v2003_v58 = vld [vmem:[#allocation2 + $0x30] sm:$0xff] (!%p2730_p5)  ;;  %v2014_v23 = vld [vmem:[#allocation2 + $0x88] sm:$0xff] (!%p2730_p5) }
 0x1fc   : > { %1979 = vst [vmem:[#allocation2 + $0x50] sm:$0xff] %v1955_v11  ;;  %1992 = vst [vmem:[#allocation2 + $0xb8] sm:$0xff] %v1968_v19  ;;  %v2004_v59 = vld [vmem:[#allocation2 + $0x38] sm:$0xff] (!%p2730_p5) }
 0x1fd   : > { %1980 = vst [vmem:[#allocation2 + $0x58] sm:$0xff] %v1956_v39  ;;  %v3849_v32 = vrot.slane (!%p2730_p5), %v2021_v42, %v3838_v56  ;;  %v3852_v43 = vrot.slane (!%p2730_p5), %v2021_v42, %v3841_v40  ;;  %v2016_v18 = vld [vmem:[#allocation2 + $0x98] sm:$0xff] (!%p2730_p5) }
 0x1ff   : > { %v3855_v52 = vadd.f32 %v3849_v32, %v1997_v12  ;;  %v3858_v54 = vadd.f32 %v3852_v43, %v1998_v45  ;;  %v3861_v55 = vadd.f32 %v3849_v32, %v1999_v46  ;;  %v3864_v57 = vadd.f32 %v3852_v43, %v2000_v48 }
 0x200   : > { %v3867_v13 = vadd.f32 %v3849_v32, %v2001_v49  ;;  %v3870_v60 = vadd.f32 %v3852_v43, %v2002_v51  ;;  %v3873_v0 = vadd.f32 %v3849_v32, %v2003_v58  ;;  %v3876_v14 = vadd.f32 %v3852_v43, %v2004_v59  ;;  %v2017_v45 = vld [vmem:[#allocation2 + $0xa0] sm:$0xff] }
 0x201   : > { %v2005_v35 = vld [vmem:[#allocation2 + $0x40] sm:$0xff]  ;;  %v2130_v38 = vadd.f32 %v3861_v55, %v3855_v52  ;;  %v2147_v1 = vadd.f32 %v3864_v57, %v3858_v54  ;;  %v2166_v44 = vmul.f32 %v3855_v52, %v3855_v52  ;;  %v2167_v7 = vmul.f32 %v3858_v54, %v3858_v54  ;;  %v2018_v46 = vld [vmem:[#allocation2 + $0xa8] sm:$0xff] }
 0x202   : > { %v2006_v61 = vld [vmem:[#allocation2 + $0x48] sm:$0xff]  ;;  %v3883_v15 = vadd.f32 %v3849_v32, %v2005_v35  ;;  %v2168_v25 = vmul.f32 %v3861_v55, %v3861_v55  ;;  %v2169_v27 = vmul.f32 %v3864_v57, %v3864_v57  ;;  %v3907_v28 = vadd.f32 %v3849_v32, %v2009_v2 }
 0x203   : > { %v2007_v62 = vld [vmem:[#allocation2 + $0x50] sm:$0xff]  ;;  %v3886_v41 = vadd.f32 %v3852_v43, %v2006_v61  ;;  %v2131_v4 = vadd.f32 %v2130_v38, %v3867_v13  ;;  %v2148_v5 = vadd.f32 %v2147_v1, %v3870_v60  ;;  %v3910_v30 = vadd.f32 %v3852_v43, %v2010_v3  ;;  %v2020_v38 = vld [vmem:[#allocation2 + $0xb8] sm:$0xff] }
 0x204   : > { %v2008_v63 = vld [vmem:[#allocation2 + $0x58] sm:$0xff]  ;;  %v3891_v6 = vadd.f32 %v3849_v32, %v2007_v62  ;;  %v2170_v17 = vmul.f32 %v3867_v13, %v3867_v13  ;;  %v2171_v34 = vmul.f32 %v3870_v60, %v3870_v60  ;;  %v3919_v47 = vadd.f32 %v3849_v32, %v2011_v8 }
 0x205   : > { %v3894_v16 = vadd.f32 %v3852_v43, %v2008_v63  ;;  %v2132_v22 = vadd.f32 %v2131_v4, %v3873_v0  ;;  %v2149_v24 = vadd.f32 %v2148_v5, %v3876_v14  ;;  %v3922_v10 = vadd.f32 %v3852_v43, %v2012_v21  ;;  %v2019_v63 = vld [vmem:[#allocation2 + $0xb0] sm:$0xff] }
 0x206   : > { %v2172_v26 = vmul.f32 %v3873_v0, %v3873_v0  ;;  %v2173_v36 = vmul.f32 %v3876_v14, %v3876_v14  ;;  %v2190_v29 = vadd.f32 %v2168_v25, %v2166_v44  ;;  %v2207_v39 = vadd.f32 %v2169_v27, %v2167_v7 }
 0x207   : > { %v2133_v31 = vadd.f32 %v2132_v22, %v3883_v15  ;;  %v2150_v33 = vadd.f32 %v2149_v24, %v3886_v41  ;;  %v3931_v19 = vadd.f32 %v3849_v32, %v2013_v9  ;;  %v3934_v53 = vadd.f32 %v3852_v43, %v2014_v23 }
 0x208   : > { %v2174_v42 = vmul.f32 %v3883_v15, %v3883_v15  ;;  %v2175_v12 = vmul.f32 %v3886_v41, %v3886_v41  ;;  %v2191_v51 = vadd.f32 %v2190_v29, %v2170_v17  ;;  %v2208_v58 = vadd.f32 %v2207_v39, %v2171_v34 }
 0x209   : > { %v2134_v50 = vadd.f32 %v2133_v31, %v3891_v6  ;;  %v2151_v11 = vadd.f32 %v2150_v33, %v3894_v16  ;;  %v3943_v59 = vadd.f32 %v3849_v32, %v2015_v37  ;;  %v3946_v35 = vadd.f32 %v3852_v43, %v2016_v18 }
 0x20a   : > { %v2176_v61 = vmul.f32 %v3891_v6, %v3891_v6  ;;  %v2177_v62 = vmul.f32 %v3894_v16, %v3894_v16  ;;  %v2192_v3 = vadd.f32 %v2191_v51, %v2172_v26  ;;  %v2209_v4 = vadd.f32 %v2208_v58, %v2173_v36 }
 0x20b   : > { %v2135_v48 = vadd.f32 %v2134_v50, %v3907_v28  ;;  %v2152_v49 = vadd.f32 %v2151_v11, %v3910_v30  ;;  %v3955_v5 = vadd.f32 %v3849_v32, %v2017_v45  ;;  %v3958_v44 = vadd.f32 %v3852_v43, %v2018_v46 }
 0x20c   : > { %v2178_v7 = vmul.f32 %v3907_v28, %v3907_v28  ;;  %v2179_v8 = vmul.f32 %v3910_v30, %v3910_v30  ;;  %v2193_v24 = vadd.f32 %v2192_v3, %v2174_v42  ;;  %v2210_v25 = vadd.f32 %v2209_v4, %v2175_v12 }
 0x20d   : > { %v2136_v1 = vadd.f32 %v2135_v48, %v3919_v47  ;;  %v2153_v2 = vadd.f32 %v2152_v49, %v3922_v10  ;;  %v3967_v27 = vadd.f32 %v3849_v32, %v2019_v63  ;;  %v3970_v9 = vadd.f32 %v3852_v43, %v2020_v38 }
 0x20e   : > { %v2180_v23 = vmul.f32 %v3919_v47, %v3919_v47  ;;  %v2181_v31 = vmul.f32 %v3922_v10, %v3922_v10  ;;  %v2194_v34 = vadd.f32 %v2193_v24, %v2176_v61  ;;  %v2211_v26 = vadd.f32 %v2210_v25, %v2177_v62 }
 0x20f   : > { %v2137_v21 = vadd.f32 %v2136_v1, %v3931_v19  ;;  %v2154_v22 = vadd.f32 %v2153_v2, %v3934_v53  ;;  %v2182_v36 = vmul.f32 %v3931_v19, %v3931_v19  ;;  %v2183_v32 = vmul.f32 %v3934_v53, %v3934_v53 }
 0x210   : > { %v2195_v18 = vadd.f32 %v2194_v34, %v2178_v7  ;;  %v2212_v50 = vadd.f32 %v2211_v26, %v2179_v8  ;;  %v2184_v11 = vmul.f32 %v3943_v59, %v3943_v59  ;;  %v2185_v29 = vmul.f32 %v3946_v35, %v3946_v35 }
 0x211   : > { %v2138_v33 = vadd.f32 %v2137_v21, %v3943_v59  ;;  %v2155_v17 = vadd.f32 %v2154_v22, %v3946_v35  ;;  %v2186_v46 = vmul.f32 %v3955_v5, %v3955_v5  ;;  %v2187_v48 = vmul.f32 %v3958_v44, %v3958_v44 }
 0x212   : > { %v2196_v12 = vadd.f32 %v2195_v18, %v2180_v23  ;;  %v2213_v45 = vadd.f32 %v2212_v50, %v2181_v31  ;;  %v2188_v62 = vmul.f32 %v3967_v27, %v3967_v27  ;;  %v2189_v63 = vmul.f32 %v3970_v9, %v3970_v9 }
 0x213   : > { %v2139_v43 = vadd.f32 %v2138_v33, %v3955_v5  ;;  %v2156_v37 = vadd.f32 %v2155_v17, %v3958_v44 }
 0x214   : > { %v2197_v58 = vadd.f32 %v2196_v12, %v2182_v36  ;;  %v2214_v61 = vadd.f32 %v2213_v45, %v2183_v32 }
 0x215   : > { %v2140_v39 = vadd.f32 %v2139_v43, %v3967_v27  ;;  %v2157_v42 = vadd.f32 %v2156_v37, %v3970_v9 }
 0x216   : > { %v2198_v2 = vadd.f32 %v2197_v58, %v2184_v11  ;;  %v2215_v3 = vadd.f32 %v2214_v61, %v2185_v29 }
 0x217   : > { %v2141_v49 = vrot.slane %v2140_v39, 4  ;;  %v2158_v51 = vrot.slane %v2157_v42, 4 }
 0x218   : > { %v2199_v8 = vadd.f32 %v2198_v2, %v2186_v46  ;;  %v2216_v21 = vadd.f32 %v2215_v3, %v2187_v48  ;;  %v3204_v3 = vmov 1966171168  }
 0x219   : > { %v2142_v38 = vadd.f32 %v2141_v49, %v2140_v39  ;;  %v2159_v1 = vadd.f32 %v2158_v51, %v2157_v42 }
 0x21a   : > { %v2200_v25 = vadd.f32 %v2199_v8, %v2188_v62  ;;  %v2217_v23 = vadd.f32 %v2216_v21, %v2189_v63 }
 0x21b   : > { %v2143_v4 = vrot.slane %v2142_v38, 2  ;;  %v2160_v7 = vrot.slane %v2159_v1, 2 }
 0x21c   : > { %v2201_v17 = vrot.slane %v2200_v25, 4  ;;  %v2218_v34 = vrot.slane %v2217_v23, 4 }
 0x21d   : > { %v2144_v22 = vadd.f32 %v2143_v4, %v2142_v38  ;;  %v2161_v24 = vadd.f32 %v2160_v7, %v2159_v1  ;;  %v2241_v4 = vunpack.c.l.s4 %v3204_v3 }
 0x21e   : > { %v2202_v32 = vadd.f32 %v2201_v17, %v2200_v25  ;;  %v2219_v43 = vadd.f32 %v2218_v34, %v2217_v23  ;;  %v2232_v23 = vld [vmem:[%s814_s22] sm:$0x3] }
 0x21f   : > { %v2145_v31 = vrot.slane %v2144_v22, 1  ;;  %v2162_v33 = vrot.slane %v2161_v24, 1  ;;  %v2242_v7 = vunpack.c.0.s8 %v2241_v4 }
 0x220   : > { %v2203_v37 = vrot.slane %v2202_v32, 2  ;;  %v2220_v18 = vrot.slane %v2219_v43, 2 }
 0x221   : > { %v2146_v26 = vadd.f32 %v2145_v31, %v2144_v22  ;;  %v2163_v36 = vadd.f32 %v2162_v33, %v2161_v24  ;;  %v2245_v21 = vsub.s32 %v2242_v7, %v3835_v20  ;;  %v2256_v20 = vld [vmem:[%s819_s18] sm:$0x3] }
 0x222   : > { %v2204_v29 = vadd.f32 %v2203_v37, %v2202_v32  ;;  %v2221_v39 = vadd.f32 %v2220_v18, %v2219_v43 }
 0x223   : > { %v2164_v50 = vmul.f32 0.010416667, %v2146_v26  ;;  %v2165_v11 = vmul.f32 0.010416667, %v2163_v36 }
 0x224   : > { %v2205_v42 = vrot.slane %v2204_v29, 1  ;;  %v2222_v12 = vrot.slane %v2221_v39, 1 }
 0x225   : > { %v2226_v48 = vmul.f32 %v2164_v50, %v2164_v50  ;;  %v2227_v49 = vmul.f32 %v2165_v11, %v2165_v11 }
 0x226   : > { %v2206_v45 = vadd.f32 %v2205_v42, %v2204_v29  ;;  %v2223_v46 = vadd.f32 %v2222_v12, %v2221_v39 }
 0x228   : > { %v2224_v51 = vmul.f32 0.010416667, %v2206_v45  ;;  %v2225_v58 = vmul.f32 0.010416667, %v2223_v46 }
 0x22a   : > { %v2228_v61 = vsub.f32 %v2224_v51, %v2226_v48  ;;  %v2229_v62 = vsub.f32 %v2225_v58, %v2227_v49 }
 0x22c   : > { %v2230_v63 = vmax.f32 %v2228_v61, 0.0  ;;  %v2231_v38 = vmax.f32 %v2229_v62, 0.0 }
 0x22e   : > { %v2233_v1 = vadd.f32 1e-05, %v2230_v63  ;;  %v2234_v2 = vadd.f32 1e-05, %v2231_v38 }
 0x230   : > { %3111 = vrsqrt.f32 %v2233_v1 }
 0x231   : > { %3113 = vrsqrt.f32 %v2234_v2 }
 0x23a   : > { %v3112_v8 = vpop.eup %3111 }
 0x23b   : > { %v3114_v22 = vpop.eup %3113 }
 0x23c   : > { %v2239_v24 = vcombine.low %v3112_v8, %v3114_v22 }
 0x23e   : > { %v2246_v25 = vrot.slane %v2239_v24, %v2245_v21 }
 0x240   : > { %v2253_v31 = vrot.slane %v2246_v25, %v2245_v21 }
 0x242   : > { %v2255_v33 = vmul.f32 %v2253_v31, %v2232_v23 }
 0x244   : > { %v2261_v17 = vrot.slane %v2255_v33, %v3838_v56  ;;  %v2265_v34 = vrot.slane %v2255_v33, %v3841_v40 }
 0x246   : > { %v2268_v26 = vmul.f32 %v2261_v17, %v2164_v50  ;;  %v2269_v36 = vmul.f32 %v2265_v34, %v2165_v11  ;;  %v2289_v37 = vmul.f32 %v2261_v17, %v3855_v52  ;;  %v2290_v18 = vmul.f32 %v2265_v34, %v3858_v54 }
 0x247   : > { %v2291_v29 = vmul.f32 %v2261_v17, %v3861_v55  ;;  %v2292_v39 = vmul.f32 %v2265_v34, %v3864_v57  ;;  %v2293_v12 = vmul.f32 %v2261_v17, %v3867_v13  ;;  %v2294_v50 = vmul.f32 %v2265_v34, %v3870_v60 }
 0x248   : > { %v2272_v32 = vcombine.low %v2268_v26, %v2269_v36  ;;  %v2295_v11 = vmul.f32 %v2261_v17, %v3873_v0  ;;  %v2296_v45 = vmul.f32 %v2265_v34, %v3876_v14  ;;  %v2297_v46 = vmul.f32 %v2261_v17, %v3883_v15 }
 0x249   : > { %v2298_v48 = vmul.f32 %v2265_v34, %v3886_v41  ;;  %v2299_v52 = vmul.f32 %v2261_v17, %v3891_v6  ;;  %v2300_v55 = vmul.f32 %v2265_v34, %v3894_v16  ;;  %v2301_v57 = vmul.f32 %v2261_v17, %v3907_v28 }
 0x24a   : > { %v2279_v43 = vrot.slane %v2272_v32, %v2245_v21  ;;  %v2302_v49 = vmul.f32 %v2265_v34, %v3910_v30  ;;  %v2303_v13 = vmul.f32 %v2261_v17, %v3919_v47  ;;  %v2304_v60 = vmul.f32 %v2265_v34, %v3922_v10 }
 0x24b   : > { %v2305_v0 = vmul.f32 %v2261_v17, %v3931_v19  ;;  %v2306_v14 = vmul.f32 %v2265_v34, %v3934_v53  ;;  %v2307_v6 = vmul.f32 %v2261_v17, %v3943_v59  ;;  %v2308_v16 = vmul.f32 %v2265_v34, %v3946_v35 }
 0x24c   : > { %v2286_v42 = vrot.slane %v2279_v43, %v2245_v21  ;;  %v2309_v28 = vmul.f32 %v2261_v17, %v3955_v5  ;;  %v2310_v30 = vmul.f32 %v2265_v34, %v3958_v44  ;;  %v2311_v47 = vmul.f32 %v2261_v17, %v3967_v27 }
 0x24d   : > { %v2312_v10 = vmul.f32 %v2265_v34, %v3970_v9 }
 0x24e   : > { %v2288_v54 = vsub.f32 %v2256_v20, %v2286_v42 }
 0x250   : > { %v2317_v15 = vrot.slane %v2288_v54, %v3838_v56  ;;  %v2321_v41 = vrot.slane %v2288_v54, %v3841_v40 }
 0x252   : > { %v2324_v51 = vadd.f32 %v2317_v15, %v2289_v37  ;;  %v2325_v19 = vadd.f32 %v2321_v41, %v2290_v18  ;;  %v2326_v53 = vadd.f32 %v2317_v15, %v2291_v29  ;;  %v2327_v56 = vadd.f32 %v2321_v41, %v2292_v39 }
 0x253   : > { %v2328_v40 = vadd.f32 %v2317_v15, %v2293_v12  ;;  %v2329_v59 = vadd.f32 %v2321_v41, %v2294_v50  ;;  %v2330_v58 = vadd.f32 %v2317_v15, %v2295_v11  ;;  %v2331_v35 = vadd.f32 %v2321_v41, %v2296_v45 }
 0x254   : > { %v2348_v61 = vmax.f32 %v2324_v51, 0.0  ;;  %v2349_v5 = vmax.f32 %v2325_v19, 0.0  ;;  %v2350_v44 = vmax.f32 %v2326_v53, 0.0  ;;  %v2351_v27 = vmax.f32 %v2327_v56, 0.0 }
 0x255   : > { %v2352_v9 = vmax.f32 %v2328_v40, 0.0  ;;  %v2353_v62 = vmax.f32 %v2329_v59, 0.0  ;;  %v2354_v63 = vmax.f32 %v2330_v58, 0.0  ;;  %v2355_v38 = vmax.f32 %v2331_v35, 0.0 }
 0x256   : > { %2372 = vst [vmem:[%s3645_s27] sm:$0xff] %v2348_v61  ;;  %2373 = vst [vmem:[%s3645_s27 + $0x8] sm:$0xff] %v2349_v5  ;;  %v2332_v1 = vadd.f32 %v2317_v15, %v2297_v46  ;;  %v2333_v2 = vadd.f32 %v2321_v41, %v2298_v48  ;;  %v2334_v3 = vadd.f32 %v2317_v15, %v2299_v52 }
 0x257   : > { %2374 = vst [vmem:[%s3645_s27 + $0x10] sm:$0xff] %v2350_v44  ;;  %2375 = vst [vmem:[%s3645_s27 + $0x18] sm:$0xff] %v2351_v27  ;;  %v2335_v4 = vadd.f32 %v2321_v41, %v2300_v55  ;;  %v2336_v7 = vadd.f32 %v2317_v15, %v2301_v57  ;;  %v2337_v8 = vadd.f32 %v2321_v41, %v2302_v49 }
 0x258   : > { %2376 = vst [vmem:[%s3645_s27 + $0x20] sm:$0xff] %v2352_v9  ;;  %2377 = vst [vmem:[%s3645_s27 + $0x28] sm:$0xff] %v2353_v62  ;;  %v2338_v21 = vadd.f32 %v2317_v15, %v2303_v13  ;;  %v2339_v22 = vadd.f32 %v2321_v41, %v2304_v60  ;;  %v2356_v24 = vmax.f32 %v2332_v1, 0.0  ;;  %v2357_v25 = vmax.f32 %v2333_v2, 0.0 }
 0x259   : > { %2378 = vst [vmem:[%s3645_s27 + $0x30] sm:$0xff] %v2354_v63  ;;  %2379 = vst [vmem:[%s3645_s27 + $0x38] sm:$0xff] %v2355_v38  ;;  %v2358_v23 = vmax.f32 %v2334_v3, 0.0  ;;  %v2359_v31 = vmax.f32 %v2335_v4, 0.0  ;;  %v2360_v33 = vmax.f32 %v2336_v7, 0.0  ;;  %v2361_v17 = vmax.f32 %v2337_v8, 0.0 }
 0x25a   : > { %v2362_v34 = vmax.f32 %v2338_v21, 0.0  ;;  %v2363_v26 = vmax.f32 %v2339_v22, 0.0  ;;  %2380 = vst [vmem:[%s3645_s27 + $0x40] sm:$0xff] %v2356_v24  ;;  %2381 = vst [vmem:[%s3645_s27 + $0x48] sm:$0xff] %v2357_v25  ;;  %v2340_v36 = vadd.f32 %v2317_v15, %v2305_v0  ;;  %v2341_v32 = vadd.f32 %v2321_v41, %v2306_v14 }
 0x25b   : > { %2382 = vst [vmem:[%s3645_s27 + $0x50] sm:$0xff] %v2358_v23  ;;  %2383 = vst [vmem:[%s3645_s27 + $0x58] sm:$0xff] %v2359_v31  ;;  %v2342_v43 = vadd.f32 %v2317_v15, %v2307_v6  ;;  %v2343_v20 = vadd.f32 %v2321_v41, %v2308_v16  ;;  %v2344_v37 = vadd.f32 %v2317_v15, %v2309_v28 }
 0x25c   : > { %2384 = vst [vmem:[%s3645_s27 + $0x60] sm:$0xff] %v2360_v33  ;;  %2385 = vst [vmem:[%s3645_s27 + $0x68] sm:$0xff] %v2361_v17  ;;  %v2345_v18 = vadd.f32 %v2321_v41, %v2310_v30  ;;  %v2346_v29 = vadd.f32 %v2317_v15, %v2311_v47  ;;  %v2347_v39 = vadd.f32 %v2321_v41, %v2312_v10  ;;  %v2364_v42 = vmax.f32 %v2340_v36, 0.0 }
 0x25d   : > { %2386 = vst [vmem:[%s3645_s27 + $0x70] sm:$0xff] %v2362_v34  ;;  %2387 = vst [vmem:[%s3645_s27 + $0x78] sm:$0xff] %v2363_v26  ;;  %v2365_v12 = vmax.f32 %v2341_v32, 0.0  ;;  %v2366_v50 = vmax.f32 %v2342_v43, 0.0  ;;  %v2367_v11 = vmax.f32 %v2343_v20, 0.0  ;;  %v2368_v45 = vmax.f32 %v2344_v37, 0.0 }
 0x25e   : > { %v2369_v46 = vmax.f32 %v2345_v18, 0.0  ;;  %v2370_v48 = vmax.f32 %v2346_v29, 0.0  ;;  %v2371_v52 = vmax.f32 %v2347_v39, 0.0  ;;  %2388 = vst [vmem:[%s3645_s27 + $0x80] sm:$0xff] %v2364_v42 }
 0x25f   : > { %2389 = vst [vmem:[%s3645_s27 + $0x88] sm:$0xff] %v2365_v12  ;;  %2390 = vst [vmem:[%s3645_s27 + $0x90] sm:$0xff] %v2366_v50 }
 0x260   : > { %2391 = vst [vmem:[%s3645_s27 + $0x98] sm:$0xff] %v2367_v11  ;;  %2392 = vst [vmem:[%s3645_s27 + $0xa0] sm:$0xff] %v2368_v45 }
 0x261   : > { %2393 = vst [vmem:[%s3645_s27 + $0xa8] sm:$0xff] %v2369_v46  ;;  %2394 = vst [vmem:[%s3645_s27 + $0xb0] sm:$0xff] %v2370_v48 }
 0x262   : > { %2395 = vst [vmem:[%s3645_s27 + $0xb8] sm:$0xff] %v2371_v52 }
 0x263 PF: > { %2402 = sbr.rel (!%p3329_p12) target bundleno = 625 (0x271), region = 113  ;;  %s2737_s8 = sshll.u32 (%p3329_p12), %s3189_s25, 4  ;;  %v2418_v54 = vld [vmem:[%s3645_s27] sm:$0xff] (%p3329_p12)  ;;  %v2420_v55 = vld [vmem:[%s3645_s27 + $0x8] sm:$0xff] (%p3329_p12)  ;;  %v2422_v57 = vld [vmem:[%s3645_s27 + $0x10] sm:$0xff] (%p3329_p12) }
 0x264   : > { %s4070_s14 = scalar_lea.vmem (%p3329_p12), %s4155_s5, %s2737_s8  ;;  %v2424_v49 = vld [vmem:[%s3645_s27 + $0x18] sm:$0xff] (%p3329_p12)  ;;  %v2426_v13 = vld [vmem:[%s3645_s27 + $0x20] sm:$0xff] (%p3329_p12)  ;;  %v2428_v60 = vld [vmem:[%s3645_s27 + $0x28] sm:$0xff] (%p3329_p12) }
 0x265   : > { %2419 = vst [vmem:[%s4070_s14] sm:$0xff] (%p3329_p12), %v2418_v54  ;;  %2421 = vst [vmem:[%s4070_s14 + $0x8] sm:$0xff] (%p3329_p12), %v2420_v55  ;;  %v2430_v0 = vld [vmem:[%s3645_s27 + $0x30] sm:$0xff] (%p3329_p12)  ;;  %v2432_v14 = vld [vmem:[%s3645_s27 + $0x38] sm:$0xff] (%p3329_p12) }
 0x266   : > { %2423 = vst [vmem:[%s4070_s14 + $0x20] sm:$0xff] (%p3329_p12), %v2422_v57  ;;  %2425 = vst [vmem:[%s4070_s14 + $0x28] sm:$0xff] (%p3329_p12), %v2424_v49  ;;  %v2434_v15 = vld [vmem:[%s3645_s27 + $0x40] sm:$0xff] (%p3329_p12)  ;;  %v2436_v41 = vld [vmem:[%s3645_s27 + $0x48] sm:$0xff] (%p3329_p12) }
 0x267   : > { %2427 = vst [vmem:[%s4070_s14 + $0x40] sm:$0xff] (%p3329_p12), %v2426_v13  ;;  %2429 = vst [vmem:[%s4070_s14 + $0x48] sm:$0xff] (%p3329_p12), %v2428_v60  ;;  %v2438_v6 = vld [vmem:[%s3645_s27 + $0x50] sm:$0xff] (%p3329_p12)  ;;  %v2440_v16 = vld [vmem:[%s3645_s27 + $0x58] sm:$0xff] (%p3329_p12) }
 0x268   : > { %2431 = vst [vmem:[%s4070_s14 + $0x60] sm:$0xff] (%p3329_p12), %v2430_v0  ;;  %2433 = vst [vmem:[%s4070_s14 + $0x68] sm:$0xff] (%p3329_p12), %v2432_v14  ;;  %v2442_v28 = vld [vmem:[%s3645_s27 + $0x60] sm:$0xff] (%p3329_p12)  ;;  %v2444_v30 = vld [vmem:[%s3645_s27 + $0x68] sm:$0xff] (%p3329_p12) }
 0x269   : > { %2435 = vst [vmem:[%s4070_s14 + $0x80] sm:$0xff] (%p3329_p12), %v2434_v15  ;;  %2437 = vst [vmem:[%s4070_s14 + $0x88] sm:$0xff] (%p3329_p12), %v2436_v41  ;;  %v2446_v47 = vld [vmem:[%s3645_s27 + $0x70] sm:$0xff] (%p3329_p12)  ;;  %v2448_v10 = vld [vmem:[%s3645_s27 + $0x78] sm:$0xff] (%p3329_p12) }
 0x26a   : > { %2439 = vst [vmem:[%s4070_s14 + $0xa0] sm:$0xff] %v2438_v6  ;;  %2441 = vst [vmem:[%s4070_s14 + $0xa8] sm:$0xff] %v2440_v16  ;;  %v2450_v51 = vld [vmem:[%s3645_s27 + $0x80] sm:$0xff]  ;;  %v2452_v19 = vld [vmem:[%s3645_s27 + $0x88] sm:$0xff] }
 0x26b   : > { %2443 = vst [vmem:[%s4070_s14 + $0xc0] sm:$0xff] %v2442_v28  ;;  %2445 = vst [vmem:[%s4070_s14 + $0xc8] sm:$0xff] %v2444_v30  ;;  %v2454_v53 = vld [vmem:[%s3645_s27 + $0x90] sm:$0xff]  ;;  %v2456_v56 = vld [vmem:[%s3645_s27 + $0x98] sm:$0xff] }
 0x26c   : > { %2447 = vst [vmem:[%s4070_s14 + $0xe0] sm:$0xff] %v2446_v47  ;;  %2449 = vst [vmem:[%s4070_s14 + $0xe8] sm:$0xff] %v2448_v10  ;;  %v2458_v40 = vld [vmem:[%s3645_s27 + $0xa0] sm:$0xff]  ;;  %v2460_v59 = vld [vmem:[%s3645_s27 + $0xa8] sm:$0xff] }
 0x26d   : > { %2451 = vst [vmem:[%s4070_s14 + $0x100] sm:$0xff] %v2450_v51  ;;  %2453 = vst [vmem:[%s4070_s14 + $0x108] sm:$0xff] %v2452_v19  ;;  %v2462_v58 = vld [vmem:[%s3645_s27 + $0xb0] sm:$0xff]  ;;  %v2464_v35 = vld [vmem:[%s3645_s27 + $0xb8] sm:$0xff] }
 0x26e   : > { %2455 = vst [vmem:[%s4070_s14 + $0x120] sm:$0xff] %v2454_v53  ;;  %2457 = vst [vmem:[%s4070_s14 + $0x128] sm:$0xff] %v2456_v56 }
 0x26f   : > { %2459 = vst [vmem:[%s4070_s14 + $0x140] sm:$0xff] %v2458_v40  ;;  %2461 = vst [vmem:[%s4070_s14 + $0x148] sm:$0xff] %v2460_v59 }
 0x270   : > { %2463 = vst [vmem:[%s4070_s14 + $0x160] sm:$0xff] %v2462_v58  ;;  %2465 = vst [vmem:[%s4070_s14 + $0x168] sm:$0xff] %v2464_v35 }
 0x271 PF: > { %s15_s28 = sadd.s32 1, %s3201_s28   ;;  %s4169_s25 = sld [smem:[#allocation6_spill]] }
 0x272   : > { %p12_p6 = scmp.ge.s32.totalorder %s15_s28, 10   ;;  %s4170_s30 = sld [smem:[#allocation7_spill]] }
 0x273   : > { %s4171_s27 = sld [smem:[#allocation8_spill]]  ;;  %s4172_s18 = smov %s3165_s19 }
 0x274   : > { %s4173_s19 = smov %s3327_s17  ;;  %s4174_s20 = smov %s3173_s21 }
 0x275   : > { %s4175_s21 = smov %s3324_s16  ;;  %s4176_s22 = smov %s3181_s23 }
 0x276   : > { %s4177_s23 = smov %s3310_s11  ;;  %s4178_s24 = smov %s3193_s26 }
 0x277   :  { %14 = sbr.rel (!%p12_p6) target bundleno = 9 (0x9), region = 184 }
 0x278   : > { %s4179_s26 = smov %s4170_s30 }

// kernel: _lambda_.6
= control target key start
LH: loop header
LB: loop body
LE: loop exit
PB: predicated region body
PF: predicated region fallthrough
CT: control target
= control target key end

     0   :  { %s5037_s0 = inlined_call_operand.vmem [shape: bf16[32,8192], index: 0, kind: input, shape index: {}]   ;;  %s5038_s1 = inlined_call_operand.vmem [shape: bf16[8192,256], index: 1, kind: input, shape index: {}]   ;;  %s5039_s2 = inlined_call_operand.vmem [shape: f32[1,256], index: 2, kind: input, shape index: {}]   ;;  %s5040_s3 = inlined_call_operand.vmem [shape: f32[1,256], index: 3, kind: input, shape index: {}]   ;;  %s5041_s4 = inlined_call_operand.vmem [shape: f32[1,256], index: 4, kind: input, shape index: {}]   ;;  %s5042_s5 = inlined_call_operand.vmem [shape: f32[32,256], index: 5, kind: output, shape index: {}]  }
   0x1   :  { %5046 = sst [smem:[#allocation9_spill]] %s5037_s0 }
   0x2   :  { %5047 = sst [smem:[#allocation10_spill]] %s5038_s1 }
   0x3   :  { %s4088_s18 = smov 0   ;;  %s4090_s19 = smov 0  }
   0x4   :  { %s4092_s20 = smov 0   ;;  %s4094_s21 = smov 0  }
   0x5   :  { %s4096_s22 = smov 0   ;;  %s4098_s23 = smov 0  }
   0x6   :  { %s4100_s24 = smov 0   ;;  %s4102_s25 = smov 0  }
   0x7   :  { %s4104_s26 = smov 0   ;;  %s4106_s27 = smov 0  }
   0x8   :  { %s4108_s28 = smov 0  }
   0x9 LB: > { %5048 = sst [smem:[#allocation6_spill]] %s4051_s27  ;;  %s3342_s29 = sadd.s32 4294967295, %s4055_s28   ;;  %s4055_s28 = sphi %s4108_s28, %s15_s28   ;;  %s4051_s27 = sphi %s4106_s27, %s5058_s27   ;;  %s4047_s26 = sphi %s4104_s26, %s5066_s26   ;;  %s4043_s25 = sphi %s4102_s25, %s5056_s25   ;;  %s4039_s24 = sphi %s4100_s24, %s5065_s24   ;;  %s4035_s23 = sphi %s4098_s23, %s5064_s23   ;;  %s4031_s22 = sphi %s4096_s22, %s5063_s22   ;;  %s4027_s21 = sphi %s4094_s21, %s5062_s21   ;;  %s4023_s20 = sphi %s4092_s20, %s5061_s20   ;;  %s4019_s19 = sphi %s4090_s19, %s5060_s19   ;;  %s4015_s18 = sphi %s4088_s18, %s5059_s18  }
   0xa   : > { %s24_s30 = sadd.s32 1, %s4047_s26  ;;  %s27_s6 = sadd.s32 1, %s4051_s27 }
   0xb   : > { %p25_p0 = scmp.ge.s32.totalorder %s24_s30, 4  ;;  %s34_s7 = sadd.s32 1, %s4035_s23 }
   0xc   : > { %p41_p1 = scmp.ne.s32.totalorder %s4035_s23, %s4031_s22  ;;  %p42_p2 = scmp.eq.s32.totalorder %s4055_s28, 0 }
   0xd   : > { %s5068_s30 = smov (%p25_p0, %s24_s30), 0  ;;  %s5070_s6 = smov (!%p25_p0, %s27_s6), %s4051_s27 }
   0xe   : > { %5049 = sst [smem:[#allocation7_spill]] %s5068_s30  ;;  %s31_s8 = ssub.s32 %s4047_s26, %s5068_s30 }
   0xf   : > { %p29_p3 = scmp.ge.s32.totalorder %s5070_s6, 2  ;;  %p32_p4 = scmp.eq.s32.totalorder %s31_s8, 0 }
  0x10   : > { %p4155_p5 = por %p42_p2, %p41_p1  ;;  %s62_s10 = sadd.s32 1, %s4027_s21 }
  0x11   : > { %s5072_s6 = smov (%p29_p3, %s5070_s6), 0  ;;  %p69_p6 = scmp.ne.s32.totalorder %s4027_s21, %s4023_s20 }
  0x12   : > { %5051 = sst [smem:[#allocation8_spill]] %s5072_s6  ;;  %s58_s12 = ssub.s32 %s4051_s27, %s5072_s6 }
  0x13   : > { %s4163_s11 = scalar_select %p32_p4, %s4035_s23, %s34_s7  }
  0x14   : > { %s59_s13 = sor.u32 %s58_s12, %s31_s8  ;;  %p164_p7 = scmp.eq.s32.totalorder %s58_s12, 0 }
  0x15   : > { %p60_p8 = scmp.eq.s32.totalorder %s59_s13, 0  ;;  %p4169_p9 = por %p69_p6, %p42_p2 }
  0x16   : > { %s166_s15 = sadd.s32 1, %s4019_s19  ;;  %p176_p10 = scmp.ne.s32.totalorder %s4019_s19, %s4015_s18 }
  0x17   : > { %s4177_s16 = scalar_select %p60_p8, %s4027_s21, %s62_s10  }
  0x18   : > { %s4180_s17 = scalar_select %p164_p7, %s4019_s19, %s166_s15  }
  0x19   : > { %p177_p11 = scmp.eq.s32.totalorder %s3342_s29, 7  ;;  %p3345_p13 = scmp.ge.s32.totalorder %s4055_s28, 8 }
  0x1b   : > { %p4182_p12 = por %p177_p11, %p176_p10  ;;  %199 = sbr.rel (%p3345_p13) target bundleno = 240 (0xf0), region = 16 }
  0x22   : > { %202 = sbr.rel (!%p4155_p5) target bundleno = 60 (0x3c), region = 20  ;;  %s204_s7 = sand.u32 (%p4155_p5), 1, %s4035_s23  }
  0x23   : > { %s3524_s8 = sshll.u32 (%p4155_p5), %s4047_s26, 6  ;;  %s3346_s12 = sshll.u32 (%p4155_p5), %s204_s7, 8 }
  0x24   : > { %s5054_s0 = sld [smem:[#allocation9_spill]] (%p4155_p5)  ;;  %s4199_s29 = scalar_lea.vmem (%p4155_p5), [#allocation3], %s3346_s12 }
  0x2a   : > { %s4194_s15 = scalar_lea.vmem %s5054_s0, %s3524_s8 }
  0x2b   : > { %v222_v0 = vld [vmem:[%s4194_s15] sm:$0xff]  ;;  %v224_v1 = vld [vmem:[%s4194_s15 + $0x8] sm:$0xff]  ;;  %v226_v2 = vld [vmem:[%s4194_s15 + $0x10] sm:$0xff] }
  0x2c   : > { %223 = vst [vmem:[%s4199_s29] sm:$0xff] %v222_v0  ;;  %225 = vst [vmem:[%s4199_s29 + $0x8] sm:$0xff] %v224_v1  ;;  %v228_v3 = vld [vmem:[%s4194_s15 + $0x18] sm:$0xff]  ;;  %v230_v4 = vld [vmem:[%s4194_s15 + $0x20] sm:$0xff] }
  0x2d   : > { %227 = vst [vmem:[%s4199_s29 + $0x10] sm:$0xff] %v226_v2  ;;  %v232_v5 = vld [vmem:[%s4194_s15 + $0x28] sm:$0xff]  ;;  %229 = vst [vmem:[%s4199_s29 + $0x18] sm:$0xff] %v228_v3  ;;  %v234_v6 = vld [vmem:[%s4194_s15 + $0x30] sm:$0xff] }
  0x2e   : > { %231 = vst [vmem:[%s4199_s29 + $0x20] sm:$0xff] %v230_v4  ;;  %233 = vst [vmem:[%s4199_s29 + $0x28] sm:$0xff] %v232_v5  ;;  %v236_v7 = vld [vmem:[%s4194_s15 + $0x38] sm:$0xff]  ;;  %v238_v8 = vld [vmem:[%s4194_s15 + $0x100] sm:$0xff] }
  0x2f   : > { %235 = vst [vmem:[%s4199_s29 + $0x30] sm:$0xff] %v234_v6  ;;  %237 = vst [vmem:[%s4199_s29 + $0x38] sm:$0xff] %v236_v7  ;;  %v240_v9 = vld [vmem:[%s4194_s15 + $0x108] sm:$0xff]  ;;  %v242_v10 = vld [vmem:[%s4194_s15 + $0x110] sm:$0xff] }
  0x30   : > { %239 = vst [vmem:[%s4199_s29 + $0x40] sm:$0xff] %v238_v8  ;;  %v244_v11 = vld [vmem:[%s4194_s15 + $0x118] sm:$0xff]  ;;  %241 = vst [vmem:[%s4199_s29 + $0x48] sm:$0xff] %v240_v9  ;;  %v246_v12 = vld [vmem:[%s4194_s15 + $0x120] sm:$0xff] }
  0x31   : > { %243 = vst [vmem:[%s4199_s29 + $0x50] sm:$0xff] %v242_v10  ;;  %245 = vst [vmem:[%s4199_s29 + $0x58] sm:$0xff] %v244_v11  ;;  %v248_v13 = vld [vmem:[%s4194_s15 + $0x128] sm:$0xff]  ;;  %v250_v14 = vld [vmem:[%s4194_s15 + $0x130] sm:$0xff] }
  0x32   : > { %247 = vst [vmem:[%s4199_s29 + $0x60] sm:$0xff] %v246_v12  ;;  %249 = vst [vmem:[%s4199_s29 + $0x68] sm:$0xff] %v248_v13  ;;  %v252_v15 = vld [vmem:[%s4194_s15 + $0x138] sm:$0xff]  ;;  %v254_v16 = vld [vmem:[%s4194_s15 + $0x200] sm:$0xff] }
  0x33   : > { %251 = vst [vmem:[%s4199_s29 + $0x70] sm:$0xff] %v250_v14  ;;  %v256_v17 = vld [vmem:[%s4194_s15 + $0x208] sm:$0xff]  ;;  %253 = vst [vmem:[%s4199_s29 + $0x78] sm:$0xff] %v252_v15  ;;  %v258_v18 = vld [vmem:[%s4194_s15 + $0x210] sm:$0xff] }
  0x34   : > { %255 = vst [vmem:[%s4199_s29 + $0x80] sm:$0xff] %v254_v16  ;;  %257 = vst [vmem:[%s4199_s29 + $0x88] sm:$0xff] %v256_v17  ;;  %v260_v19 = vld [vmem:[%s4194_s15 + $0x218] sm:$0xff]  ;;  %v262_v20 = vld [vmem:[%s4194_s15 + $0x220] sm:$0xff] }
  0x35   : > { %259 = vst [vmem:[%s4199_s29 + $0x90] sm:$0xff] %v258_v18  ;;  %261 = vst [vmem:[%s4199_s29 + $0x98] sm:$0xff] %v260_v19  ;;  %v264_v21 = vld [vmem:[%s4194_s15 + $0x228] sm:$0xff]  ;;  %v266_v22 = vld [vmem:[%s4194_s15 + $0x230] sm:$0xff] }
  0x36   : > { %263 = vst [vmem:[%s4199_s29 + $0xa0] sm:$0xff] %v262_v20  ;;  %v268_v23 = vld [vmem:[%s4194_s15 + $0x238] sm:$0xff]  ;;  %265 = vst [vmem:[%s4199_s29 + $0xa8] sm:$0xff] %v264_v21  ;;  %v270_v24 = vld [vmem:[%s4194_s15 + $0x300] sm:$0xff] }
  0x37   : > { %267 = vst [vmem:[%s4199_s29 + $0xb0] sm:$0xff] %v266_v22  ;;  %269 = vst [vmem:[%s4199_s29 + $0xb8] sm:$0xff] %v268_v23  ;;  %v272_v25 = vld [vmem:[%s4194_s15 + $0x308] sm:$0xff]  ;;  %v274_v26 = vld [vmem:[%s4194_s15 + $0x310] sm:$0xff] }
  0x38   : > { %271 = vst [vmem:[%s4199_s29 + $0xc0] sm:$0xff] %v270_v24  ;;  %273 = vst [vmem:[%s4199_s29 + $0xc8] sm:$0xff] %v272_v25  ;;  %v276_v27 = vld [vmem:[%s4194_s15 + $0x318] sm:$0xff]  ;;  %v278_v28 = vld [vmem:[%s4194_s15 + $0x320] sm:$0xff] }
  0x39   : > { %275 = vst [vmem:[%s4199_s29 + $0xd0] sm:$0xff] %v274_v26  ;;  %v280_v29 = vld [vmem:[%s4194_s15 + $0x328] sm:$0xff]  ;;  %277 = vst [vmem:[%s4199_s29 + $0xd8] sm:$0xff] %v276_v27  ;;  %v282_v30 = vld [vmem:[%s4194_s15 + $0x330] sm:$0xff] }
  0x3a   : > { %279 = vst [vmem:[%s4199_s29 + $0xe0] sm:$0xff] %v278_v28  ;;  %281 = vst [vmem:[%s4199_s29 + $0xe8] sm:$0xff] %v280_v29  ;;  %v284_v31 = vld [vmem:[%s4194_s15 + $0x338] sm:$0xff] }
  0x3b   : > { %283 = vst [vmem:[%s4199_s29 + $0xf0] sm:$0xff] %v282_v30  ;;  %285 = vst [vmem:[%s4199_s29 + $0xf8] sm:$0xff] %v284_v31 }
  0x3c PF: > { %291 = sbr.rel (!%p4169_p9) target bundleno = 240 (0xf0), region = 43  ;;  %s293_s9 = sand.u32 (%p4169_p9), 1, %s4027_s21  }
  0x3d   : > { %s3525_s7 = sshll.u32 (%p4169_p9), %s4047_s26, 9  ;;  %s3349_s8 = sshll.u32 (%p4169_p9), %s293_s9, 10 }
  0x3e   : > { %s298_s12 = sadd.s32 (%p4169_p9), %s4051_s27, %s3525_s7  ;;  %s5055_s1 = sld [smem:[#allocation10_spill]] (%p4169_p9) }
  0x3f   : > { %s3352_s10 = sshll.u32 (%p4169_p9), %s298_s12, 2  ;;  %s4275_s14 = scalar_lea.vmem (%p4169_p9), [#allocation4], %s3349_s8 }
  0x44   : > { %s4270_s6 = scalar_lea.vmem %s5055_s1, %s3352_s10 }
  0x45   : > { %v316_v32 = vld [vmem:[%s4270_s6] sm:$0xf]  ;;  %v318_v33 = vld [vmem:[%s4270_s6 + $0x8] sm:$0xf]  ;;  %v320_v34 = vld [vmem:[%s4270_s6 + $0x10] sm:$0xf] }
  0x46   : > { %317 = vst [vmem:[%s4275_s14] sm:$0xf] %v316_v32  ;;  %319 = vst [vmem:[%s4275_s14 + $0x4] sm:$0xf] %v318_v33  ;;  %v322_v35 = vld [vmem:[%s4270_s6 + $0x18] sm:$0xf] }
  0x47   : > { %321 = vst [vmem:[%s4275_s14 + $0x8] sm:$0xf] %v320_v34  ;;  %v324_v36 = vld [vmem:[%s4270_s6 + $0x20] sm:$0xf]  ;;  %v326_v37 = vld [vmem:[%s4270_s6 + $0x28] sm:$0xf] }
  0x48   : > { %323 = vst [vmem:[%s4275_s14 + $0xc] sm:$0xf] %v322_v35  ;;  %325 = vst [vmem:[%s4275_s14 + $0x10] sm:$0xf] %v324_v36  ;;  %v328_v38 = vld [vmem:[%s4270_s6 + $0x30] sm:$0xf] }
  0x49   : > { %327 = vst [vmem:[%s4275_s14 + $0x14] sm:$0xf] %v326_v37  ;;  %v330_v39 = vld [vmem:[%s4270_s6 + $0x38] sm:$0xf]  ;;  %v332_v40 = vld [vmem:[%s4270_s6 + $0x40] sm:$0xf] }
  0x4a   : > { %329 = vst [vmem:[%s4275_s14 + $0x18] sm:$0xf] %v328_v38  ;;  %331 = vst [vmem:[%s4275_s14 + $0x1c] sm:$0xf] %v330_v39  ;;  %v334_v41 = vld [vmem:[%s4270_s6 + $0x48] sm:$0xf] }
  0x4b   : > { %333 = vst [vmem:[%s4275_s14 + $0x20] sm:$0xf] %v332_v40  ;;  %v336_v42 = vld [vmem:[%s4270_s6 + $0x50] sm:$0xf]  ;;  %v338_v43 = vld [vmem:[%s4270_s6 + $0x58] sm:$0xf] }
  0x4c   : > { %335 = vst [vmem:[%s4275_s14 + $0x24] sm:$0xf] %v334_v41  ;;  %337 = vst [vmem:[%s4275_s14 + $0x28] sm:$0xf] %v336_v42  ;;  %v340_v44 = vld [vmem:[%s4270_s6 + $0x60] sm:$0xf] }
  0x4d   : > { %339 = vst [vmem:[%s4275_s14 + $0x2c] sm:$0xf] %v338_v43  ;;  %v342_v45 = vld [vmem:[%s4270_s6 + $0x68] sm:$0xf]  ;;  %v344_v46 = vld [vmem:[%s4270_s6 + $0x70] sm:$0xf] }
  0x4e   : > { %341 = vst [vmem:[%s4275_s14 + $0x30] sm:$0xf] %v340_v44  ;;  %343 = vst [vmem:[%s4275_s14 + $0x34] sm:$0xf] %v342_v45  ;;  %v346_v47 = vld [vmem:[%s4270_s6 + $0x78] sm:$0xf] }
  0x4f   : > { %345 = vst [vmem:[%s4275_s14 + $0x38] sm:$0xf] %v344_v46  ;;  %v348_v48 = vld [vmem:[%s4270_s6 + $0x80] sm:$0xf]  ;;  %v350_v49 = vld [vmem:[%s4270_s6 + $0x88] sm:$0xf] }
  0x50   : > { %347 = vst [vmem:[%s4275_s14 + $0x3c] sm:$0xf] %v346_v47  ;;  %349 = vst [vmem:[%s4275_s14 + $0x40] sm:$0xf] %v348_v48  ;;  %v352_v50 = vld [vmem:[%s4270_s6 + $0x90] sm:$0xf] }
  0x51   : > { %351 = vst [vmem:[%s4275_s14 + $0x44] sm:$0xf] %v350_v49  ;;  %v354_v51 = vld [vmem:[%s4270_s6 + $0x98] sm:$0xf]  ;;  %v356_v52 = vld [vmem:[%s4270_s6 + $0xa0] sm:$0xf] }
  0x52   : > { %353 = vst [vmem:[%s4275_s14 + $0x48] sm:$0xf] %v352_v50  ;;  %355 = vst [vmem:[%s4275_s14 + $0x4c] sm:$0xf] %v354_v51  ;;  %v358_v53 = vld [vmem:[%s4270_s6 + $0xa8] sm:$0xf] }
  0x53   : > { %357 = vst [vmem:[%s4275_s14 + $0x50] sm:$0xf] %v356_v52  ;;  %v360_v54 = vld [vmem:[%s4270_s6 + $0xb0] sm:$0xf]  ;;  %v362_v55 = vld [vmem:[%s4270_s6 + $0xb8] sm:$0xf] }
  0x54   : > { %359 = vst [vmem:[%s4275_s14 + $0x54] sm:$0xf] %v358_v53  ;;  %361 = vst [vmem:[%s4275_s14 + $0x58] sm:$0xf] %v360_v54  ;;  %v364_v56 = vld [vmem:[%s4270_s6 + $0xc0] sm:$0xf] }
  0x55   : > { %363 = vst [vmem:[%s4275_s14 + $0x5c] sm:$0xf] %v362_v55  ;;  %v366_v57 = vld [vmem:[%s4270_s6 + $0xc8] sm:$0xf]  ;;  %v368_v58 = vld [vmem:[%s4270_s6 + $0xd0] sm:$0xf] }
  0x56   : > { %365 = vst [vmem:[%s4275_s14 + $0x60] sm:$0xf] %v364_v56  ;;  %367 = vst [vmem:[%s4275_s14 + $0x64] sm:$0xf] %v366_v57  ;;  %v370_v59 = vld [vmem:[%s4270_s6 + $0xd8] sm:$0xf] }
  0x57   : > { %369 = vst [vmem:[%s4275_s14 + $0x68] sm:$0xf] %v368_v58  ;;  %v372_v60 = vld [vmem:[%s4270_s6 + $0xe0] sm:$0xf]  ;;  %v374_v61 = vld [vmem:[%s4270_s6 + $0xe8] sm:$0xf] }
  0x58   : > { %371 = vst [vmem:[%s4275_s14 + $0x6c] sm:$0xf] %v370_v59  ;;  %373 = vst [vmem:[%s4275_s14 + $0x70] sm:$0xf] %v372_v60  ;;  %v376_v62 = vld [vmem:[%s4270_s6 + $0xf0] sm:$0xf] }
  0x59   : > { %375 = vst [vmem:[%s4275_s14 + $0x74] sm:$0xf] %v374_v61  ;;  %v378_v63 = vld [vmem:[%s4270_s6 + $0xf8] sm:$0xf]  ;;  %v380_v0 = vld [vmem:[%s4270_s6 + $0x100] sm:$0xf] }
  0x5a   : > { %377 = vst [vmem:[%s4275_s14 + $0x78] sm:$0xf] %v376_v62  ;;  %379 = vst [vmem:[%s4275_s14 + $0x7c] sm:$0xf] %v378_v63  ;;  %v382_v1 = vld [vmem:[%s4270_s6 + $0x108] sm:$0xf] }
  0x5b   : > { %381 = vst [vmem:[%s4275_s14 + $0x80] sm:$0xf] %v380_v0  ;;  %v384_v2 = vld [vmem:[%s4270_s6 + $0x110] sm:$0xf]  ;;  %v386_v3 = vld [vmem:[%s4270_s6 + $0x118] sm:$0xf] }
  0x5c   : > { %383 = vst [vmem:[%s4275_s14 + $0x84] sm:$0xf] %v382_v1  ;;  %385 = vst [vmem:[%s4275_s14 + $0x88] sm:$0xf] %v384_v2  ;;  %v388_v4 = vld [vmem:[%s4270_s6 + $0x120] sm:$0xf] }
  0x5d   : > { %387 = vst [vmem:[%s4275_s14 + $0x8c] sm:$0xf] %v386_v3  ;;  %v390_v5 = vld [vmem:[%s4270_s6 + $0x128] sm:$0xf]  ;;  %v392_v6 = vld [vmem:[%s4270_s6 + $0x130] sm:$0xf] }
  0x5e   : > { %389 = vst [vmem:[%s4275_s14 + $0x90] sm:$0xf] %v388_v4  ;;  %391 = vst [vmem:[%s4275_s14 + $0x94] sm:$0xf] %v390_v5  ;;  %v394_v7 = vld [vmem:[%s4270_s6 + $0x138] sm:$0xf] }
  0x5f   : > { %393 = vst [vmem:[%s4275_s14 + $0x98] sm:$0xf] %v392_v6  ;;  %v396_v8 = vld [vmem:[%s4270_s6 + $0x140] sm:$0xf]  ;;  %v398_v9 = vld [vmem:[%s4270_s6 + $0x148] sm:$0xf] }
  0x60   : > { %395 = vst [vmem:[%s4275_s14 + $0x9c] sm:$0xf] %v394_v7  ;;  %397 = vst [vmem:[%s4275_s14 + $0xa0] sm:$0xf] %v396_v8  ;;  %v400_v10 = vld [vmem:[%s4270_s6 + $0x150] sm:$0xf] }
  0x61   : > { %399 = vst [vmem:[%s4275_s14 + $0xa4] sm:$0xf] %v398_v9  ;;  %v402_v11 = vld [vmem:[%s4270_s6 + $0x158] sm:$0xf]  ;;  %v404_v12 = vld [vmem:[%s4270_s6 + $0x160] sm:$0xf] }
  0x62   : > { %401 = vst [vmem:[%s4275_s14 + $0xa8] sm:$0xf] %v400_v10  ;;  %403 = vst [vmem:[%s4275_s14 + $0xac] sm:$0xf] %v402_v11  ;;  %v406_v13 = vld [vmem:[%s4270_s6 + $0x168] sm:$0xf] }
  0x63   : > { %405 = vst [vmem:[%s4275_s14 + $0xb0] sm:$0xf] %v404_v12  ;;  %v408_v14 = vld [vmem:[%s4270_s6 + $0x170] sm:$0xf]  ;;  %v410_v15 = vld [vmem:[%s4270_s6 + $0x178] sm:$0xf] }
  0x64   : > { %407 = vst [vmem:[%s4275_s14 + $0xb4] sm:$0xf] %v406_v13  ;;  %409 = vst [vmem:[%s4275_s14 + $0xb8] sm:$0xf] %v408_v14  ;;  %v412_v16 = vld [vmem:[%s4270_s6 + $0x180] sm:$0xf] }
  0x65   : > { %411 = vst [vmem:[%s4275_s14 + $0xbc] sm:$0xf] %v410_v15  ;;  %v414_v17 = vld [vmem:[%s4270_s6 + $0x188] sm:$0xf]  ;;  %v416_v18 = vld [vmem:[%s4270_s6 + $0x190] sm:$0xf] }
  0x66   : > { %413 = vst [vmem:[%s4275_s14 + $0xc0] sm:$0xf] %v412_v16  ;;  %415 = vst [vmem:[%s4275_s14 + $0xc4] sm:$0xf] %v414_v17  ;;  %v418_v19 = vld [vmem:[%s4270_s6 + $0x198] sm:$0xf] }
  0x67   : > { %417 = vst [vmem:[%s4275_s14 + $0xc8] sm:$0xf] %v416_v18  ;;  %v420_v20 = vld [vmem:[%s4270_s6 + $0x1a0] sm:$0xf]  ;;  %v422_v21 = vld [vmem:[%s4270_s6 + $0x1a8] sm:$0xf] }
  0x68   : > { %419 = vst [vmem:[%s4275_s14 + $0xcc] sm:$0xf] %v418_v19  ;;  %421 = vst [vmem:[%s4275_s14 + $0xd0] sm:$0xf] %v420_v20  ;;  %v424_v22 = vld [vmem:[%s4270_s6 + $0x1b0] sm:$0xf] }
  0x69   : > { %423 = vst [vmem:[%s4275_s14 + $0xd4] sm:$0xf] %v422_v21  ;;  %v426_v23 = vld [vmem:[%s4270_s6 + $0x1b8] sm:$0xf]  ;;  %v428_v24 = vld [vmem:[%s4270_s6 + $0x1c0] sm:$0xf] }
  0x6a   : > { %425 = vst [vmem:[%s4275_s14 + $0xd8] sm:$0xf] %v424_v22  ;;  %427 = vst [vmem:[%s4275_s14 + $0xdc] sm:$0xf] %v426_v23  ;;  %v430_v25 = vld [vmem:[%s4270_s6 + $0x1c8] sm:$0xf] }
  0x6b   : > { %429 = vst [vmem:[%s4275_s14 + $0xe0] sm:$0xf] %v428_v24  ;;  %v432_v26 = vld [vmem:[%s4270_s6 + $0x1d0] sm:$0xf]  ;;  %v434_v27 = vld [vmem:[%s4270_s6 + $0x1d8] sm:$0xf] }
  0x6c   : > { %431 = vst [vmem:[%s4275_s14 + $0xe4] sm:$0xf] %v430_v25  ;;  %433 = vst [vmem:[%s4275_s14 + $0xe8] sm:$0xf] %v432_v26  ;;  %v436_v28 = vld [vmem:[%s4270_s6 + $0x1e0] sm:$0xf] }
  0x6d   : > { %435 = vst [vmem:[%s4275_s14 + $0xec] sm:$0xf] %v434_v27  ;;  %v438_v29 = vld [vmem:[%s4270_s6 + $0x1e8] sm:$0xf]  ;;  %v440_v30 = vld [vmem:[%s4270_s6 + $0x1f0] sm:$0xf] }
  0x6e   : > { %437 = vst [vmem:[%s4275_s14 + $0xf0] sm:$0xf] %v436_v28  ;;  %439 = vst [vmem:[%s4275_s14 + $0xf4] sm:$0xf] %v438_v29  ;;  %v442_v31 = vld [vmem:[%s4270_s6 + $0x1f8] sm:$0xf] }
  0x6f   : > { %441 = vst [vmem:[%s4275_s14 + $0xf8] sm:$0xf] %v440_v30  ;;  %v444_v32 = vld [vmem:[%s4270_s6 + $0x200] sm:$0xf]  ;;  %v446_v33 = vld [vmem:[%s4270_s6 + $0x208] sm:$0xf] }
  0x70   : > { %443 = vst [vmem:[%s4275_s14 + $0xfc] sm:$0xf] %v442_v31  ;;  %445 = vst [vmem:[%s4275_s14 + $0x100] sm:$0xf] %v444_v32  ;;  %v448_v34 = vld [vmem:[%s4270_s6 + $0x210] sm:$0xf] }
  0x71   : > { %447 = vst [vmem:[%s4275_s14 + $0x104] sm:$0xf] %v446_v33  ;;  %v450_v35 = vld [vmem:[%s4270_s6 + $0x218] sm:$0xf]  ;;  %v452_v36 = vld [vmem:[%s4270_s6 + $0x220] sm:$0xf] }
  0x72   : > { %449 = vst [vmem:[%s4275_s14 + $0x108] sm:$0xf] %v448_v34  ;;  %451 = vst [vmem:[%s4275_s14 + $0x10c] sm:$0xf] %v450_v35  ;;  %v454_v37 = vld [vmem:[%s4270_s6 + $0x228] sm:$0xf] }
  0x73   : > { %453 = vst [vmem:[%s4275_s14 + $0x110] sm:$0xf] %v452_v36  ;;  %v456_v38 = vld [vmem:[%s4270_s6 + $0x230] sm:$0xf]  ;;  %v458_v39 = vld [vmem:[%s4270_s6 + $0x238] sm:$0xf] }
  0x74   : > { %455 = vst [vmem:[%s4275_s14 + $0x114] sm:$0xf] %v454_v37  ;;  %457 = vst [vmem:[%s4275_s14 + $0x118] sm:$0xf] %v456_v38  ;;  %v460_v40 = vld [vmem:[%s4270_s6 + $0x240] sm:$0xf] }
  0x75   : > { %459 = vst [vmem:[%s4275_s14 + $0x11c] sm:$0xf] %v458_v39  ;;  %v462_v41 = vld [vmem:[%s4270_s6 + $0x248] sm:$0xf]  ;;  %v464_v42 = vld [vmem:[%s4270_s6 + $0x250] sm:$0xf] }
  0x76   : > { %461 = vst [vmem:[%s4275_s14 + $0x120] sm:$0xf] %v460_v40  ;;  %463 = vst [vmem:[%s4275_s14 + $0x124] sm:$0xf] %v462_v41  ;;  %v466_v43 = vld [vmem:[%s4270_s6 + $0x258] sm:$0xf] }
  0x77   : > { %465 = vst [vmem:[%s4275_s14 + $0x128] sm:$0xf] %v464_v42  ;;  %v468_v44 = vld [vmem:[%s4270_s6 + $0x260] sm:$0xf]  ;;  %v470_v45 = vld [vmem:[%s4270_s6 + $0x268] sm:$0xf] }
  0x78   : > { %467 = vst [vmem:[%s4275_s14 + $0x12c] sm:$0xf] %v466_v43  ;;  %469 = vst [vmem:[%s4275_s14 + $0x130] sm:$0xf] %v468_v44  ;;  %v472_v46 = vld [vmem:[%s4270_s6 + $0x270] sm:$0xf] }
  0x79   : > { %471 = vst [vmem:[%s4275_s14 + $0x134] sm:$0xf] %v470_v45  ;;  %v474_v47 = vld [vmem:[%s4270_s6 + $0x278] sm:$0xf]  ;;  %v476_v48 = vld [vmem:[%s4270_s6 + $0x280] sm:$0xf] }
  0x7a   : > { %473 = vst [vmem:[%s4275_s14 + $0x138] sm:$0xf] %v472_v46  ;;  %475 = vst [vmem:[%s4275_s14 + $0x13c] sm:$0xf] %v474_v47  ;;  %v478_v49 = vld [vmem:[%s4270_s6 + $0x288] sm:$0xf] }
  0x7b   : > { %477 = vst [vmem:[%s4275_s14 + $0x140] sm:$0xf] %v476_v48  ;;  %v480_v50 = vld [vmem:[%s4270_s6 + $0x290] sm:$0xf]  ;;  %v482_v51 = vld [vmem:[%s4270_s6 + $0x298] sm:$0xf] }
  0x7c   : > { %479 = vst [vmem:[%s4275_s14 + $0x144] sm:$0xf] %v478_v49  ;;  %481 = vst [vmem:[%s4275_s14 + $0x148] sm:$0xf] %v480_v50  ;;  %v484_v52 = vld [vmem:[%s4270_s6 + $0x2a0] sm:$0xf] }
  0x7d   : > { %483 = vst [vmem:[%s4275_s14 + $0x14c] sm:$0xf] %v482_v51  ;;  %v486_v53 = vld [vmem:[%s4270_s6 + $0x2a8] sm:$0xf]  ;;  %v488_v54 = vld [vmem:[%s4270_s6 + $0x2b0] sm:$0xf] }
  0x7e   : > { %485 = vst [vmem:[%s4275_s14 + $0x150] sm:$0xf] %v484_v52  ;;  %487 = vst [vmem:[%s4275_s14 + $0x154] sm:$0xf] %v486_v53  ;;  %v490_v55 = vld [vmem:[%s4270_s6 + $0x2b8] sm:$0xf] }
  0x7f   : > { %489 = vst [vmem:[%s4275_s14 + $0x158] sm:$0xf] %v488_v54  ;;  %v492_v56 = vld [vmem:[%s4270_s6 + $0x2c0] sm:$0xf]  ;;  %v494_v57 = vld [vmem:[%s4270_s6 + $0x2c8] sm:$0xf] }
  0x80   : > { %491 = vst [vmem:[%s4275_s14 + $0x15c] sm:$0xf] %v490_v55  ;;  %493 = vst [vmem:[%s4275_s14 + $0x160] sm:$0xf] %v492_v56  ;;  %v496_v58 = vld [vmem:[%s4270_s6 + $0x2d0] sm:$0xf] }
  0x81   : > { %495 = vst [vmem:[%s4275_s14 + $0x164] sm:$0xf] %v494_v57  ;;  %v498_v59 = vld [vmem:[%s4270_s6 + $0x2d8] sm:$0xf]  ;;  %v500_v60 = vld [vmem:[%s4270_s6 + $0x2e0] sm:$0xf] }
  0x82   : > { %497 = vst [vmem:[%s4275_s14 + $0x168] sm:$0xf] %v496_v58  ;;  %499 = vst [vmem:[%s4275_s14 + $0x16c] sm:$0xf] %v498_v59  ;;  %v502_v61 = vld [vmem:[%s4270_s6 + $0x2e8] sm:$0xf] }
  0x83   : > { %501 = vst [vmem:[%s4275_s14 + $0x170] sm:$0xf] %v500_v60  ;;  %v504_v62 = vld [vmem:[%s4270_s6 + $0x2f0] sm:$0xf]  ;;  %v506_v63 = vld [vmem:[%s4270_s6 + $0x2f8] sm:$0xf] }
  0x84   : > { %503 = vst [vmem:[%s4275_s14 + $0x174] sm:$0xf] %v502_v61  ;;  %505 = vst [vmem:[%s4275_s14 + $0x178] sm:$0xf] %v504_v62  ;;  %v508_v0 = vld [vmem:[%s4270_s6 + $0x300] sm:$0xf] }
  0x85   : > { %507 = vst [vmem:[%s4275_s14 + $0x17c] sm:$0xf] %v506_v63  ;;  %v510_v1 = vld [vmem:[%s4270_s6 + $0x308] sm:$0xf]  ;;  %v512_v2 = vld [vmem:[%s4270_s6 + $0x310] sm:$0xf] }
  0x86   : > { %509 = vst [vmem:[%s4275_s14 + $0x180] sm:$0xf] %v508_v0  ;;  %511 = vst [vmem:[%s4275_s14 + $0x184] sm:$0xf] %v510_v1  ;;  %v514_v3 = vld [vmem:[%s4270_s6 + $0x318] sm:$0xf] }
  0x87   : > { %513 = vst [vmem:[%s4275_s14 + $0x188] sm:$0xf] %v512_v2  ;;  %v516_v4 = vld [vmem:[%s4270_s6 + $0x320] sm:$0xf]  ;;  %v518_v5 = vld [vmem:[%s4270_s6 + $0x328] sm:$0xf] }
  0x88   : > { %515 = vst [vmem:[%s4275_s14 + $0x18c] sm:$0xf] %v514_v3  ;;  %517 = vst [vmem:[%s4275_s14 + $0x190] sm:$0xf] %v516_v4  ;;  %v520_v6 = vld [vmem:[%s4270_s6 + $0x330] sm:$0xf] }
  0x89   : > { %519 = vst [vmem:[%s4275_s14 + $0x194] sm:$0xf] %v518_v5  ;;  %v522_v7 = vld [vmem:[%s4270_s6 + $0x338] sm:$0xf]  ;;  %v524_v8 = vld [vmem:[%s4270_s6 + $0x340] sm:$0xf] }
  0x8a   : > { %521 = vst [vmem:[%s4275_s14 + $0x198] sm:$0xf] %v520_v6  ;;  %523 = vst [vmem:[%s4275_s14 + $0x19c] sm:$0xf] %v522_v7  ;;  %v526_v9 = vld [vmem:[%s4270_s6 + $0x348] sm:$0xf] }
  0x8b   : > { %525 = vst [vmem:[%s4275_s14 + $0x1a0] sm:$0xf] %v524_v8  ;;  %v528_v10 = vld [vmem:[%s4270_s6 + $0x350] sm:$0xf]  ;;  %v530_v11 = vld [vmem:[%s4270_s6 + $0x358] sm:$0xf] }
  0x8c   : > { %527 = vst [vmem:[%s4275_s14 + $0x1a4] sm:$0xf] %v526_v9  ;;  %529 = vst [vmem:[%s4275_s14 + $0x1a8] sm:$0xf] %v528_v10  ;;  %v532_v12 = vld [vmem:[%s4270_s6 + $0x360] sm:$0xf] }
  0x8d   : > { %531 = vst [vmem:[%s4275_s14 + $0x1ac] sm:$0xf] %v530_v11  ;;  %v534_v13 = vld [vmem:[%s4270_s6 + $0x368] sm:$0xf]  ;;  %v536_v14 = vld [vmem:[%s4270_s6 + $0x370] sm:$0xf] }
  0x8e   : > { %533 = vst [vmem:[%s4275_s14 + $0x1b0] sm:$0xf] %v532_v12  ;;  %535 = vst [vmem:[%s4275_s14 + $0x1b4] sm:$0xf] %v534_v13  ;;  %v538_v15 = vld [vmem:[%s4270_s6 + $0x378] sm:$0xf] }
  0x8f   : > { %537 = vst [vmem:[%s4275_s14 + $0x1b8] sm:$0xf] %v536_v14  ;;  %v540_v16 = vld [vmem:[%s4270_s6 + $0x380] sm:$0xf]  ;;  %v542_v17 = vld [vmem:[%s4270_s6 + $0x388] sm:$0xf] }
  0x90   : > { %539 = vst [vmem:[%s4275_s14 + $0x1bc] sm:$0xf] %v538_v15  ;;  %541 = vst [vmem:[%s4275_s14 + $0x1c0] sm:$0xf] %v540_v16  ;;  %v544_v18 = vld [vmem:[%s4270_s6 + $0x390] sm:$0xf] }
  0x91   : > { %543 = vst [vmem:[%s4275_s14 + $0x1c4] sm:$0xf] %v542_v17  ;;  %v546_v19 = vld [vmem:[%s4270_s6 + $0x398] sm:$0xf]  ;;  %v548_v20 = vld [vmem:[%s4270_s6 + $0x3a0] sm:$0xf] }
  0x92   : > { %545 = vst [vmem:[%s4275_s14 + $0x1c8] sm:$0xf] %v544_v18  ;;  %547 = vst [vmem:[%s4275_s14 + $0x1cc] sm:$0xf] %v546_v19  ;;  %v550_v21 = vld [vmem:[%s4270_s6 + $0x3a8] sm:$0xf] }
  0x93   : > { %549 = vst [vmem:[%s4275_s14 + $0x1d0] sm:$0xf] %v548_v20  ;;  %v552_v22 = vld [vmem:[%s4270_s6 + $0x3b0] sm:$0xf]  ;;  %v554_v23 = vld [vmem:[%s4270_s6 + $0x3b8] sm:$0xf] }
  0x94   : > { %551 = vst [vmem:[%s4275_s14 + $0x1d4] sm:$0xf] %v550_v21  ;;  %553 = vst [vmem:[%s4275_s14 + $0x1d8] sm:$0xf] %v552_v22  ;;  %v556_v24 = vld [vmem:[%s4270_s6 + $0x3c0] sm:$0xf] }
  0x95   : > { %555 = vst [vmem:[%s4275_s14 + $0x1dc] sm:$0xf] %v554_v23  ;;  %v558_v25 = vld [vmem:[%s4270_s6 + $0x3c8] sm:$0xf]  ;;  %v560_v26 = vld [vmem:[%s4270_s6 + $0x3d0] sm:$0xf] }
  0x96   : > { %557 = vst [vmem:[%s4275_s14 + $0x1e0] sm:$0xf] %v556_v24  ;;  %559 = vst [vmem:[%s4275_s14 + $0x1e4] sm:$0xf] %v558_v25  ;;  %v562_v27 = vld [vmem:[%s4270_s6 + $0x3d8] sm:$0xf] }
  0x97   : > { %561 = vst [vmem:[%s4275_s14 + $0x1e8] sm:$0xf] %v560_v26  ;;  %v564_v28 = vld [vmem:[%s4270_s6 + $0x3e0] sm:$0xf]  ;;  %v566_v29 = vld [vmem:[%s4270_s6 + $0x3e8] sm:$0xf] }
  0x98   : > { %563 = vst [vmem:[%s4275_s14 + $0x1ec] sm:$0xf] %v562_v27  ;;  %565 = vst [vmem:[%s4275_s14 + $0x1f0] sm:$0xf] %v564_v28  ;;  %v568_v30 = vld [vmem:[%s4270_s6 + $0x3f0] sm:$0xf] }
  0x99   : > { %567 = vst [vmem:[%s4275_s14 + $0x1f4] sm:$0xf] %v566_v29  ;;  %v570_v31 = vld [vmem:[%s4270_s6 + $0x3f8] sm:$0xf]  ;;  %v572_v32 = vld [vmem:[%s4270_s6 + $0x400] sm:$0xf] }
  0x9a   : > { %569 = vst [vmem:[%s4275_s14 + $0x1f8] sm:$0xf] %v568_v30  ;;  %571 = vst [vmem:[%s4275_s14 + $0x1fc] sm:$0xf] %v570_v31  ;;  %v574_v33 = vld [vmem:[%s4270_s6 + $0x408] sm:$0xf] }
  0x9b   : > { %573 = vst [vmem:[%s4275_s14 + $0x200] sm:$0xf] %v572_v32  ;;  %v576_v34 = vld [vmem:[%s4270_s6 + $0x410] sm:$0xf]  ;;  %v578_v35 = vld [vmem:[%s4270_s6 + $0x418] sm:$0xf] }
  0x9c   : > { %575 = vst [vmem:[%s4275_s14 + $0x204] sm:$0xf] %v574_v33  ;;  %577 = vst [vmem:[%s4275_s14 + $0x208] sm:$0xf] %v576_v34  ;;  %v580_v36 = vld [vmem:[%s4270_s6 + $0x420] sm:$0xf] }
  0x9d   : > { %579 = vst [vmem:[%s4275_s14 + $0x20c] sm:$0xf] %v578_v35  ;;  %v582_v37 = vld [vmem:[%s4270_s6 + $0x428] sm:$0xf]  ;;  %v584_v38 = vld [vmem:[%s4270_s6 + $0x430] sm:$0xf] }
  0x9e   : > { %581 = vst [vmem:[%s4275_s14 + $0x210] sm:$0xf] %v580_v36  ;;  %583 = vst [vmem:[%s4275_s14 + $0x214] sm:$0xf] %v582_v37  ;;  %v586_v39 = vld [vmem:[%s4270_s6 + $0x438] sm:$0xf] }
  0x9f   : > { %585 = vst [vmem:[%s4275_s14 + $0x218] sm:$0xf] %v584_v38  ;;  %v588_v40 = vld [vmem:[%s4270_s6 + $0x440] sm:$0xf]  ;;  %v590_v41 = vld [vmem:[%s4270_s6 + $0x448] sm:$0xf] }
  0xa0   : > { %587 = vst [vmem:[%s4275_s14 + $0x21c] sm:$0xf] %v586_v39  ;;  %589 = vst [vmem:[%s4275_s14 + $0x220] sm:$0xf] %v588_v40  ;;  %v592_v42 = vld [vmem:[%s4270_s6 + $0x450] sm:$0xf] }
  0xa1   : > { %591 = vst [vmem:[%s4275_s14 + $0x224] sm:$0xf] %v590_v41  ;;  %v594_v43 = vld [vmem:[%s4270_s6 + $0x458] sm:$0xf]  ;;  %v596_v44 = vld [vmem:[%s4270_s6 + $0x460] sm:$0xf] }
  0xa2   : > { %593 = vst [vmem:[%s4275_s14 + $0x228] sm:$0xf] %v592_v42  ;;  %595 = vst [vmem:[%s4275_s14 + $0x22c] sm:$0xf] %v594_v43  ;;  %v598_v45 = vld [vmem:[%s4270_s6 + $0x468] sm:$0xf] }
  0xa3   : > { %597 = vst [vmem:[%s4275_s14 + $0x230] sm:$0xf] %v596_v44  ;;  %v600_v46 = vld [vmem:[%s4270_s6 + $0x470] sm:$0xf]  ;;  %v602_v47 = vld [vmem:[%s4270_s6 + $0x478] sm:$0xf] }
  0xa4   : > { %599 = vst [vmem:[%s4275_s14 + $0x234] sm:$0xf] %v598_v45  ;;  %601 = vst [vmem:[%s4275_s14 + $0x238] sm:$0xf] %v600_v46  ;;  %v604_v48 = vld [vmem:[%s4270_s6 + $0x480] sm:$0xf] }
  0xa5   : > { %603 = vst [vmem:[%s4275_s14 + $0x23c] sm:$0xf] %v602_v47  ;;  %v606_v49 = vld [vmem:[%s4270_s6 + $0x488] sm:$0xf]  ;;  %v608_v50 = vld [vmem:[%s4270_s6 + $0x490] sm:$0xf] }
  0xa6   : > { %605 = vst [vmem:[%s4275_s14 + $0x240] sm:$0xf] %v604_v48  ;;  %607 = vst [vmem:[%s4275_s14 + $0x244] sm:$0xf] %v606_v49  ;;  %v610_v51 = vld [vmem:[%s4270_s6 + $0x498] sm:$0xf] }
  0xa7   : > { %609 = vst [vmem:[%s4275_s14 + $0x248] sm:$0xf] %v608_v50  ;;  %v612_v52 = vld [vmem:[%s4270_s6 + $0x4a0] sm:$0xf]  ;;  %v614_v53 = vld [vmem:[%s4270_s6 + $0x4a8] sm:$0xf] }
  0xa8   : > { %611 = vst [vmem:[%s4275_s14 + $0x24c] sm:$0xf] %v610_v51  ;;  %613 = vst [vmem:[%s4275_s14 + $0x250] sm:$0xf] %v612_v52  ;;  %v616_v54 = vld [vmem:[%s4270_s6 + $0x4b0] sm:$0xf] }
  0xa9   : > { %615 = vst [vmem:[%s4275_s14 + $0x254] sm:$0xf] %v614_v53  ;;  %v618_v55 = vld [vmem:[%s4270_s6 + $0x4b8] sm:$0xf]  ;;  %v620_v56 = vld [vmem:[%s4270_s6 + $0x4c0] sm:$0xf] }
  0xaa   : > { %617 = vst [vmem:[%s4275_s14 + $0x258] sm:$0xf] %v616_v54  ;;  %619 = vst [vmem:[%s4275_s14 + $0x25c] sm:$0xf] %v618_v55  ;;  %v622_v57 = vld [vmem:[%s4270_s6 + $0x4c8] sm:$0xf] }
  0xab   : > { %621 = vst [vmem:[%s4275_s14 + $0x260] sm:$0xf] %v620_v56  ;;  %v624_v58 = vld [vmem:[%s4270_s6 + $0x4d0] sm:$0xf]  ;;  %v626_v59 = vld [vmem:[%s4270_s6 + $0x4d8] sm:$0xf] }
  0xac   : > { %623 = vst [vmem:[%s4275_s14 + $0x264] sm:$0xf] %v622_v57  ;;  %625 = vst [vmem:[%s4275_s14 + $0x268] sm:$0xf] %v624_v58  ;;  %v628_v60 = vld [vmem:[%s4270_s6 + $0x4e0] sm:$0xf] }
  0xad   : > { %627 = vst [vmem:[%s4275_s14 + $0x26c] sm:$0xf] %v626_v59  ;;  %v630_v61 = vld [vmem:[%s4270_s6 + $0x4e8] sm:$0xf]  ;;  %v632_v62 = vld [vmem:[%s4270_s6 + $0x4f0] sm:$0xf] }
  0xae   : > { %629 = vst [vmem:[%s4275_s14 + $0x270] sm:$0xf] %v628_v60  ;;  %631 = vst [vmem:[%s4275_s14 + $0x274] sm:$0xf] %v630_v61  ;;  %v634_v63 = vld [vmem:[%s4270_s6 + $0x4f8] sm:$0xf] }
  0xaf   : > { %633 = vst [vmem:[%s4275_s14 + $0x278] sm:$0xf] %v632_v62  ;;  %v636_v0 = vld [vmem:[%s4270_s6 + $0x500] sm:$0xf]  ;;  %v638_v1 = vld [vmem:[%s4270_s6 + $0x508] sm:$0xf] }
  0xb0   : > { %635 = vst [vmem:[%s4275_s14 + $0x27c] sm:$0xf] %v634_v63  ;;  %637 = vst [vmem:[%s4275_s14 + $0x280] sm:$0xf] %v636_v0  ;;  %v640_v2 = vld [vmem:[%s4270_s6 + $0x510] sm:$0xf] }
  0xb1   : > { %639 = vst [vmem:[%s4275_s14 + $0x284] sm:$0xf] %v638_v1  ;;  %v642_v3 = vld [vmem:[%s4270_s6 + $0x518] sm:$0xf]  ;;  %v644_v4 = vld [vmem:[%s4270_s6 + $0x520] sm:$0xf] }
  0xb2   : > { %641 = vst [vmem:[%s4275_s14 + $0x288] sm:$0xf] %v640_v2  ;;  %643 = vst [vmem:[%s4275_s14 + $0x28c] sm:$0xf] %v642_v3  ;;  %v646_v5 = vld [vmem:[%s4270_s6 + $0x528] sm:$0xf] }
  0xb3   : > { %645 = vst [vmem:[%s4275_s14 + $0x290] sm:$0xf] %v644_v4  ;;  %v648_v6 = vld [vmem:[%s4270_s6 + $0x530] sm:$0xf]  ;;  %v650_v7 = vld [vmem:[%s4270_s6 + $0x538] sm:$0xf] }
  0xb4   : > { %647 = vst [vmem:[%s4275_s14 + $0x294] sm:$0xf] %v646_v5  ;;  %649 = vst [vmem:[%s4275_s14 + $0x298] sm:$0xf] %v648_v6  ;;  %v652_v8 = vld [vmem:[%s4270_s6 + $0x540] sm:$0xf] }
  0xb5   : > { %651 = vst [vmem:[%s4275_s14 + $0x29c] sm:$0xf] %v650_v7  ;;  %v654_v9 = vld [vmem:[%s4270_s6 + $0x548] sm:$0xf]  ;;  %v656_v10 = vld [vmem:[%s4270_s6 + $0x550] sm:$0xf] }
  0xb6   : > { %653 = vst [vmem:[%s4275_s14 + $0x2a0] sm:$0xf] %v652_v8  ;;  %655 = vst [vmem:[%s4275_s14 + $0x2a4] sm:$0xf] %v654_v9  ;;  %v658_v11 = vld [vmem:[%s4270_s6 + $0x558] sm:$0xf] }
  0xb7   : > { %657 = vst [vmem:[%s4275_s14 + $0x2a8] sm:$0xf] %v656_v10  ;;  %v660_v12 = vld [vmem:[%s4270_s6 + $0x560] sm:$0xf]  ;;  %v662_v13 = vld [vmem:[%s4270_s6 + $0x568] sm:$0xf] }
  0xb8   : > { %659 = vst [vmem:[%s4275_s14 + $0x2ac] sm:$0xf] %v658_v11  ;;  %661 = vst [vmem:[%s4275_s14 + $0x2b0] sm:$0xf] %v660_v12  ;;  %v664_v14 = vld [vmem:[%s4270_s6 + $0x570] sm:$0xf] }
  0xb9   : > { %663 = vst [vmem:[%s4275_s14 + $0x2b4] sm:$0xf] %v662_v13  ;;  %v666_v15 = vld [vmem:[%s4270_s6 + $0x578] sm:$0xf]  ;;  %v668_v16 = vld [vmem:[%s4270_s6 + $0x580] sm:$0xf] }
  0xba   : > { %665 = vst [vmem:[%s4275_s14 + $0x2b8] sm:$0xf] %v664_v14  ;;  %667 = vst [vmem:[%s4275_s14 + $0x2bc] sm:$0xf] %v666_v15  ;;  %v670_v17 = vld [vmem:[%s4270_s6 + $0x588] sm:$0xf] }
  0xbb   : > { %669 = vst [vmem:[%s4275_s14 + $0x2c0] sm:$0xf] %v668_v16  ;;  %v672_v18 = vld [vmem:[%s4270_s6 + $0x590] sm:$0xf]  ;;  %v674_v19 = vld [vmem:[%s4270_s6 + $0x598] sm:$0xf] }
  0xbc   : > { %671 = vst [vmem:[%s4275_s14 + $0x2c4] sm:$0xf] %v670_v17  ;;  %673 = vst [vmem:[%s4275_s14 + $0x2c8] sm:$0xf] %v672_v18  ;;  %v676_v20 = vld [vmem:[%s4270_s6 + $0x5a0] sm:$0xf] }
  0xbd   : > { %675 = vst [vmem:[%s4275_s14 + $0x2cc] sm:$0xf] %v674_v19  ;;  %v678_v21 = vld [vmem:[%s4270_s6 + $0x5a8] sm:$0xf]  ;;  %v680_v22 = vld [vmem:[%s4270_s6 + $0x5b0] sm:$0xf] }
  0xbe   : > { %677 = vst [vmem:[%s4275_s14 + $0x2d0] sm:$0xf] %v676_v20  ;;  %679 = vst [vmem:[%s4275_s14 + $0x2d4] sm:$0xf] %v678_v21  ;;  %v682_v23 = vld [vmem:[%s4270_s6 + $0x5b8] sm:$0xf] }
  0xbf   : > { %681 = vst [vmem:[%s4275_s14 + $0x2d8] sm:$0xf] %v680_v22  ;;  %v684_v24 = vld [vmem:[%s4270_s6 + $0x5c0] sm:$0xf]  ;;  %v686_v25 = vld [vmem:[%s4270_s6 + $0x5c8] sm:$0xf] }
  0xc0   : > { %683 = vst [vmem:[%s4275_s14 + $0x2dc] sm:$0xf] %v682_v23  ;;  %685 = vst [vmem:[%s4275_s14 + $0x2e0] sm:$0xf] %v684_v24  ;;  %v688_v26 = vld [vmem:[%s4270_s6 + $0x5d0] sm:$0xf] }
  0xc1   : > { %687 = vst [vmem:[%s4275_s14 + $0x2e4] sm:$0xf] %v686_v25  ;;  %v690_v27 = vld [vmem:[%s4270_s6 + $0x5d8] sm:$0xf]  ;;  %v692_v28 = vld [vmem:[%s4270_s6 + $0x5e0] sm:$0xf] }
  0xc2   : > { %689 = vst [vmem:[%s4275_s14 + $0x2e8] sm:$0xf] %v688_v26  ;;  %691 = vst [vmem:[%s4275_s14 + $0x2ec] sm:$0xf] %v690_v27  ;;  %v694_v29 = vld [vmem:[%s4270_s6 + $0x5e8] sm:$0xf] }
  0xc3   : > { %693 = vst [vmem:[%s4275_s14 + $0x2f0] sm:$0xf] %v692_v28  ;;  %v696_v30 = vld [vmem:[%s4270_s6 + $0x5f0] sm:$0xf]  ;;  %v698_v31 = vld [vmem:[%s4270_s6 + $0x5f8] sm:$0xf] }
  0xc4   : > { %695 = vst [vmem:[%s4275_s14 + $0x2f4] sm:$0xf] %v694_v29  ;;  %697 = vst [vmem:[%s4275_s14 + $0x2f8] sm:$0xf] %v696_v30  ;;  %v700_v32 = vld [vmem:[%s4270_s6 + $0x600] sm:$0xf] }
  0xc5   : > { %699 = vst [vmem:[%s4275_s14 + $0x2fc] sm:$0xf] %v698_v31  ;;  %v702_v33 = vld [vmem:[%s4270_s6 + $0x608] sm:$0xf]  ;;  %v704_v34 = vld [vmem:[%s4270_s6 + $0x610] sm:$0xf] }
  0xc6   : > { %701 = vst [vmem:[%s4275_s14 + $0x300] sm:$0xf] %v700_v32  ;;  %703 = vst [vmem:[%s4275_s14 + $0x304] sm:$0xf] %v702_v33  ;;  %v706_v35 = vld [vmem:[%s4270_s6 + $0x618] sm:$0xf] }
  0xc7   : > { %705 = vst [vmem:[%s4275_s14 + $0x308] sm:$0xf] %v704_v34  ;;  %v708_v36 = vld [vmem:[%s4270_s6 + $0x620] sm:$0xf]  ;;  %v710_v37 = vld [vmem:[%s4270_s6 + $0x628] sm:$0xf] }
  0xc8   : > { %707 = vst [vmem:[%s4275_s14 + $0x30c] sm:$0xf] %v706_v35  ;;  %709 = vst [vmem:[%s4275_s14 + $0x310] sm:$0xf] %v708_v36  ;;  %v712_v38 = vld [vmem:[%s4270_s6 + $0x630] sm:$0xf] }
  0xc9   : > { %711 = vst [vmem:[%s4275_s14 + $0x314] sm:$0xf] %v710_v37  ;;  %v714_v39 = vld [vmem:[%s4270_s6 + $0x638] sm:$0xf]  ;;  %v716_v40 = vld [vmem:[%s4270_s6 + $0x640] sm:$0xf] }
  0xca   : > { %713 = vst [vmem:[%s4275_s14 + $0x318] sm:$0xf] %v712_v38  ;;  %715 = vst [vmem:[%s4275_s14 + $0x31c] sm:$0xf] %v714_v39  ;;  %v718_v41 = vld [vmem:[%s4270_s6 + $0x648] sm:$0xf] }
  0xcb   : > { %717 = vst [vmem:[%s4275_s14 + $0x320] sm:$0xf] %v716_v40  ;;  %v720_v42 = vld [vmem:[%s4270_s6 + $0x650] sm:$0xf]  ;;  %v722_v43 = vld [vmem:[%s4270_s6 + $0x658] sm:$0xf] }
  0xcc   : > { %719 = vst [vmem:[%s4275_s14 + $0x324] sm:$0xf] %v718_v41  ;;  %721 = vst [vmem:[%s4275_s14 + $0x328] sm:$0xf] %v720_v42  ;;  %v724_v44 = vld [vmem:[%s4270_s6 + $0x660] sm:$0xf] }
  0xcd   : > { %723 = vst [vmem:[%s4275_s14 + $0x32c] sm:$0xf] %v722_v43  ;;  %v726_v45 = vld [vmem:[%s4270_s6 + $0x668] sm:$0xf]  ;;  %v728_v46 = vld [vmem:[%s4270_s6 + $0x670] sm:$0xf] }
  0xce   : > { %725 = vst [vmem:[%s4275_s14 + $0x330] sm:$0xf] %v724_v44  ;;  %727 = vst [vmem:[%s4275_s14 + $0x334] sm:$0xf] %v726_v45  ;;  %v730_v47 = vld [vmem:[%s4270_s6 + $0x678] sm:$0xf] }
  0xcf   : > { %729 = vst [vmem:[%s4275_s14 + $0x338] sm:$0xf] %v728_v46  ;;  %v732_v48 = vld [vmem:[%s4270_s6 + $0x680] sm:$0xf]  ;;  %v734_v49 = vld [vmem:[%s4270_s6 + $0x688] sm:$0xf] }
  0xd0   : > { %731 = vst [vmem:[%s4275_s14 + $0x33c] sm:$0xf] %v730_v47  ;;  %733 = vst [vmem:[%s4275_s14 + $0x340] sm:$0xf] %v732_v48  ;;  %v736_v50 = vld [vmem:[%s4270_s6 + $0x690] sm:$0xf] }
  0xd1   : > { %735 = vst [vmem:[%s4275_s14 + $0x344] sm:$0xf] %v734_v49  ;;  %v738_v51 = vld [vmem:[%s4270_s6 + $0x698] sm:$0xf]  ;;  %v740_v52 = vld [vmem:[%s4270_s6 + $0x6a0] sm:$0xf] }
  0xd2   : > { %737 = vst [vmem:[%s4275_s14 + $0x348] sm:$0xf] %v736_v50  ;;  %739 = vst [vmem:[%s4275_s14 + $0x34c] sm:$0xf] %v738_v51  ;;  %v742_v53 = vld [vmem:[%s4270_s6 + $0x6a8] sm:$0xf] }
  0xd3   : > { %741 = vst [vmem:[%s4275_s14 + $0x350] sm:$0xf] %v740_v52  ;;  %v744_v54 = vld [vmem:[%s4270_s6 + $0x6b0] sm:$0xf]  ;;  %v746_v55 = vld [vmem:[%s4270_s6 + $0x6b8] sm:$0xf] }
  0xd4   : > { %743 = vst [vmem:[%s4275_s14 + $0x354] sm:$0xf] %v742_v53  ;;  %745 = vst [vmem:[%s4275_s14 + $0x358] sm:$0xf] %v744_v54  ;;  %v748_v56 = vld [vmem:[%s4270_s6 + $0x6c0] sm:$0xf] }
  0xd5   : > { %747 = vst [vmem:[%s4275_s14 + $0x35c] sm:$0xf] %v746_v55  ;;  %v750_v57 = vld [vmem:[%s4270_s6 + $0x6c8] sm:$0xf]  ;;  %v752_v58 = vld [vmem:[%s4270_s6 + $0x6d0] sm:$0xf] }
  0xd6   : > { %749 = vst [vmem:[%s4275_s14 + $0x360] sm:$0xf] %v748_v56  ;;  %751 = vst [vmem:[%s4275_s14 + $0x364] sm:$0xf] %v750_v57  ;;  %v754_v59 = vld [vmem:[%s4270_s6 + $0x6d8] sm:$0xf] }
  0xd7   : > { %753 = vst [vmem:[%s4275_s14 + $0x368] sm:$0xf] %v752_v58  ;;  %v756_v60 = vld [vmem:[%s4270_s6 + $0x6e0] sm:$0xf]  ;;  %v758_v61 = vld [vmem:[%s4270_s6 + $0x6e8] sm:$0xf] }
  0xd8   : > { %755 = vst [vmem:[%s4275_s14 + $0x36c] sm:$0xf] %v754_v59  ;;  %757 = vst [vmem:[%s4275_s14 + $0x370] sm:$0xf] %v756_v60  ;;  %v760_v62 = vld [vmem:[%s4270_s6 + $0x6f0] sm:$0xf] }
  0xd9   : > { %759 = vst [vmem:[%s4275_s14 + $0x374] sm:$0xf] %v758_v61  ;;  %v762_v63 = vld [vmem:[%s4270_s6 + $0x6f8] sm:$0xf]  ;;  %v764_v0 = vld [vmem:[%s4270_s6 + $0x700] sm:$0xf] }
  0xda   : > { %761 = vst [vmem:[%s4275_s14 + $0x378] sm:$0xf] %v760_v62  ;;  %763 = vst [vmem:[%s4275_s14 + $0x37c] sm:$0xf] %v762_v63  ;;  %v766_v1 = vld [vmem:[%s4270_s6 + $0x708] sm:$0xf] }
  0xdb   : > { %765 = vst [vmem:[%s4275_s14 + $0x380] sm:$0xf] %v764_v0  ;;  %v768_v2 = vld [vmem:[%s4270_s6 + $0x710] sm:$0xf]  ;;  %v770_v3 = vld [vmem:[%s4270_s6 + $0x718] sm:$0xf] }
  0xdc   : > { %767 = vst [vmem:[%s4275_s14 + $0x384] sm:$0xf] %v766_v1  ;;  %769 = vst [vmem:[%s4275_s14 + $0x388] sm:$0xf] %v768_v2  ;;  %v772_v4 = vld [vmem:[%s4270_s6 + $0x720] sm:$0xf] }
  0xdd   : > { %771 = vst [vmem:[%s4275_s14 + $0x38c] sm:$0xf] %v770_v3  ;;  %v774_v5 = vld [vmem:[%s4270_s6 + $0x728] sm:$0xf]  ;;  %v776_v6 = vld [vmem:[%s4270_s6 + $0x730] sm:$0xf] }
  0xde   : > { %773 = vst [vmem:[%s4275_s14 + $0x390] sm:$0xf] %v772_v4  ;;  %775 = vst [vmem:[%s4275_s14 + $0x394] sm:$0xf] %v774_v5  ;;  %v778_v7 = vld [vmem:[%s4270_s6 + $0x738] sm:$0xf] }
  0xdf   : > { %777 = vst [vmem:[%s4275_s14 + $0x398] sm:$0xf] %v776_v6  ;;  %v780_v8 = vld [vmem:[%s4270_s6 + $0x740] sm:$0xf]  ;;  %v782_v9 = vld [vmem:[%s4270_s6 + $0x748] sm:$0xf] }
  0xe0   : > { %779 = vst [vmem:[%s4275_s14 + $0x39c] sm:$0xf] %v778_v7  ;;  %781 = vst [vmem:[%s4275_s14 + $0x3a0] sm:$0xf] %v780_v8  ;;  %v784_v10 = vld [vmem:[%s4270_s6 + $0x750] sm:$0xf] }
  0xe1   : > { %783 = vst [vmem:[%s4275_s14 + $0x3a4] sm:$0xf] %v782_v9  ;;  %v786_v11 = vld [vmem:[%s4270_s6 + $0x758] sm:$0xf]  ;;  %v788_v12 = vld [vmem:[%s4270_s6 + $0x760] sm:$0xf] }
  0xe2   : > { %785 = vst [vmem:[%s4275_s14 + $0x3a8] sm:$0xf] %v784_v10  ;;  %787 = vst [vmem:[%s4275_s14 + $0x3ac] sm:$0xf] %v786_v11  ;;  %v790_v13 = vld [vmem:[%s4270_s6 + $0x768] sm:$0xf] }
  0xe3   : > { %789 = vst [vmem:[%s4275_s14 + $0x3b0] sm:$0xf] %v788_v12  ;;  %v792_v14 = vld [vmem:[%s4270_s6 + $0x770] sm:$0xf]  ;;  %v794_v15 = vld [vmem:[%s4270_s6 + $0x778] sm:$0xf] }
  0xe4   : > { %791 = vst [vmem:[%s4275_s14 + $0x3b4] sm:$0xf] %v790_v13  ;;  %793 = vst [vmem:[%s4275_s14 + $0x3b8] sm:$0xf] %v792_v14  ;;  %v796_v16 = vld [vmem:[%s4270_s6 + $0x780] sm:$0xf] }
  0xe5   : > { %795 = vst [vmem:[%s4275_s14 + $0x3bc] sm:$0xf] %v794_v15  ;;  %v798_v17 = vld [vmem:[%s4270_s6 + $0x788] sm:$0xf]  ;;  %v800_v18 = vld [vmem:[%s4270_s6 + $0x790] sm:$0xf] }
  0xe6   : > { %797 = vst [vmem:[%s4275_s14 + $0x3c0] sm:$0xf] %v796_v16  ;;  %799 = vst [vmem:[%s4275_s14 + $0x3c4] sm:$0xf] %v798_v17  ;;  %v802_v19 = vld [vmem:[%s4270_s6 + $0x798] sm:$0xf] }
  0xe7   : > { %801 = vst [vmem:[%s4275_s14 + $0x3c8] sm:$0xf] %v800_v18  ;;  %v804_v20 = vld [vmem:[%s4270_s6 + $0x7a0] sm:$0xf]  ;;  %v806_v21 = vld [vmem:[%s4270_s6 + $0x7a8] sm:$0xf] }
  0xe8   : > { %803 = vst [vmem:[%s4275_s14 + $0x3cc] sm:$0xf] %v802_v19  ;;  %805 = vst [vmem:[%s4275_s14 + $0x3d0] sm:$0xf] %v804_v20  ;;  %v808_v22 = vld [vmem:[%s4270_s6 + $0x7b0] sm:$0xf] }
  0xe9   : > { %807 = vst [vmem:[%s4275_s14 + $0x3d4] sm:$0xf] %v806_v21  ;;  %v810_v23 = vld [vmem:[%s4270_s6 + $0x7b8] sm:$0xf]  ;;  %v812_v24 = vld [vmem:[%s4270_s6 + $0x7c0] sm:$0xf] }
  0xea   : > { %809 = vst [vmem:[%s4275_s14 + $0x3d8] sm:$0xf] %v808_v22  ;;  %811 = vst [vmem:[%s4275_s14 + $0x3dc] sm:$0xf] %v810_v23  ;;  %v814_v25 = vld [vmem:[%s4270_s6 + $0x7c8] sm:$0xf] }
  0xeb   : > { %813 = vst [vmem:[%s4275_s14 + $0x3e0] sm:$0xf] %v812_v24  ;;  %v816_v26 = vld [vmem:[%s4270_s6 + $0x7d0] sm:$0xf]  ;;  %v818_v27 = vld [vmem:[%s4270_s6 + $0x7d8] sm:$0xf] }
  0xec   : > { %815 = vst [vmem:[%s4275_s14 + $0x3e4] sm:$0xf] %v814_v25  ;;  %817 = vst [vmem:[%s4275_s14 + $0x3e8] sm:$0xf] %v816_v26  ;;  %v820_v28 = vld [vmem:[%s4270_s6 + $0x7e0] sm:$0xf] }
  0xed   : > { %819 = vst [vmem:[%s4275_s14 + $0x3ec] sm:$0xf] %v818_v27  ;;  %v822_v29 = vld [vmem:[%s4270_s6 + $0x7e8] sm:$0xf]  ;;  %v824_v30 = vld [vmem:[%s4270_s6 + $0x7f0] sm:$0xf] }
  0xee   : > { %821 = vst [vmem:[%s4275_s14 + $0x3f0] sm:$0xf] %v820_v28  ;;  %823 = vst [vmem:[%s4275_s14 + $0x3f4] sm:$0xf] %v822_v29  ;;  %v826_v31 = vld [vmem:[%s4270_s6 + $0x7f8] sm:$0xf] }
  0xef   : > { %825 = vst [vmem:[%s4275_s14 + $0x3f8] sm:$0xf] %v824_v30  ;;  %827 = vst [vmem:[%s4275_s14 + $0x3fc] sm:$0xf] %v826_v31 }
  0xf0 PF: > { %p3353_p0 = scmp.ge.s32.totalorder %s4055_s28, 1  ;;  %p1379_p1 = scmp.lt.s32.totalorder %s4055_s28, 9 }
  0xf2   : > { %p1380_p2 = pnand %p3353_p0, %p1379_p1 }
  0xf3   : > { %s1386_s0 = sand.u32 (!%p1380_p2), 1, %s4031_s22   ;;  %s1393_s15 = sand.u32 (!%p1380_p2), 1, %s4023_s20  }
  0xf4   : > { %1383 = sbr.rel (%p1380_p2) target bundleno = 689 (0x2b1), region = 96  ;;  %s3354_s29 = sshll.u32 (!%p1380_p2), %s1386_s0, 8 }
  0xf5   : > { %s3355_s9 = sshll.u32 (!%p1380_p2), %s1393_s15, 10  ;;  %s1429_s7 = sand.u32 (!%p1380_p2), 1, %s4015_s18  }
  0xf6   : > { %p1434_p3 = scmp.lt.s32.totalorder (!%p1380_p2), %s4043_s25, 1  ;;  %s3356_s6 = sshll.u32 (!%p1380_p2), %s1429_s7, 5 }
  0xf7   : > { %s4807_s18 = scalar_lea.vmem (!%p1380_p2), [#allocation3], %s3354_s29  ;;  %s4809_s15 = scalar_lea.vmem (!%p1380_p2), [#allocation4], %s3355_s9 }
  0xf8   : > { %s4811_s7 = scalar_lea.vmem (!%p1380_p2), [#allocation5], %s3356_s6  ;;  %p3357_p4 = scmp.ne.s32.totalorder (!%p1380_p2), %s4039_s24, 0 }
  0xfb   : > { %s4793_s8 = scalar_select %p1434_p3, %s4043_s25, 1 }
  0xfc   : > { %1447 = sbr.rel (%p3357_p4) target bundleno = 259 (0x103), region = 108  ;;  %v4057_v32 = vmov (!%p3357_p4), 0.0  }
  0xfd   : > { %s1436_s13 = scalar_lea.vmem %s5039_s2, %s4793_s8  ;;  %s1439_s27 = scalar_lea.vmem %s5040_s3, %s4793_s8  ;;  %1448 = vst [vmem:[#allocation2] sm:$0xff] (!%p3357_p4), %v4057_v32  ;;  %1449 = vst [vmem:[#allocation2 + $0x8] sm:$0xff] (!%p3357_p4), %v4057_v32 }
  0xfe   : > { %s1442_s0 = scalar_lea.vmem %s5041_s4, %s4793_s8  ;;  %1450 = vst [vmem:[#allocation2 + $0x10] sm:$0xff] (!%p3357_p4), %v4057_v32  ;;  %1451 = vst [vmem:[#allocation2 + $0x18] sm:$0xff] (!%p3357_p4), %v4057_v32 }
 0x103 PF: > { %v3839_v33 = vld [vmem:[%s4809_s15 + $0x40] sm:$0xff]   ;;  %v3843_v37 = vld [vmem:[%s4809_s15 + $0x48] sm:$0xff]   ;;  %v3847_v41 = vld [vmem:[%s4809_s15 + $0x50] sm:$0xff]   ;;  %p3518_p5 = scmp.ne.s32.totalorder %s4039_s24, 3 }
 0x104   : > { %v3840_v34 = vld [vmem:[%s4809_s15 + $0xc0] sm:$0xff]   ;;  %3526 = vmatprep.subr.bf16.mxu0 %v3839_v33  ;;  %v3844_v38 = vld [vmem:[%s4809_s15 + $0xc8] sm:$0xff]   ;;  %v3848_v42 = vld [vmem:[%s4809_s15 + $0xd0] sm:$0xff]  }
 0x105   : > { %v3841_v35 = vld [vmem:[%s4809_s15] sm:$0xff]   ;;  %3554 = vmatprep.subr.bf16.mxu1 %v3840_v34  ;;  %v3845_v39 = vld [vmem:[%s4809_s15 + $0x8] sm:$0xff]   ;;  %v3849_v43 = vld [vmem:[%s4809_s15 + $0x10] sm:$0xff]  }
 0x106   : > { %v3842_v36 = vld [vmem:[%s4809_s15 + $0x80] sm:$0xff]   ;;  %3527 = vmatpush3.bf16.msra.mxu0 %v3841_v35  ;;  %v3846_v40 = vld [vmem:[%s4809_s15 + $0x88] sm:$0xff]   ;;  %v3850_v44 = vld [vmem:[%s4809_s15 + $0x90] sm:$0xff]  }
 0x107   : > { %3555 = vmatpush3.bf16.msra.mxu1 %v3842_v36  ;;  %3528 = vmatprep.subr.bf16.mxu0 %v3843_v37  ;;  %v3851_v45 = vld [vmem:[%s4809_s15 + $0x58] sm:$0xff]   ;;  %v3855_v49 = vld [vmem:[%s4809_s15 + $0x60] sm:$0xff]   ;;  %v3859_v53 = vld [vmem:[%s4809_s15 + $0x68] sm:$0xff]  }
 0x108   : > { %3556 = vmatprep.subr.bf16.mxu1 %v3844_v38  ;;  %v3852_v46 = vld [vmem:[%s4809_s15 + $0xd8] sm:$0xff]   ;;  %v3856_v50 = vld [vmem:[%s4809_s15 + $0xe0] sm:$0xff]   ;;  %v3860_v54 = vld [vmem:[%s4809_s15 + $0xe8] sm:$0xff]  }
 0x109   : > { %v3853_v47 = vld [vmem:[%s4809_s15 + $0x18] sm:$0xff]   ;;  %v3857_v51 = vld [vmem:[%s4809_s15 + $0x20] sm:$0xff]   ;;  %v3861_v55 = vld [vmem:[%s4809_s15 + $0x28] sm:$0xff]  }
 0x10a   : > { %3529 = vmatpush3.bf16.msra.mxu0 %v3845_v39  ;;  %v3854_v48 = vld [vmem:[%s4809_s15 + $0x98] sm:$0xff]   ;;  %v3858_v52 = vld [vmem:[%s4809_s15 + $0xa0] sm:$0xff]   ;;  %v3862_v56 = vld [vmem:[%s4809_s15 + $0xa8] sm:$0xff]  }
 0x10b   : > { %3557 = vmatpush3.bf16.msra.mxu1 %v3846_v40  ;;  %3530 = vmatprep.subr.bf16.mxu0 %v3847_v41  ;;  %v3863_v57 = vld [vmem:[%s4809_s15 + $0x70] sm:$0xff]   ;;  %v3867_v61 = vld [vmem:[%s4809_s15 + $0x78] sm:$0xff]   ;;  %v1456_v1 = vld [vmem:[%s4807_s18] sm:$0xff] }
 0x10c   : > { %3558 = vmatprep.subr.bf16.mxu1 %v3848_v42  ;;  %v3864_v58 = vld [vmem:[%s4809_s15 + $0xf0] sm:$0xff]   ;;  %v3868_v62 = vld [vmem:[%s4809_s15 + $0xf8] sm:$0xff]   ;;  %v1464_v2 = vld [vmem:[%s4807_s18 + $0x40] sm:$0xff] }
 0x10d   : > { %v3865_v59 = vld [vmem:[%s4809_s15 + $0x30] sm:$0xff]   ;;  %v3869_v63 = vld [vmem:[%s4809_s15 + $0x38] sm:$0xff]   ;;  %v1457_v3 = vld [vmem:[%s4807_s18 + $0x8] sm:$0xff]  ;;  %v3358_v4 = vcombine.low %v1456_v1, %v1464_v2  ;;  %v3359_v5 = vcombine.high %v1456_v1, %v1464_v2 }
 0x10e   : > { %3531 = vmatpush3.bf16.msra.mxu0 %v3849_v43  ;;  %v3866_v60 = vld [vmem:[%s4809_s15 + $0xb0] sm:$0xff]   ;;  %v3870_v0 = vld [vmem:[%s4809_s15 + $0xb8] sm:$0xff]   ;;  %v1465_v6 = vld [vmem:[%s4807_s18 + $0x48] sm:$0xff] }
 0x10f   : > { %3559 = vmatpush3.bf16.msra.mxu1 %v3850_v44  ;;  %3532 = vmatprep.subr.bf16.mxu0 %v3851_v45  ;;  %v3360_v7 = vcombine.low %v1457_v3, %v1465_v6  ;;  %v3361_v8 = vcombine.high %v1457_v3, %v1465_v6  ;;  %v3871_v9 = vld [vmem:[%s4809_s15 + $0x140] sm:$0xff]   ;;  %v3875_v13 = vld [vmem:[%s4809_s15 + $0x148] sm:$0xff]   ;;  %v3879_v17 = vld [vmem:[%s4809_s15 + $0x150] sm:$0xff]  }
 0x110   : > { %3560 = vmatprep.subr.bf16.mxu1 %v3852_v46  ;;  %2704 = vmatprep.mubr.bf16.mxu0 %v3359_v5  ;;  %v3872_v10 = vld [vmem:[%s4809_s15 + $0x1c0] sm:$0xff]   ;;  %v3876_v14 = vld [vmem:[%s4809_s15 + $0x1c8] sm:$0xff]   ;;  %v3880_v18 = vld [vmem:[%s4809_s15 + $0x1d0] sm:$0xff]  }
 0x111   : > { %2753 = vmatprep.mubr.bf16.mxu1 %v3361_v8  ;;  %v3873_v11 = vld [vmem:[%s4809_s15 + $0x100] sm:$0xff]   ;;  %v3877_v15 = vld [vmem:[%s4809_s15 + $0x108] sm:$0xff]   ;;  %v3881_v19 = vld [vmem:[%s4809_s15 + $0x110] sm:$0xff]  }
 0x112   : > { %3533 = vmatpush3.bf16.msra.mxu0 %v3853_v47  ;;  %v3874_v12 = vld [vmem:[%s4809_s15 + $0x180] sm:$0xff]   ;;  %v3878_v16 = vld [vmem:[%s4809_s15 + $0x188] sm:$0xff]   ;;  %v3882_v20 = vld [vmem:[%s4809_s15 + $0x190] sm:$0xff]  }
 0x113   : > { %3561 = vmatpush3.bf16.msra.mxu1 %v3854_v48  ;;  %3534 = vmatprep.subr.bf16.mxu0 %v3855_v49  ;;  %v3883_v21 = vld [vmem:[%s4809_s15 + $0x158] sm:$0xff]   ;;  %v3887_v25 = vld [vmem:[%s4809_s15 + $0x160] sm:$0xff]   ;;  %v3891_v29 = vld [vmem:[%s4809_s15 + $0x168] sm:$0xff]  }
 0x114   : > { %3562 = vmatprep.subr.bf16.mxu1 %v3856_v50  ;;  %v3884_v22 = vld [vmem:[%s4809_s15 + $0x1d8] sm:$0xff]   ;;  %v3888_v26 = vld [vmem:[%s4809_s15 + $0x1e0] sm:$0xff]   ;;  %v3892_v30 = vld [vmem:[%s4809_s15 + $0x1e8] sm:$0xff]  }
 0x115   : > { %v3885_v23 = vld [vmem:[%s4809_s15 + $0x118] sm:$0xff]   ;;  %v3889_v27 = vld [vmem:[%s4809_s15 + $0x120] sm:$0xff]   ;;  %v1473_v34 = vld [vmem:[%s4807_s18 + $0x88] sm:$0xff] }
 0x116   : > { %3535 = vmatpush3.bf16.msra.mxu0 %v3857_v51  ;;  %v3886_v24 = vld [vmem:[%s4809_s15 + $0x198] sm:$0xff]   ;;  %v3890_v28 = vld [vmem:[%s4809_s15 + $0x1a0] sm:$0xff]   ;;  %v1481_v35 = vld [vmem:[%s4807_s18 + $0xc8] sm:$0xff] }
 0x117   : > { %3563 = vmatpush3.bf16.msra.mxu1 %v3858_v52  ;;  %3536 = vmatprep.subr.bf16.mxu0 %v3859_v53  ;;  %v1472_v31 = vld [vmem:[%s4807_s18 + $0x80] sm:$0xff]  ;;  %v3377_v37 = vcombine.high %v1473_v34, %v1481_v35  ;;  %v3893_v38 = vld [vmem:[%s4809_s15 + $0x128] sm:$0xff]   ;;  %v3376_v39 = vcombine.low %v1473_v34, %v1481_v35  ;;  %v3895_v41 = vld [vmem:[%s4809_s15 + $0x170] sm:$0xff]  }
 0x118   : > { %3564 = vmatprep.subr.bf16.mxu1 %v3860_v54  ;;  %v1480_v32 = vld [vmem:[%s4807_s18 + $0xc0] sm:$0xff]  ;;  %v3894_v40 = vld [vmem:[%s4809_s15 + $0x1a8] sm:$0xff]   ;;  %v3896_v42 = vld [vmem:[%s4809_s15 + $0x1f0] sm:$0xff]  }
 0x119   : > { %v3375_v33 = vcombine.high %v1472_v31, %v1480_v32  ;;  %v3374_v36 = vcombine.low %v1472_v31, %v1480_v32  ;;  %v3897_v43 = vld [vmem:[%s4809_s15 + $0x130] sm:$0xff]   ;;  %v3899_v45 = vld [vmem:[%s4809_s15 + $0x178] sm:$0xff]   ;;  %v1468_v34 = vld [vmem:[%s4807_s18 + $0x60] sm:$0xff] }
 0x11a   : > { %3537 = vmatpush3.bf16.msra.mxu0 %v3861_v55  ;;  %v3898_v44 = vld [vmem:[%s4809_s15 + $0x1b0] sm:$0xff]   ;;  %v3900_v46 = vld [vmem:[%s4809_s15 + $0x1f8] sm:$0xff]  }
 0x11b   : > { %3565 = vmatpush3.bf16.msra.mxu1 %v3862_v56  ;;  %3538 = vmatprep.subr.bf16.mxu0 %v3863_v57  ;;  %v3901_v47 = vld [vmem:[%s4809_s15 + $0x138] sm:$0xff]   ;;  %v1458_v49 = vld [vmem:[%s4807_s18 + $0x10] sm:$0xff]  ;;  %v3903_v57 = vld [vmem:[%s4809_s15 + $0x240] sm:$0xff]  }
 0x11c   : > { %3566 = vmatprep.subr.bf16.mxu1 %v3864_v58  ;;  %v3902_v48 = vld [vmem:[%s4809_s15 + $0x1b8] sm:$0xff]   ;;  %v1466_v50 = vld [vmem:[%s4807_s18 + $0x50] sm:$0xff]  ;;  %v3904_v58 = vld [vmem:[%s4809_s15 + $0x2c0] sm:$0xff]  }
 0x11d   : > { %v1459_v51 = vld [vmem:[%s4807_s18 + $0x18] sm:$0xff]  ;;  %v3362_v53 = vcombine.low %v1458_v49, %v1466_v50  ;;  %v3363_v54 = vcombine.high %v1458_v49, %v1466_v50  ;;  %v1474_v1 = vld [vmem:[%s4807_s18 + $0x90] sm:$0xff]  ;;  %v1476_v49 = vld [vmem:[%s4807_s18 + $0xa0] sm:$0xff] }
 0x11e   : > { %3539 = vmatpush3.bf16.msra.mxu0 %v3865_v59  ;;  %v1467_v52 = vld [vmem:[%s4807_s18 + $0x58] sm:$0xff]  ;;  %v3905_v59 = vld [vmem:[%s4809_s15 + $0x200] sm:$0xff]   ;;  %v1482_v2 = vld [vmem:[%s4807_s18 + $0xd0] sm:$0xff] }
 0x11f   : > { %3567 = vmatpush3.bf16.msra.mxu1 %v3866_v60  ;;  %3540 = vmatprep.subr.bf16.mxu0 %v3867_v61  ;;  %v3364_v55 = vcombine.low %v1459_v51, %v1467_v52  ;;  %v3365_v56 = vcombine.high %v1459_v51, %v1467_v52  ;;  %v3906_v60 = vld [vmem:[%s4809_s15 + $0x280] sm:$0xff]   ;;  %v3907_v61 = vld [vmem:[%s4809_s15 + $0x248] sm:$0xff]   ;;  %v3379_v3 = vcombine.high %v1474_v1, %v1482_v2  ;;  %v3911_v5 = vld [vmem:[%s4809_s15 + $0x250] sm:$0xff]  }
 0x120   : > { %3568 = vmatprep.subr.bf16.mxu1 %v3868_v62  ;;  %v3908_v62 = vld [vmem:[%s4809_s15 + $0x2c8] sm:$0xff]   ;;  %v3912_v6 = vld [vmem:[%s4809_s15 + $0x2d0] sm:$0xff]   ;;  %v1483_v8 = vld [vmem:[%s4807_s18 + $0xd8] sm:$0xff] }
 0x121   : > { %v3933_v31 = vld [vmem:[%s4809_s15 + $0x238] sm:$0xff]   ;;  %v1484_v50 = vld [vmem:[%s4807_s18 + $0xe0] sm:$0xff] }
 0x122   : > { %3541 = vmatpush3.bf16.msra.mxu0 %v3869_v63  ;;  %v3909_v63 = vld [vmem:[%s4809_s15 + $0x208] sm:$0xff]   ;;  %v3934_v32 = vld [vmem:[%s4809_s15 + $0x2b8] sm:$0xff]   ;;  %v3383_v51 = vcombine.high %v1476_v49, %v1484_v50  ;;  %v3382_v52 = vcombine.low %v1476_v49, %v1484_v50 }
 0x123   : > { %3569 = vmatpush3.bf16.msra.mxu1 %v3870_v0  ;;  %3582 = vmatprep.subr.bf16.mxu0 %v3871_v9  ;;  %v3910_v0 = vld [vmem:[%s4809_s15 + $0x288] sm:$0xff]  }
 0x124   : > { %3610 = vmatprep.subr.bf16.mxu1 %v3872_v10  ;;  %v3913_v10 = vld [vmem:[%s4809_s15 + $0x210] sm:$0xff]  }
 0x125   : > { %2705 = vmatmul.mubr.bf16.vlgmr.msra.gmra.mrb[0].mxu0 %v3358_v4  ;;  %v3378_v4 = vcombine.low %v1474_v1, %v1482_v2  ;;  %v3951_v1 = vld [vmem:[%s4809_s15 + $0x360] sm:$0xff]  }
 0x126   : > { %2754 = vmatmul.mubr.bf16.vlgmr.msra.gmra.mrb[0].mxu1 %v3360_v7  ;;  %3583 = vmatpush3.bf16.msra.mxu0 %v3873_v11  ;;  %v1475_v7 = vld [vmem:[%s4807_s18 + $0x98] sm:$0xff]  ;;  %v3952_v2 = vld [vmem:[%s4809_s15 + $0x3e0] sm:$0xff]  }
 0x127   : > { %3611 = vmatpush3.bf16.msra.mxu1 %v3874_v12  ;;  %3584 = vmatprep.subr.bf16.mxu0 %v3875_v13  ;;  %v3381_v9 = vcombine.high %v1475_v7, %v1483_v8  ;;  %v3380_v11 = vcombine.low %v1475_v7, %v1483_v8  ;;  %v3914_v12 = vld [vmem:[%s4809_s15 + $0x290] sm:$0xff]   ;;  %v3915_v13 = vld [vmem:[%s4809_s15 + $0x258] sm:$0xff]   ;;  %v3957_v7 = vld [vmem:[%s4809_s15 + $0x328] sm:$0xff]  }
 0x128   : > { %3612 = vmatprep.subr.bf16.mxu1 %v3876_v14  ;;  %2712 = vmatprep.mubr.bf16.mxu0 %v3375_v33  ;;  %v3916_v14 = vld [vmem:[%s4809_s15 + $0x2d8] sm:$0xff]   ;;  %v1460_v33 = vld [vmem:[%s4807_s18 + $0x20] sm:$0xff]  ;;  %v3958_v8 = vld [vmem:[%s4809_s15 + $0x3a8] sm:$0xff]  }
 0x129   : > { %2761 = vmatprep.mubr.bf16.mxu1 %v3377_v37  ;;  %v3366_v35 = vcombine.low %v1460_v33, %v1468_v34  ;;  %v1461_v37 = vld [vmem:[%s4807_s18 + $0x28] sm:$0xff] }
 0x12a   : > { %3585 = vmatpush3.bf16.msra.mxu0 %v3877_v15  ;;  %v3917_v15 = vld [vmem:[%s4809_s15 + $0x218] sm:$0xff]  }
 0x12b   : > { %3613 = vmatpush3.bf16.msra.mxu1 %v3878_v16  ;;  %3586 = vmatprep.subr.bf16.mxu0 %v3879_v17  ;;  %v3918_v16 = vld [vmem:[%s4809_s15 + $0x298] sm:$0xff]   ;;  %v3919_v17 = vld [vmem:[%s4809_s15 + $0x260] sm:$0xff]  }
 0x12c   : > { %3614 = vmatprep.subr.bf16.mxu1 %v3880_v18  ;;  %v3920_v18 = vld [vmem:[%s4809_s15 + $0x2e0] sm:$0xff]  }
 0x12d   : > { %2713 = vmatmul.mubr.bf16.gmra.mrb[4].mxu0 %v3374_v36  ;;  %v3367_v36 = vcombine.high %v1460_v33, %v1468_v34 }
 0x12e   : > { %3587 = vmatpush3.bf16.msra.mxu0 %v3881_v19  ;;  %2762 = vmatmul.mubr.bf16.gmra.mrb[4].mxu1 %v3376_v39  ;;  %v3921_v19 = vld [vmem:[%s4809_s15 + $0x220] sm:$0xff]  }
 0x12f   : > { %3615 = vmatpush3.bf16.msra.mxu1 %v3882_v20  ;;  %3588 = vmatprep.subr.bf16.mxu0 %v3883_v21  ;;  %v3922_v20 = vld [vmem:[%s4809_s15 + $0x2a0] sm:$0xff]   ;;  %v3923_v21 = vld [vmem:[%s4809_s15 + $0x268] sm:$0xff]  }
 0x130   : > { %3616 = vmatprep.subr.bf16.mxu1 %v3884_v22  ;;  %2802 = vmatprep.mubr.bf16.mxu0 %v3363_v54  ;;  %v3924_v22 = vld [vmem:[%s4809_s15 + $0x2e8] sm:$0xff]   ;;  %v3944_v54 = vld [vmem:[%s4809_s15 + $0x3d0] sm:$0xff]  }
 0x131   : > { %2851 = vmatprep.mubr.bf16.mxu1 %v3365_v56  ;;  %v1485_v56 = vld [vmem:[%s4807_s18 + $0xe8] sm:$0xff] }
 0x132   : > { %3589 = vmatpush3.bf16.msra.mxu0 %v3885_v23  ;;  %v3925_v23 = vld [vmem:[%s4809_s15 + $0x228] sm:$0xff]  }
 0x133   : > { %3617 = vmatpush3.bf16.msra.mxu1 %v3886_v24  ;;  %3590 = vmatprep.subr.bf16.mxu0 %v3887_v25  ;;  %v3926_v24 = vld [vmem:[%s4809_s15 + $0x2a8] sm:$0xff]   ;;  %v3927_v25 = vld [vmem:[%s4809_s15 + $0x270] sm:$0xff]  }
 0x134   : > { %3618 = vmatprep.subr.bf16.mxu1 %v3888_v26  ;;  %v3928_v26 = vld [vmem:[%s4809_s15 + $0x2f0] sm:$0xff]  }
 0x136   : > { %3591 = vmatpush3.bf16.msra.mxu0 %v3889_v27  ;;  %v3929_v27 = vld [vmem:[%s4809_s15 + $0x230] sm:$0xff]  }
 0x137   : > { %3619 = vmatpush3.bf16.msra.mxu1 %v3890_v28  ;;  %3592 = vmatprep.subr.bf16.mxu0 %v3891_v29  ;;  %v3930_v28 = vld [vmem:[%s4809_s15 + $0x2b0] sm:$0xff]   ;;  %v3931_v29 = vld [vmem:[%s4809_s15 + $0x278] sm:$0xff]  }
 0x138   : > { %3620 = vmatprep.subr.bf16.mxu1 %v3892_v30  ;;  %v3932_v30 = vld [vmem:[%s4809_s15 + $0x2f8] sm:$0xff]  }
 0x13a   : > { %3593 = vmatpush3.bf16.msra.mxu0 %v3893_v38  ;;  %v1469_v38 = vld [vmem:[%s4807_s18 + $0x68] sm:$0xff] }
 0x13b   : > { %3621 = vmatpush3.bf16.msra.mxu1 %v3894_v40  ;;  %3594 = vmatprep.subr.bf16.mxu0 %v3895_v41  ;;  %v3368_v39 = vcombine.low %v1461_v37, %v1469_v38  ;;  %v3369_v40 = vcombine.high %v1461_v37, %v1469_v38  ;;  %v3935_v41 = vld [vmem:[%s4809_s15 + $0x340] sm:$0xff]  }
 0x13c   : > { %3622 = vmatprep.subr.bf16.mxu1 %v3896_v42  ;;  %v3936_v42 = vld [vmem:[%s4809_s15 + $0x3c0] sm:$0xff]  }
 0x13e   : > { %3595 = vmatpush3.bf16.msra.mxu0 %v3897_v43  ;;  %v3937_v43 = vld [vmem:[%s4809_s15 + $0x300] sm:$0xff]  }
 0x13f   : > { %3623 = vmatpush3.bf16.msra.mxu1 %v3898_v44  ;;  %3596 = vmatprep.subr.bf16.mxu0 %v3899_v45  ;;  %v3938_v44 = vld [vmem:[%s4809_s15 + $0x380] sm:$0xff]   ;;  %v3939_v45 = vld [vmem:[%s4809_s15 + $0x348] sm:$0xff]  }
 0x140   : > { %3624 = vmatprep.subr.bf16.mxu1 %v3900_v46  ;;  %v3940_v46 = vld [vmem:[%s4809_s15 + $0x3c8] sm:$0xff]  }
 0x142   : > { %3597 = vmatpush3.bf16.msra.mxu0 %v3901_v47  ;;  %v3941_v47 = vld [vmem:[%s4809_s15 + $0x308] sm:$0xff]  }
 0x143   : > { %3625 = vmatpush3.bf16.msra.mxu1 %v3902_v48  ;;  %3638 = vmatprep.subr.bf16.mxu0 %v3903_v57  ;;  %v3942_v48 = vld [vmem:[%s4809_s15 + $0x388] sm:$0xff]  }
 0x144   : > { %3666 = vmatprep.subr.bf16.mxu1 %v3904_v58  ;;  %v3945_v58 = vld [vmem:[%s4809_s15 + $0x310] sm:$0xff]  }
 0x145   : > { %2803 = vmatmul.mubr.bf16.vlgmr.msra.gmra.mrb[8].mxu0 %v3362_v53  ;;  %v3943_v53 = vld [vmem:[%s4809_s15 + $0x350] sm:$0xff]  }
 0x146   : > { %2852 = vmatmul.mubr.bf16.vlgmr.msra.gmra.mrb[8].mxu1 %v3364_v55  ;;  %3639 = vmatpush3.bf16.msra.mxu0 %v3905_v59  ;;  %v1477_v55 = vld [vmem:[%s4807_s18 + $0xa8] sm:$0xff] }
 0x147   : > { %3667 = vmatpush3.bf16.msra.mxu1 %v3906_v60  ;;  %3640 = vmatprep.subr.bf16.mxu0 %v3907_v61  ;;  %v3385_v57 = vcombine.high %v1477_v55, %v1485_v56  ;;  %v3384_v59 = vcombine.low %v1477_v55, %v1485_v56  ;;  %v3946_v60 = vld [vmem:[%s4809_s15 + $0x390] sm:$0xff]   ;;  %v3947_v61 = vld [vmem:[%s4809_s15 + $0x358] sm:$0xff]  }
 0x148   : > { %3668 = vmatprep.subr.bf16.mxu1 %v3908_v62  ;;  %2810 = vmatprep.mubr.bf16.mxu0 %v3379_v3  ;;  %v3948_v62 = vld [vmem:[%s4809_s15 + $0x3d8] sm:$0xff]   ;;  %v3953_v3 = vld [vmem:[%s4809_s15 + $0x320] sm:$0xff]  }
 0x149   : > { %2859 = vmatprep.mubr.bf16.mxu1 %v3381_v9  ;;  %v3959_v9 = vld [vmem:[%s4809_s15 + $0x370] sm:$0xff]  }
 0x14a   : > { %3641 = vmatpush3.bf16.msra.mxu0 %v3909_v63  ;;  %v3949_v63 = vld [vmem:[%s4809_s15 + $0x318] sm:$0xff]  }
 0x14b   : > { %3669 = vmatpush3.bf16.msra.mxu1 %v3910_v0  ;;  %3642 = vmatprep.subr.bf16.mxu0 %v3911_v5  ;;  %v3950_v0 = vld [vmem:[%s4809_s15 + $0x398] sm:$0xff]   ;;  %v3955_v5 = vld [vmem:[%s4809_s15 + $0x368] sm:$0xff]  }
 0x14c   : > { %3670 = vmatprep.subr.bf16.mxu1 %v3912_v6  ;;  %v3956_v6 = vld [vmem:[%s4809_s15 + $0x3e8] sm:$0xff]  }
 0x14d   : > { %2811 = vmatmul.mubr.bf16.gmra.mrb[12].mxu0 %v3378_v4  ;;  %v3954_v4 = vld [vmem:[%s4809_s15 + $0x3a0] sm:$0xff]  }
 0x14e   : > { %3643 = vmatpush3.bf16.msra.mxu0 %v3913_v10  ;;  %2860 = vmatmul.mubr.bf16.gmra.mrb[12].mxu1 %v3380_v11  ;;  %v3960_v10 = vld [vmem:[%s4809_s15 + $0x3f0] sm:$0xff]  }
 0x14f   : > { %3671 = vmatpush3.bf16.msra.mxu1 %v3914_v12  ;;  %3644 = vmatprep.subr.bf16.mxu0 %v3915_v13  ;;  %v3961_v11 = vld [vmem:[%s4809_s15 + $0x330] sm:$0xff]   ;;  %v3963_v13 = vld [vmem:[%s4809_s15 + $0x378] sm:$0xff]  }
 0x150   : > { %3672 = vmatprep.subr.bf16.mxu1 %v3916_v14  ;;  %2900 = vmatprep.mubr.bf16.mxu0 %v3367_v36  ;;  %v3962_v12 = vld [vmem:[%s4809_s15 + $0x3b0] sm:$0xff]   ;;  %v3964_v14 = vld [vmem:[%s4809_s15 + $0x3f8] sm:$0xff]  }
 0x151   : > { %2949 = vmatprep.mubr.bf16.mxu1 %v3369_v40 }
 0x152   : > { %3645 = vmatpush3.bf16.msra.mxu0 %v3917_v15  ;;  %v3965_v15 = vld [vmem:[%s4809_s15 + $0x338] sm:$0xff]  }
 0x153   : > { %3673 = vmatpush3.bf16.msra.mxu1 %v3918_v16  ;;  %3646 = vmatprep.subr.bf16.mxu0 %v3919_v17  ;;  %v3966_v16 = vld [vmem:[%s4809_s15 + $0x3b8] sm:$0xff]   ;;  %v1462_v17 = vld [vmem:[%s4807_s18 + $0x30] sm:$0xff] }
 0x154   : > { %3674 = vmatprep.subr.bf16.mxu1 %v3920_v18  ;;  %v1470_v18 = vld [vmem:[%s4807_s18 + $0x70] sm:$0xff] }
 0x156   : > { %3647 = vmatpush3.bf16.msra.mxu0 %v3921_v19  ;;  %v1463_v19 = vld [vmem:[%s4807_s18 + $0x38] sm:$0xff] }
 0x157   : > { %3675 = vmatpush3.bf16.msra.mxu1 %v3922_v20  ;;  %3648 = vmatprep.subr.bf16.mxu0 %v3923_v21  ;;  %v3370_v20 = vcombine.low %v1462_v17, %v1470_v18  ;;  %v3371_v21 = vcombine.high %v1462_v17, %v1470_v18 }
 0x158   : > { %3676 = vmatprep.subr.bf16.mxu1 %v3924_v22  ;;  %v1471_v22 = vld [vmem:[%s4807_s18 + $0x78] sm:$0xff] }
 0x15a   : > { %3649 = vmatpush3.bf16.msra.mxu0 %v3925_v23  ;;  %v1478_v23 = vld [vmem:[%s4807_s18 + $0xb0] sm:$0xff] }
 0x15b   : > { %3677 = vmatpush3.bf16.msra.mxu1 %v3926_v24  ;;  %3650 = vmatprep.subr.bf16.mxu0 %v3927_v25  ;;  %v1486_v24 = vld [vmem:[%s4807_s18 + $0xf0] sm:$0xff]  ;;  %v3372_v25 = vcombine.low %v1463_v19, %v1471_v22 }
 0x15c   : > { %3678 = vmatprep.subr.bf16.mxu1 %v3928_v26  ;;  %v3373_v26 = vcombine.high %v1463_v19, %v1471_v22 }
 0x15e   : > { %3651 = vmatpush3.bf16.msra.mxu0 %v3929_v27  ;;  %v3387_v27 = vcombine.high %v1478_v23, %v1486_v24 }
 0x15f   : > { %3679 = vmatpush3.bf16.msra.mxu1 %v3930_v28  ;;  %3652 = vmatprep.subr.bf16.mxu0 %v3931_v29  ;;  %v1479_v28 = vld [vmem:[%s4807_s18 + $0xb8] sm:$0xff] }
 0x160   : > { %3680 = vmatprep.subr.bf16.mxu1 %v3932_v30  ;;  %v1487_v29 = vld [vmem:[%s4807_s18 + $0xf8] sm:$0xff] }
 0x161   : > { %v3389_v30 = vcombine.high %v1479_v28, %v1487_v29 }
 0x162   : > { %3653 = vmatpush3.bf16.msra.mxu0 %v3933_v31  ;;  %v3386_v31 = vcombine.low %v1478_v23, %v1486_v24 }
 0x163   : > { %3681 = vmatpush3.bf16.msra.mxu1 %v3934_v32  ;;  %3694 = vmatprep.subr.bf16.mxu0 %v3935_v41  ;;  %v3388_v32 = vcombine.low %v1479_v28, %v1487_v29 }
 0x164   : > { %3722 = vmatprep.subr.bf16.mxu1 %v3936_v42 }
 0x165   : > { %2901 = vmatmul.mubr.bf16.vlgmr.msra.gmra.mrb[16].mxu0 %v3366_v35 }
 0x166   : > { %2950 = vmatmul.mubr.bf16.vlgmr.msra.gmra.mrb[16].mxu1 %v3368_v39  ;;  %3695 = vmatpush3.bf16.msra.mxu0 %v3937_v43 }
 0x167   : > { %3723 = vmatpush3.bf16.msra.mxu1 %v3938_v44  ;;  %3696 = vmatprep.subr.bf16.mxu0 %v3939_v45 }
 0x168   : > { %3724 = vmatprep.subr.bf16.mxu1 %v3940_v46  ;;  %2908 = vmatprep.mubr.bf16.mxu0 %v3383_v51 }
 0x169   : > { %2957 = vmatprep.mubr.bf16.mxu1 %v3385_v57 }
 0x16a   : > { %3697 = vmatpush3.bf16.msra.mxu0 %v3941_v47 }
 0x16b   : > { %3725 = vmatpush3.bf16.msra.mxu1 %v3942_v48  ;;  %3698 = vmatprep.subr.bf16.mxu0 %v3943_v53 }
 0x16c   : > { %3726 = vmatprep.subr.bf16.mxu1 %v3944_v54 }
 0x16d   : > { %2909 = vmatmul.mubr.bf16.gmra.mrb[20].mxu0 %v3382_v52 }
 0x16e   : > { %3699 = vmatpush3.bf16.msra.mxu0 %v3945_v58  ;;  %2958 = vmatmul.mubr.bf16.gmra.mrb[20].mxu1 %v3384_v59 }
 0x16f   : > { %3727 = vmatpush3.bf16.msra.mxu1 %v3946_v60  ;;  %3700 = vmatprep.subr.bf16.mxu0 %v3947_v61 }
 0x170   : > { %3728 = vmatprep.subr.bf16.mxu1 %v3948_v62  ;;  %2998 = vmatprep.mubr.bf16.mxu0 %v3371_v21 }
 0x171   : > { %3047 = vmatprep.mubr.bf16.mxu1 %v3373_v26 }
 0x172   : > { %3701 = vmatpush3.bf16.msra.mxu0 %v3949_v63 }
 0x173   : > { %3729 = vmatpush3.bf16.msra.mxu1 %v3950_v0  ;;  %3702 = vmatprep.subr.bf16.mxu0 %v3951_v1 }
 0x174   : > { %3730 = vmatprep.subr.bf16.mxu1 %v3952_v2 }
 0x176   : > { %3703 = vmatpush3.bf16.msra.mxu0 %v3953_v3 }
 0x177   : > { %3731 = vmatpush3.bf16.msra.mxu1 %v3954_v4  ;;  %3704 = vmatprep.subr.bf16.mxu0 %v3955_v5 }
 0x178   : > { %3732 = vmatprep.subr.bf16.mxu1 %v3956_v6 }
 0x17a   : > { %3705 = vmatpush3.bf16.msra.mxu0 %v3957_v7 }
 0x17b   : > { %3733 = vmatpush3.bf16.msra.mxu1 %v3958_v8  ;;  %3706 = vmatprep.subr.bf16.mxu0 %v3959_v9 }
 0x17c   : > { %3734 = vmatprep.subr.bf16.mxu1 %v3960_v10 }
 0x17e   : > { %3707 = vmatpush3.bf16.msra.mxu0 %v3961_v11 }
 0x17f   : > { %3735 = vmatpush3.bf16.msra.mxu1 %v3962_v12  ;;  %3708 = vmatprep.subr.bf16.mxu0 %v3963_v13 }
 0x180   : > { %3736 = vmatprep.subr.bf16.mxu1 %v3964_v14 }
 0x182   : > { %3709 = vmatpush3.bf16.msra.mxu0 %v3965_v15 }
 0x183   : > { %3737 = vmatpush3.bf16.msra.mxu1 %v3966_v16 }
 0x185   : > { %2999 = vmatmul.mubr.bf16.vlgmr.msra.gmra.mrb[24].mxu0 %v3370_v20 }
 0x186   : > { %3048 = vmatmul.mubr.bf16.vlgmr.msra.gmra.mrb[24].mxu1 %v3372_v25  ;;  %3006 = vmatprep.mubr.bf16.mxu0 %v3387_v27 }
 0x187   : > { %3055 = vmatprep.mubr.bf16.mxu1 %v3389_v30 }
 0x18d   : > { %3007 = vmatmul.mubr.bf16.gmra.mrb[28].mxu0 %v3386_v31 }
 0x18e   : > { %3056 = vmatmul.mubr.bf16.gmra.mrb[28].mxu1 %v3388_v32 }
 0x1f8   : > { %v3542_v33 = vpop.f32.mrb[0].mxu0 }
 0x1f9   : > { %v3570_v34 = vpop.f32.mrb[0].mxu1  ;;  %v3543_v35 = vpop.f32.mrb[1].mxu0 }
 0x1fa   : > { %v3544_v36 = vadd.f32 %v3543_v35, %v3542_v33  ;;  %v3571_v37 = vpop.f32.mrb[1].mxu1  ;;  %v3545_v38 = vpop.f32.mrb[2].mxu0 }
 0x1fb   : > { %v3572_v39 = vadd.f32 %v3571_v37, %v3570_v34  ;;  %v3573_v40 = vpop.f32.mrb[2].mxu1  ;;  %v3546_v41 = vpop.f32.mrb[3].mxu0 }
 0x1fc   : > { %v3547_v42 = vadd.f32 %v3546_v41, %v3545_v38  ;;  %v3574_v43 = vpop.f32.mrb[3].mxu1 }
 0x1fd   : > { %v2756_v44 = vadd.f32 %v3572_v39, %v3544_v36  ;;  %v3575_v45 = vadd.f32 %v3574_v43, %v3573_v40 }
 0x1ff   : > { %v2759_v46 = vadd.f32 %v3575_v45, %v3547_v42 }
 0x200   : > { %v3548_v47 = vpop.f32.mrb[4].mxu0 }
 0x201   : > { %v3576_v48 = vpop.f32.mrb[4].mxu1  ;;  %v3549_v49 = vpop.f32.mrb[5].mxu0 }
 0x202   : > { %v3550_v50 = vadd.f32 %v3549_v49, %v3548_v47  ;;  %v3577_v51 = vpop.f32.mrb[5].mxu1  ;;  %v3551_v52 = vpop.f32.mrb[6].mxu0 }
 0x203   : > { %v3578_v53 = vadd.f32 %v3577_v51, %v3576_v48  ;;  %v3579_v54 = vpop.f32.mrb[6].mxu1  ;;  %v3552_v55 = vpop.f32.mrb[7].mxu0 }
 0x204   : > { %v3553_v56 = vadd.f32 %v3552_v55, %v3551_v52  ;;  %v3580_v57 = vpop.f32.mrb[7].mxu1 }
 0x205   : > { %v2764_v58 = vadd.f32 %v3578_v53, %v3550_v50  ;;  %v3581_v59 = vadd.f32 %v3580_v57, %v3579_v54 }
 0x207   : > { %v2767_v60 = vadd.f32 %v3581_v59, %v3553_v56 }
 0x218   : > { %v3598_v61 = vpop.f32.mrb[8].mxu0 }
 0x219   : > { %v3626_v62 = vpop.f32.mrb[8].mxu1  ;;  %v3599_v63 = vpop.f32.mrb[9].mxu0 }
 0x21a   : > { %v3627_v0 = vpop.f32.mrb[9].mxu1  ;;  %v3600_v1 = vadd.f32 %v3599_v63, %v3598_v61  ;;  %v3601_v3 = vpop.f32.mrb[10].mxu0 }
 0x21b   : > { %v3628_v2 = vadd.f32 %v3627_v0, %v3626_v62  ;;  %v3629_v4 = vpop.f32.mrb[10].mxu1  ;;  %v3602_v5 = vpop.f32.mrb[11].mxu0 }
 0x21c   : > { %v3630_v6 = vpop.f32.mrb[11].mxu1  ;;  %v2805_v7 = vadd.f32 %v3600_v1, %v2756_v44  ;;  %v3603_v8 = vadd.f32 %v3602_v5, %v3601_v3 }
 0x21d   : > { %v3631_v9 = vadd.f32 %v3630_v6, %v3629_v4 }
 0x21e   : > { %v2854_v10 = vadd.f32 %v3628_v2, %v2805_v7  ;;  %v2808_v11 = vadd.f32 %v3603_v8, %v2759_v46 }
 0x220   : > { %v2857_v12 = vadd.f32 %v3631_v9, %v2808_v11  ;;  %v3604_v13 = vpop.f32.mrb[12].mxu0  ;;  %v1452_v9 = vld [vmem:[#allocation2] sm:$0xff] }
 0x221   : > { %v3605_v14 = vpop.f32.mrb[13].mxu0  ;;  %v3632_v19 = vpop.f32.mrb[12].mxu1 }
 0x222   : > { %v3606_v15 = vadd.f32 %v3605_v14, %v3604_v13  ;;  %v3607_v16 = vpop.f32.mrb[14].mxu0  ;;  %v3633_v21 = vpop.f32.mrb[13].mxu1  ;;  %v1453_v13 = vld [vmem:[#allocation2 + $0x8] sm:$0xff] }
 0x223   : > { %v3608_v17 = vpop.f32.mrb[15].mxu0  ;;  %v3634_v23 = vadd.f32 %v3633_v21, %v3632_v19  ;;  %v3635_v24 = vpop.f32.mrb[14].mxu1 }
 0x224   : > { %v2813_v18 = vadd.f32 %v3606_v15, %v2764_v58  ;;  %v3609_v20 = vadd.f32 %v3608_v17, %v3607_v16  ;;  %v3636_v25 = vpop.f32.mrb[15].mxu1 }
 0x225   : > { %v3637_v27 = vadd.f32 %v3636_v25, %v3635_v24 }
 0x226   : > { %v2816_v22 = vadd.f32 %v3609_v20, %v2767_v60  ;;  %v2862_v26 = vadd.f32 %v3634_v23, %v2813_v18 }
 0x228   : > { %v2865_v28 = vadd.f32 %v3637_v27, %v2816_v22 }
 0x238   : > { %v3654_v29 = vpop.f32.mrb[16].mxu0 }
 0x239   : > { %v3682_v30 = vpop.f32.mrb[16].mxu1  ;;  %v3655_v31 = vpop.f32.mrb[17].mxu0 }
 0x23a   : > { %v3656_v32 = vadd.f32 %v3655_v31, %v3654_v29  ;;  %v3683_v33 = vpop.f32.mrb[17].mxu1  ;;  %v3657_v34 = vpop.f32.mrb[18].mxu0  ;;  %v1454_v29 = vld [vmem:[#allocation2 + $0x10] sm:$0xff] }
 0x23b   : > { %v3684_v35 = vadd.f32 %v3683_v33, %v3682_v30  ;;  %v3685_v36 = vpop.f32.mrb[18].mxu1  ;;  %v3658_v37 = vpop.f32.mrb[19].mxu0  ;;  %v1455_v33 = vld [vmem:[#allocation2 + $0x18] sm:$0xff] }
 0x23c   : > { %v2903_v38 = vadd.f32 %v3656_v32, %v2854_v10  ;;  %v3659_v39 = vadd.f32 %v3658_v37, %v3657_v34  ;;  %v3686_v40 = vpop.f32.mrb[19].mxu1 }
 0x23d   : > { %v3687_v41 = vadd.f32 %v3686_v40, %v3685_v36 }
 0x23e   : > { %v2952_v42 = vadd.f32 %v3684_v35, %v2903_v38  ;;  %v2906_v43 = vadd.f32 %v3659_v39, %v2857_v12 }
 0x240   : > { %v2955_v44 = vadd.f32 %v3687_v41, %v2906_v43  ;;  %v3660_v45 = vpop.f32.mrb[20].mxu0  ;;  %v3519_v41 = vld [vmem:[%s1436_s13] ss:$0 sm:$0xff] (!%p3518_p5) }
 0x241   : > { %v3661_v46 = vpop.f32.mrb[21].mxu0  ;;  %v3688_v49 = vpop.f32.mrb[20].mxu1 }
 0x242   : > { %v3662_v47 = vadd.f32 %v3661_v46, %v3660_v45  ;;  %v3663_v48 = vpop.f32.mrb[22].mxu0  ;;  %v3689_v53 = vpop.f32.mrb[21].mxu1 }
 0x243   : > { %v3664_v50 = vpop.f32.mrb[23].mxu0  ;;  %v3690_v54 = vadd.f32 %v3689_v53, %v3688_v49  ;;  %v3691_v55 = vpop.f32.mrb[22].mxu1 }
 0x244   : > { %v2911_v51 = vadd.f32 %v3662_v47, %v2862_v26  ;;  %v3665_v52 = vadd.f32 %v3664_v50, %v3663_v48  ;;  %v3692_v57 = vpop.f32.mrb[23].mxu1 }
 0x245   : > { %v3693_v59 = vadd.f32 %v3692_v57, %v3691_v55 }
 0x246   : > { %v2914_v56 = vadd.f32 %v3665_v52, %v2865_v28  ;;  %v2960_v58 = vadd.f32 %v3690_v54, %v2911_v51 }
 0x248   : > { %v2963_v60 = vadd.f32 %v3693_v59, %v2914_v56 }
 0x258   : > { %v3710_v61 = vpop.f32.mrb[24].mxu0 }
 0x259   : > { %v3738_v62 = vpop.f32.mrb[24].mxu1  ;;  %v3711_v63 = vpop.f32.mrb[25].mxu0 }
 0x25a   : > { %v3712_v0 = vadd.f32 %v3711_v63, %v3710_v61  ;;  %v3739_v1 = vpop.f32.mrb[25].mxu1  ;;  %v3713_v2 = vpop.f32.mrb[26].mxu0 }
 0x25b   : > { %v3740_v3 = vadd.f32 %v3739_v1, %v3738_v62  ;;  %v3741_v4 = vpop.f32.mrb[26].mxu1  ;;  %v3714_v5 = vpop.f32.mrb[27].mxu0 }
 0x25c   : > { %v3001_v6 = vadd.f32 %v3712_v0, %v2952_v42  ;;  %v3715_v7 = vadd.f32 %v3714_v5, %v3713_v2  ;;  %v3742_v8 = vpop.f32.mrb[27].mxu1 }
 0x25d   : > { %v3743_v10 = vadd.f32 %v3742_v8, %v3741_v4 }
 0x25e   : > { %v3050_v11 = vadd.f32 %v3740_v3, %v3001_v6  ;;  %v3004_v12 = vadd.f32 %v3715_v7, %v2955_v44 }
 0x260   : > { %v3064_v14 = vadd.f32 %v3050_v11, %v1452_v9  ;;  %v3053_v15 = vadd.f32 %v3743_v10, %v3004_v12  ;;  %v3716_v16 = vpop.f32.mrb[28].mxu0  ;;  %v3147_v11 = vlaneseq (!%p3518_p5) }
 0x261   : > { %v3744_v17 = vpop.f32.mrb[28].mxu1  ;;  %v3717_v18 = vpop.f32.mrb[29].mxu0 }
 0x262   : > { %3068 = vst [vmem:[#allocation2] sm:$0xff] %v3064_v14  ;;  %v3065_v19 = vadd.f32 %v3053_v15, %v1453_v13  ;;  %v3718_v20 = vadd.f32 %v3717_v18, %v3716_v16  ;;  %v3745_v21 = vpop.f32.mrb[29].mxu1  ;;  %v3719_v22 = vpop.f32.mrb[30].mxu0  ;;  %v3148_v12 = vshrl.u32 (!%p3518_p5), %v3147_v11, 7  ;;  %v3139_v13 = vld [vmem:[%s1439_s27] sm:$0x1] (!%p3518_p5) }
 0x263   : > { %v3746_v23 = vadd.f32 %v3745_v21, %v3744_v17  ;;  %v3747_v24 = vpop.f32.mrb[30].mxu1  ;;  %v3720_v25 = vpop.f32.mrb[31].mxu0  ;;  %v3143_v17 = vld [vmem:[%s1442_s0] sm:$0x1] (!%p3518_p5) }
 0x264   : > { %3069 = vst [vmem:[#allocation2 + $0x8] sm:$0xff] %v3065_v19  ;;  %v3009_v26 = vadd.f32 %v3718_v20, %v2960_v58  ;;  %v3721_v27 = vadd.f32 %v3720_v25, %v3719_v22  ;;  %v3748_v28 = vpop.f32.mrb[31].mxu1  ;;  %v3149_v14 = vsub.s32 (!%p3518_p5), 0, %v3148_v12 }
 0x265   : > { %v3749_v30 = vadd.f32 %v3748_v28, %v3747_v24 }
 0x266   : > { %v3058_v31 = vadd.f32 %v3746_v23, %v3009_v26  ;;  %v3012_v32 = vadd.f32 %v3721_v27, %v2963_v60  ;;  %3075 = sbr.rel (%p3518_p5) target bundleno = 681 (0x2a9), region = 112 }
 0x268   : > { %v3066_v34 = vadd.f32 %v3058_v31, %v1454_v29  ;;  %v3061_v35 = vadd.f32 %v3749_v30, %v3012_v32 }
 0x269   : > { %v3076_v37 = vld [vmem:[#allocation2] sm:$0xff] (!%p3518_p5) }
 0x26a   : > { %3070 = vst [vmem:[#allocation2 + $0x10] sm:$0xff] %v3066_v34  ;;  %v3067_v36 = vadd.f32 %v3061_v35, %v1455_v33  ;;  %v3087_v42 = vadd.f32 (!%p3518_p5), %v3519_v41, %v3076_v37 }
 0x26b   : > { %v3077_v38 = vld [vmem:[#allocation2 + $0x8] sm:$0xff] (!%p3518_p5) }
 0x26c   : > { %3071 = vst [vmem:[#allocation2 + $0x18] sm:$0xff] %v3067_v36  ;;  %v3088_v43 = vadd.f32 (!%p3518_p5), %v3519_v41, %v3077_v38  ;;  %v3122_v48 = vmul.f32 (!%p3518_p5), %v3087_v42, %v3087_v42 }
 0x26e   : > { %v3112_v47 = vadd.f32 %v3088_v43, %v3087_v42  ;;  %v3123_v49 = vmul.f32 %v3088_v43, %v3088_v43 }
 0x270   : > { %v3126_v53 = vadd.f32 %v3123_v49, %v3122_v48 }
 0x271   : > { %v3078_v39 = vld [vmem:[#allocation2 + $0x10] sm:$0xff] }
 0x272   : > { %v3089_v44 = vadd.f32 %v3519_v41, %v3078_v39 }
 0x273   : > { %v3079_v40 = vld [vmem:[#allocation2 + $0x18] sm:$0xff] }
 0x274   : > { %v3090_v45 = vadd.f32 %v3519_v41, %v3079_v40  ;;  %v3124_v50 = vmul.f32 %v3089_v44, %v3089_v44  ;;  %v3113_v51 = vadd.f32 %v3112_v47, %v3089_v44 }
 0x276   : > { %v3111_v46 = vmul.f32 0.0, %v3090_v45  ;;  %v3127_v55 = vadd.f32 %v3126_v53, %v3124_v50 }
 0x278   : > { %v3125_v52 = vmul.f32 %v3111_v46, %v3111_v46  ;;  %v3114_v54 = vadd.f32 %v3113_v51, %v3111_v46 }
 0x27a   : > { %v3115_v56 = vrot.slane %v3114_v54, 4  ;;  %v3128_v57 = vadd.f32 %v3127_v55, %v3125_v52 }
 0x27c   : > { %v3116_v58 = vadd.f32 %v3115_v56, %v3114_v54  ;;  %v3129_v59 = vrot.slane %v3128_v57, 4 }
 0x27e   : > { %v3117_v60 = vrot.slane %v3116_v58, 2  ;;  %v3130_v61 = vadd.f32 %v3129_v59, %v3128_v57 }
 0x280   : > { %v3118_v62 = vadd.f32 %v3117_v60, %v3116_v58  ;;  %v3131_v63 = vrot.slane %v3130_v61, 2 }
 0x282   : > { %v3119_v0 = vrot.slane %v3118_v62, 1  ;;  %v3132_v1 = vadd.f32 %v3131_v63, %v3130_v61 }
 0x284   : > { %v3120_v2 = vadd.f32 %v3119_v0, %v3118_v62  ;;  %v3133_v3 = vrot.slane %v3132_v1, 1 }
 0x286   : > { %v3121_v4 = vmul.f32 0.041666668, %v3120_v2  ;;  %v3134_v5 = vadd.f32 %v3133_v3, %v3132_v1 }
 0x288   : > { %v3135_v6 = vmul.f32 0.041666668, %v3134_v5  ;;  %v3136_v7 = vmul.f32 %v3121_v4, %v3121_v4 }
 0x28a   : > { %v3137_v8 = vsub.f32 %v3135_v6, %v3136_v7 }
 0x28c   : > { %v3138_v9 = vmax.f32 %v3137_v8, 0.0 }
 0x28e   : > { %v3140_v10 = vadd.f32 1e-05, %v3138_v9 }
 0x290   : > { %3967 = vrsqrt.f32 %v3140_v10 }
 0x29a   : > { %v3968_v15 = vpop.eup %3967 }
 0x29b   : > { %v3142_v16 = vmul.f32 %v3968_v15, %v3139_v13 }
 0x29d   : > { %v3144_v18 = vmul.f32 %v3142_v16, %v3121_v4  ;;  %v3150_v19 = vrot.slane %v3142_v16, %v3149_v14 }
 0x29f   : > { %v3145_v20 = vsub.f32 %v3143_v17, %v3144_v18  ;;  %v3152_v21 = vmul.f32 %v3150_v19, %v3087_v42  ;;  %v3153_v22 = vmul.f32 %v3150_v19, %v3088_v43  ;;  %v3154_v23 = vmul.f32 %v3150_v19, %v3089_v44 }
 0x2a0   : > { %v3155_v24 = vmul.f32 %v3150_v19, %v3090_v45 }
 0x2a1   : > { %v3160_v25 = vrot.slane %v3145_v20, %v3149_v14 }
 0x2a3   : > { %v3162_v26 = vadd.f32 %v3160_v25, %v3152_v21  ;;  %v3163_v27 = vadd.f32 %v3160_v25, %v3153_v22  ;;  %v3164_v28 = vadd.f32 %v3160_v25, %v3154_v23  ;;  %v3165_v29 = vadd.f32 %v3160_v25, %v3155_v24 }
 0x2a5   : > { %v3166_v30 = vmax.f32 %v3162_v26, 0.0  ;;  %v3167_v31 = vmax.f32 %v3163_v27, 0.0  ;;  %v3168_v32 = vmax.f32 %v3164_v28, 0.0  ;;  %v3169_v33 = vmax.f32 %v3165_v29, 0.0 }
 0x2a7   : > { %3170 = vst [vmem:[%s4811_s7] sm:$0xff] %v3166_v30  ;;  %3171 = vst [vmem:[%s4811_s7 + $0x8] sm:$0xff] %v3167_v31 }
 0x2a8   : > { %3172 = vst [vmem:[%s4811_s7 + $0x10] sm:$0xff] %v3168_v32  ;;  %3173 = vst [vmem:[%s4811_s7 + $0x18] sm:$0xff] %v3169_v33 }
 0x2a9 PF: > { %3180 = sbr.rel (!%p4182_p12) target bundleno = 689 (0x2b1), region = 116  ;;  %s3521_s27 = sshll.u32 (%p4182_p12), %s4043_s25, 3 }
 0x2aa   : > { %s3182_s13 = scalar_lea.vmem (%p4182_p12), %s5042_s5, %s3521_s27 }
 0x2ae   : > { %v3216_v34 = vld [vmem:[%s4811_s7] sm:$0xff] (%p4182_p12)  ;;  %v3218_v35 = vld [vmem:[%s4811_s7 + $0x8] sm:$0xff] (%p4182_p12) }
 0x2af   : > { %v3220_v36 = vld [vmem:[%s4811_s7 + $0x10] sm:$0xff] (%p4182_p12)  ;;  %v3222_v37 = vld [vmem:[%s4811_s7 + $0x18] sm:$0xff] (%p4182_p12)  ;;  %3217 = vst [vmem:[%s3182_s13] sm:$0xff] (%p4182_p12), %v3216_v34  ;;  %3219 = vst [vmem:[%s3182_s13 + $0x10] sm:$0xff] (%p4182_p12), %v3218_v35 }
 0x2b0   : > { %3221 = vst [vmem:[%s3182_s13 + $0x20] sm:$0xff] %v3220_v36  ;;  %3223 = vst [vmem:[%s3182_s13 + $0x30] sm:$0xff] %v3222_v37 }
 0x2b1 PF: > { %s15_s28 = sadd.s32 1, %s4055_s28   ;;  %s5056_s25 = sld [smem:[#allocation6_spill]] }
 0x2b2   : > { %p12_p6 = scmp.ge.s32.totalorder %s15_s28, 10   ;;  %s5057_s30 = sld [smem:[#allocation7_spill]] }
 0x2b3   : > { %s5058_s27 = sld [smem:[#allocation8_spill]]  ;;  %s5059_s18 = smov %s4019_s19 }
 0x2b4   : > { %s5060_s19 = smov %s4180_s17  ;;  %s5061_s20 = smov %s4027_s21 }
 0x2b5   : > { %s5062_s21 = smov %s4177_s16  ;;  %s5063_s22 = smov %s4035_s23 }
 0x2b6   : > { %s5064_s23 = smov %s4163_s11  ;;  %s5065_s24 = smov %s4047_s26 }
 0x2b7   :  { %14 = sbr.rel (!%p12_p6) target bundleno = 9 (0x9), region = 202 }
 0x2b8   : > { %s5066_s26 = smov %s5057_s30 }

// kernel: _lambda_.7
= control target key start
LH: loop header
LB: loop body
LE: loop exit
PB: predicated region body
PF: predicated region fallthrough
CT: control target
= control target key end

     0   :  { %s1553_s18 = smov 0   ;;  %s1555_s19 = smov 0   ;;  %s1705_s0 = inlined_call_operand.vmem [shape: bf16[32,2304], index: 0, kind: input, shape index: {}]   ;;  %s1706_s1 = inlined_call_operand.vmem [shape: bf16[2304,128], index: 1, kind: input, shape index: {}]   ;;  %s1707_s2 = inlined_call_operand.vmem [shape: f32[1,128], index: 2, kind: input, shape index: {}]   ;;  %s1708_s3 = inlined_call_operand.vmem [shape: f32[1,128], index: 3, kind: input, shape index: {}]   ;;  %s1709_s4 = inlined_call_operand.vmem [shape: f32[1,128], index: 4, kind: input, shape index: {}]   ;;  %s1710_s5 = inlined_call_operand.vmem [shape: f32[32,128], index: 5, kind: output, shape index: {}]  }
   0x1   :  { %s1557_s20 = smov 0   ;;  %s1559_s21 = smov 0  }
   0x2   :  { %s1561_s22 = smov 0  }
   0x3 LB: > { %s24_s23 = sadd.s32 1, %s1516_s21  ;;  %p41_p1 = scmp.ne.s32.totalorder %s1508_s19, %s1504_s18  ;;  %s1520_s22 = sphi %s1561_s22, %s15_s22   ;;  %s1516_s21 = sphi %s1559_s21, %s1714_s21   ;;  %s1512_s20 = sphi %s1557_s20, %s1713_s20   ;;  %s1508_s19 = sphi %s1555_s19, %s1712_s19   ;;  %s1504_s18 = sphi %s1553_s18, %s1711_s18  }
   0x4   : > { %p25_p0 = scmp.ge.s32.totalorder %s24_s23, 3  ;;  %p42_p2 = scmp.eq.s32.totalorder %s1520_s22, 0 }
   0x5   : > { %s34_s25 = sadd.s32 1, %s1508_s19  ;;  %p1200_p5 = scmp.ge.s32.totalorder %s1520_s22, 3 }
   0x6   : > { %s1716_s23 = smov (%p25_p0, %s24_s23), 0  ;;  %p43_p3 = por %p42_p2, %p41_p1 }
   0x7   : > { %s31_s24 = ssub.s32 %s1516_s21, %s1716_s23  ;;  %217 = sbr.rel (%p1200_p5) target bundleno = 25 (0x19), region = 28 }
   0x8   : > { %p32_p4 = scmp.eq.s32.totalorder %s31_s24, 0 }
   0xa   : > { %s1588_s26 = scalar_select %p32_p4, %s1508_s19, %s34_s25  }
   0xe   : > { %220 = sbr.rel (!%p43_p3) target bundleno = 25 (0x19), region = 32  ;;  %s222_s27 = sand.u32 (%p43_p3), 1, %s1508_s19  }
   0xf   : > { %s1270_s28 = smul.u32 (%p43_p3), 24, %s1516_s21 }
  0x10   : > { %s1371_s29 = smul.u32 (%p43_p3), 96, %s222_s27 }
  0x11   : > { %s227_s7 = scalar_lea.vmem (%p43_p3), %s1705_s0, %s1270_s28 }
  0x12   : > { %v240_v0 = vld [vmem:[%s227_s7] sm:$0xff] (%p43_p3)  ;;  %v242_v1 = vld [vmem:[%s227_s7 + $0x8] sm:$0xff] (%p43_p3)  ;;  %v244_v2 = vld [vmem:[%s227_s7 + $0x10] sm:$0xff] (%p43_p3)  ;;  %s224_s8 = scalar_lea.vmem (%p43_p3), [#allocation3], %s1371_s29 }
  0x13   : > { %241 = vst [vmem:[%s224_s8] sm:$0xff] (%p43_p3), %v240_v0  ;;  %243 = vst [vmem:[%s224_s8 + $0x8] sm:$0xff] (%p43_p3), %v242_v1  ;;  %v246_v3 = vld [vmem:[%s227_s7 + $0x48] sm:$0xff] (%p43_p3)  ;;  %v248_v4 = vld [vmem:[%s227_s7 + $0x50] sm:$0xff] (%p43_p3) }
  0x14   : > { %245 = vst [vmem:[%s224_s8 + $0x10] sm:$0xff] (%p43_p3), %v244_v2  ;;  %v250_v5 = vld [vmem:[%s227_s7 + $0x58] sm:$0xff] (%p43_p3)  ;;  %247 = vst [vmem:[%s224_s8 + $0x18] sm:$0xff] (%p43_p3), %v246_v3  ;;  %v252_v6 = vld [vmem:[%s227_s7 + $0x90] sm:$0xff] (%p43_p3) }
  0x15   : > { %249 = vst [vmem:[%s224_s8 + $0x20] sm:$0xff] %v248_v4  ;;  %251 = vst [vmem:[%s224_s8 + $0x28] sm:$0xff] %v250_v5  ;;  %v254_v7 = vld [vmem:[%s227_s7 + $0x98] sm:$0xff]  ;;  %v256_v8 = vld [vmem:[%s227_s7 + $0xa0] sm:$0xff] }
  0x16   : > { %253 = vst [vmem:[%s224_s8 + $0x30] sm:$0xff] %v252_v6  ;;  %255 = vst [vmem:[%s224_s8 + $0x38] sm:$0xff] %v254_v7  ;;  %v258_v9 = vld [vmem:[%s227_s7 + $0xd8] sm:$0xff]  ;;  %v260_v10 = vld [vmem:[%s227_s7 + $0xe0] sm:$0xff] }
  0x17   : > { %257 = vst [vmem:[%s224_s8 + $0x40] sm:$0xff] %v256_v8  ;;  %v262_v11 = vld [vmem:[%s227_s7 + $0xe8] sm:$0xff]  ;;  %259 = vst [vmem:[%s224_s8 + $0x48] sm:$0xff] %v258_v9 }
  0x18   : > { %261 = vst [vmem:[%s224_s8 + $0x50] sm:$0xff] %v260_v10  ;;  %263 = vst [vmem:[%s224_s8 + $0x58] sm:$0xff] %v262_v11 }
  0x19 PF: > { %p1202_p6 = scmp.ge.s32.totalorder %s1520_s22, 1  ;;  %p280_p7 = scmp.lt.s32.totalorder %s1520_s22, 4 }
  0x1b   : > { %p281_p8 = pnand %p1202_p6, %p280_p7 }
  0x1c   : > { %s287_s9 = sand.u32 (!%p281_p8), 1, %s1504_s18   ;;  %s331_s10 = smul.u32 (!%p281_p8), 96, %s1512_s20 }
  0x1d   : > { %284 = sbr.rel (%p281_p8) target bundleno = 393 (0x189), region = 59  ;;  %p1204_p10 = scmp.ne.s32.totalorder (!%p281_p8), %s1512_s20, 0 }
  0x1e   : > { %s1372_s11 = smul.u32 (!%p281_p8), 96, %s287_s9  ;;  %p332_p9 = scmp.lt.s32.totalorder (!%p281_p8), %s331_s10, 287 }
  0x20   : > { %s1605_s16 = scalar_lea.vmem (!%p281_p8), [#allocation3], %s1372_s11 }
  0x24   : > { %s1718_s10 = smov (!%p332_p9, %s331_s10), 287  ;;  %357 = sbr.rel (%p1204_p10) target bundleno = 43 (0x2b), region = 67 }
  0x25   : > { %s1203_s12 = sshll.u32 %s1718_s10, 2  ;;  %v1522_v12 = vmov (!%p1204_p10), 0.0  }
  0x26   : > { %s1603_s15 = scalar_lea.vmem %s1706_s1, %s1203_s12  ;;  %358 = vst [vmem:[#allocation2] sm:$0xff] (!%p1204_p10), %v1522_v12  ;;  %359 = vst [vmem:[#allocation2 + $0x8] sm:$0xff] (!%p1204_p10), %v1522_v12 }
  0x27   : > { %360 = vst [vmem:[#allocation2 + $0x10] sm:$0xff] (!%p1204_p10), %v1522_v12  ;;  %361 = vst [vmem:[#allocation2 + $0x18] sm:$0xff] (!%p1204_p10), %v1522_v12 }
  0x2b PF: > { %v1414_v13 = vld [vmem:[%s1603_s15 + $0x40] sm:$0xff]   ;;  %v1418_v17 = vld [vmem:[%s1603_s15 + $0x48] sm:$0xff]   ;;  %v1422_v21 = vld [vmem:[%s1603_s15 + $0x50] sm:$0xff]   ;;  %p1265_p11 = scmp.ne.s32.totalorder %s1512_s20, 2 }
  0x2c   : > { %v1415_v14 = vld [vmem:[%s1603_s15 + $0xc0] sm:$0xff]   ;;  %1271 = vmatprep.subr.bf16.mxu0 %v1414_v13  ;;  %v1419_v18 = vld [vmem:[%s1603_s15 + $0xc8] sm:$0xff]   ;;  %v1423_v22 = vld [vmem:[%s1603_s15 + $0xd0] sm:$0xff]  }
  0x2d   : > { %v1416_v15 = vld [vmem:[%s1603_s15] sm:$0xff]   ;;  %1299 = vmatprep.subr.bf16.mxu1 %v1415_v14  ;;  %v1420_v19 = vld [vmem:[%s1603_s15 + $0x8] sm:$0xff]   ;;  %v1424_v23 = vld [vmem:[%s1603_s15 + $0x10] sm:$0xff]  }
  0x2e   : > { %v1417_v16 = vld [vmem:[%s1603_s15 + $0x80] sm:$0xff]   ;;  %1272 = vmatpush3.bf16.msra.mxu0 %v1416_v15  ;;  %v1421_v20 = vld [vmem:[%s1603_s15 + $0x88] sm:$0xff]   ;;  %v1425_v24 = vld [vmem:[%s1603_s15 + $0x90] sm:$0xff]  }
  0x2f   : > { %1300 = vmatpush3.bf16.msra.mxu1 %v1417_v16  ;;  %1273 = vmatprep.subr.bf16.mxu0 %v1418_v17  ;;  %v1426_v25 = vld [vmem:[%s1603_s15 + $0x58] sm:$0xff]   ;;  %v1430_v29 = vld [vmem:[%s1603_s15 + $0x60] sm:$0xff]   ;;  %v1434_v33 = vld [vmem:[%s1603_s15 + $0x68] sm:$0xff]  }
  0x30   : > { %1301 = vmatprep.subr.bf16.mxu1 %v1419_v18  ;;  %v1427_v26 = vld [vmem:[%s1603_s15 + $0xd8] sm:$0xff]   ;;  %v1431_v30 = vld [vmem:[%s1603_s15 + $0xe0] sm:$0xff]   ;;  %v1435_v34 = vld [vmem:[%s1603_s15 + $0xe8] sm:$0xff]  }
  0x31   : > { %v1428_v27 = vld [vmem:[%s1603_s15 + $0x18] sm:$0xff]   ;;  %v1432_v31 = vld [vmem:[%s1603_s15 + $0x20] sm:$0xff]   ;;  %v1436_v35 = vld [vmem:[%s1603_s15 + $0x28] sm:$0xff]  }
  0x32   : > { %1274 = vmatpush3.bf16.msra.mxu0 %v1420_v19  ;;  %v1429_v28 = vld [vmem:[%s1603_s15 + $0x98] sm:$0xff]   ;;  %v1433_v32 = vld [vmem:[%s1603_s15 + $0xa0] sm:$0xff]   ;;  %v1437_v36 = vld [vmem:[%s1603_s15 + $0xa8] sm:$0xff]  }
  0x33   : > { %1302 = vmatpush3.bf16.msra.mxu1 %v1421_v20  ;;  %1275 = vmatprep.subr.bf16.mxu0 %v1422_v21  ;;  %v1438_v37 = vld [vmem:[%s1603_s15 + $0x70] sm:$0xff]   ;;  %v1442_v41 = vld [vmem:[%s1603_s15 + $0x78] sm:$0xff]   ;;  %v1449_v47 = vld [vmem:[%s1605_s16 + $0x8] ss:$24 sps:$4 sm:$0xff]  }
  0x34   : > { %1303 = vmatprep.subr.bf16.mxu1 %v1423_v22  ;;  %v1439_v38 = vld [vmem:[%s1603_s15 + $0xf0] sm:$0xff]   ;;  %v1443_v42 = vld [vmem:[%s1603_s15 + $0xf8] sm:$0xff]   ;;  %v1451_v48 = vld [vmem:[%s1605_s16 + $0xc] ss:$24 sps:$4 sm:$0xff]  }
  0x35   : > { %v1440_v39 = vld [vmem:[%s1603_s15 + $0x30] sm:$0xff]   ;;  %v1444_v43 = vld [vmem:[%s1603_s15 + $0x38] sm:$0xff]   ;;  %v1452_v49 = vld [vmem:[%s1603_s15 + $0x140] sm:$0xff]   ;;  %903 = vmatprep.mubr.bf16.mxu1 %v1451_v48 }
  0x36   : > { %1276 = vmatpush3.bf16.msra.mxu0 %v1424_v23  ;;  %v1441_v40 = vld [vmem:[%s1603_s15 + $0xb0] sm:$0xff]   ;;  %v1445_v44 = vld [vmem:[%s1603_s15 + $0xb8] sm:$0xff]   ;;  %v1453_v50 = vld [vmem:[%s1603_s15 + $0x100] sm:$0xff]  }
  0x37   : > { %1304 = vmatpush3.bf16.msra.mxu1 %v1425_v24  ;;  %1277 = vmatprep.subr.bf16.mxu0 %v1426_v25  ;;  %v1446_v45 = vld [vmem:[%s1605_s16] ss:$24 sps:$4 sm:$0xff]   ;;  %v1448_v46 = vld [vmem:[%s1605_s16 + $0x4] ss:$24 sps:$4 sm:$0xff]   ;;  %v1454_v51 = vld [vmem:[%s1603_s15 + $0x148] sm:$0xff]  }
  0x38   : > { %1305 = vmatprep.subr.bf16.mxu1 %v1427_v26  ;;  %854 = vmatprep.mubr.bf16.mxu0 %v1448_v46  ;;  %v1455_v52 = vld [vmem:[%s1603_s15 + $0x108] sm:$0xff]   ;;  %v1456_v53 = vld [vmem:[%s1603_s15 + $0x150] sm:$0xff]   ;;  %v1458_v55 = vld [vmem:[%s1603_s15 + $0x158] sm:$0xff]  }
  0x39   : > { %v1457_v54 = vld [vmem:[%s1603_s15 + $0x110] sm:$0xff]   ;;  %v1459_v56 = vld [vmem:[%s1603_s15 + $0x118] sm:$0xff]   ;;  %v1460_v59 = vld [vmem:[%s1603_s15 + $0x160] sm:$0xff]  }
  0x3a   : > { %1278 = vmatpush3.bf16.msra.mxu0 %v1428_v27  ;;  %v1462_v57 = vld [vmem:[%s1605_s16 + $0x34] ss:$24 sps:$4 sm:$0xff]   ;;  %v1467_v60 = vld [vmem:[%s1605_s16 + $0x30] ss:$24 sps:$4 sm:$0xff]   ;;  %v1461_v62 = vld [vmem:[%s1603_s15 + $0x120] sm:$0xff]  }
  0x3b   : > { %1306 = vmatpush3.bf16.msra.mxu1 %v1429_v28  ;;  %1279 = vmatprep.subr.bf16.mxu0 %v1430_v29  ;;  %v1464_v58 = vld [vmem:[%s1605_s16 + $0x3c] ss:$24 sps:$4 sm:$0xff]   ;;  %v1468_v61 = vld [vmem:[%s1605_s16 + $0x38] ss:$24 sps:$4 sm:$0xff]   ;;  %v1466_v63 = vld [vmem:[%s1603_s15 + $0x168] sm:$0xff]  }
  0x3c   : > { %1307 = vmatprep.subr.bf16.mxu1 %v1431_v30  ;;  %v1469_v0 = vld [vmem:[%s1603_s15 + $0x128] sm:$0xff]   ;;  %v1470_v2 = vld [vmem:[%s1603_s15 + $0x170] sm:$0xff]   ;;  %v1479_v3 = vld [vmem:[%s1605_s16 + $0x44] ss:$24 sps:$4 sm:$0xff]  }
  0x3d   : > { %v1476_v1 = vld [vmem:[%s1605_s16 + $0x14] ss:$24 sps:$4 sm:$0xff]   ;;  %v1472_v5 = vld [vmem:[%s1603_s15 + $0x178] sm:$0xff]   ;;  %v1474_v7 = vld [vmem:[%s1605_s16 + $0x10] ss:$24 sps:$4 sm:$0xff]  }
  0x3e   : > { %1280 = vmatpush3.bf16.msra.mxu0 %v1432_v31  ;;  %v1471_v4 = vld [vmem:[%s1603_s15 + $0x130] sm:$0xff]   ;;  %v1473_v6 = vld [vmem:[%s1603_s15 + $0x138] sm:$0xff]  }
  0x3f   : > { %1308 = vmatpush3.bf16.msra.mxu1 %v1433_v32  ;;  %1281 = vmatprep.subr.bf16.mxu0 %v1434_v33  ;;  %v1477_v8 = vld [vmem:[%s1605_s16 + $0x40] ss:$24 sps:$4 sm:$0xff]   ;;  %v364_v48 = vld [vmem:[#allocation2 + $0x10] sm:$0xff] }
  0x40   : > { %1309 = vmatprep.subr.bf16.mxu1 %v1435_v34 }
  0x42   : > { %1282 = vmatpush3.bf16.msra.mxu0 %v1436_v35 }
  0x43   : > { %1310 = vmatpush3.bf16.msra.mxu1 %v1437_v36  ;;  %1283 = vmatprep.subr.bf16.mxu0 %v1438_v37 }
  0x44   : > { %1311 = vmatprep.subr.bf16.mxu1 %v1439_v38 }
  0x46   : > { %1284 = vmatpush3.bf16.msra.mxu0 %v1440_v39 }
  0x47   : > { %1312 = vmatpush3.bf16.msra.mxu1 %v1441_v40  ;;  %1285 = vmatprep.subr.bf16.mxu0 %v1442_v41 }
  0x48   : > { %1313 = vmatprep.subr.bf16.mxu1 %v1443_v42 }
  0x4a   : > { %1286 = vmatpush3.bf16.msra.mxu0 %v1444_v43  ;;  %v362_v43 = vld [vmem:[#allocation2] sm:$0xff] }
  0x4b   : > { %1314 = vmatpush3.bf16.msra.mxu1 %v1445_v44  ;;  %1327 = vmatprep.subr.bf16.mxu0 %v1452_v49 }
  0x4c   : > { %1355 = vmatprep.subr.bf16.mxu1 %v1452_v49 }
  0x4d   : > { %855 = vmatmul.mubr.bf16.vlgmr.msra.gmra.mrb[0].mxu0 %v1446_v45 }
  0x4e   : > { %904 = vmatmul.mubr.bf16.vlgmr.msra.gmra.mrb[0].mxu1 %v1449_v47  ;;  %1328 = vmatpush3.bf16.msra.mxu0 %v1453_v50 }
  0x4f   : > { %1363 = vmatpush3.bf16.msra.mxu1 %v1453_v50  ;;  %1329 = vmatprep.subr.bf16.mxu0 %v1454_v51 }
  0x50   : > { %1356 = vmatprep.subr.bf16.mxu1 %v1454_v51  ;;  %862 = vmatprep.mubr.bf16.mxu0 %v1462_v57 }
  0x51   : > { %911 = vmatprep.mubr.bf16.mxu1 %v1464_v58 }
  0x52   : > { %1330 = vmatpush3.bf16.msra.mxu0 %v1455_v52 }
  0x53   : > { %1364 = vmatpush3.bf16.msra.mxu1 %v1455_v52  ;;  %1331 = vmatprep.subr.bf16.mxu0 %v1456_v53  ;;  %v363_v52 = vld [vmem:[#allocation2 + $0x8] sm:$0xff] }
  0x54   : > { %1357 = vmatprep.subr.bf16.mxu1 %v1456_v53 }
  0x55   : > { %863 = vmatmul.mubr.bf16.gmra.mrb[4].mxu0 %v1467_v60 }
  0x56   : > { %1332 = vmatpush3.bf16.msra.mxu0 %v1457_v54  ;;  %912 = vmatmul.mubr.bf16.gmra.mrb[4].mxu1 %v1468_v61 }
  0x57   : > { %1365 = vmatpush3.bf16.msra.mxu1 %v1457_v54  ;;  %1333 = vmatprep.subr.bf16.mxu0 %v1458_v55 }
  0x58   : > { %1358 = vmatprep.subr.bf16.mxu1 %v1458_v55  ;;  %952 = vmatprep.mubr.bf16.mxu0 %v1476_v1  ;;  %v1266_v1 = vld [vmem:[%s1707_s2] ss:$0 sm:$0xff] (!%p1265_p11) }
  0x59   : > { %960 = vmatprep.mubr.bf16.mxu1 %v1479_v3 }
  0x5a   : > { %1334 = vmatpush3.bf16.msra.mxu0 %v1459_v56 }
  0x5b   : > { %1366 = vmatpush3.bf16.msra.mxu1 %v1459_v56  ;;  %1335 = vmatprep.subr.bf16.mxu0 %v1460_v59  ;;  %v365_v56 = vld [vmem:[#allocation2 + $0x18] sm:$0xff] }
  0x5c   : > { %1359 = vmatprep.subr.bf16.mxu1 %v1460_v59 }
  0x5e   : > { %1336 = vmatpush3.bf16.msra.mxu0 %v1461_v62 }
  0x5f   : > { %1367 = vmatpush3.bf16.msra.mxu1 %v1461_v62  ;;  %1337 = vmatprep.subr.bf16.mxu0 %v1466_v63 }
  0x60   : > { %1360 = vmatprep.subr.bf16.mxu1 %v1466_v63 }
  0x62   : > { %1338 = vmatpush3.bf16.msra.mxu0 %v1469_v0 }
  0x63   : > { %1368 = vmatpush3.bf16.msra.mxu1 %v1469_v0  ;;  %1339 = vmatprep.subr.bf16.mxu0 %v1470_v2 }
  0x64   : > { %1361 = vmatprep.subr.bf16.mxu1 %v1470_v2 }
  0x66   : > { %1340 = vmatpush3.bf16.msra.mxu0 %v1471_v4 }
  0x67   : > { %1369 = vmatpush3.bf16.msra.mxu1 %v1471_v4  ;;  %1341 = vmatprep.subr.bf16.mxu0 %v1472_v5 }
  0x68   : > { %1362 = vmatprep.subr.bf16.mxu1 %v1472_v5 }
  0x6a   : > { %1342 = vmatpush3.bf16.msra.mxu0 %v1473_v6 }
  0x6b   : > { %1370 = vmatpush3.bf16.msra.mxu1 %v1473_v6 }
  0x6d   : > { %953 = vmatmul.mubr.bf16.vlgmr.msra.gmra.mrb[8].mxu0 %v1474_v7 }
  0x6e   : > { %961 = vmatmul.mubr.bf16.vlgmr.msra.gmra.mrb[8].mxu1 %v1477_v8 }
 0x120   : > { %v1287_v9 = vpop.f32.mrb[0].mxu0 }
 0x121   : > { %v1315_v10 = vpop.f32.mrb[0].mxu1  ;;  %v1288_v11 = vpop.f32.mrb[1].mxu0 }
 0x122   : > { %v1289_v12 = vadd.f32 %v1288_v11, %v1287_v9  ;;  %v1316_v13 = vpop.f32.mrb[1].mxu1  ;;  %v1290_v14 = vpop.f32.mrb[2].mxu0 }
 0x123   : > { %v1317_v15 = vadd.f32 %v1316_v13, %v1315_v10  ;;  %v1318_v16 = vpop.f32.mrb[2].mxu1  ;;  %v1291_v17 = vpop.f32.mrb[3].mxu0 }
 0x124   : > { %v1292_v18 = vadd.f32 %v1291_v17, %v1290_v14  ;;  %v1319_v19 = vpop.f32.mrb[3].mxu1 }
 0x125   : > { %v906_v20 = vadd.f32 %v1317_v15, %v1289_v12  ;;  %v1320_v21 = vadd.f32 %v1319_v19, %v1318_v16 }
 0x127   : > { %v909_v22 = vadd.f32 %v1320_v21, %v1292_v18 }
 0x128   : > { %v1293_v23 = vpop.f32.mrb[4].mxu0 }
 0x129   : > { %v1321_v24 = vpop.f32.mrb[4].mxu1  ;;  %v1294_v25 = vpop.f32.mrb[5].mxu0 }
 0x12a   : > { %v1295_v26 = vadd.f32 %v1294_v25, %v1293_v23  ;;  %v1322_v27 = vpop.f32.mrb[5].mxu1  ;;  %v1296_v28 = vpop.f32.mrb[6].mxu0 }
 0x12b   : > { %v1323_v29 = vadd.f32 %v1322_v27, %v1321_v24  ;;  %v1324_v30 = vpop.f32.mrb[6].mxu1  ;;  %v1297_v31 = vpop.f32.mrb[7].mxu0 }
 0x12c   : > { %v1298_v32 = vadd.f32 %v1297_v31, %v1296_v28  ;;  %v1325_v33 = vpop.f32.mrb[7].mxu1 }
 0x12d   : > { %v914_v34 = vadd.f32 %v1323_v29, %v1295_v26  ;;  %v1326_v35 = vadd.f32 %v1325_v33, %v1324_v30 }
 0x12f   : > { %v917_v36 = vadd.f32 %v1326_v35, %v1298_v32  ;;  %v1052_v35 = vlaneseq (!%p1265_p11) }
 0x140   : > { %v1343_v37 = vpop.f32.mrb[8].mxu0 }
 0x141   : > { %v1349_v38 = vpop.f32.mrb[8].mxu1  ;;  %v1344_v39 = vpop.f32.mrb[9].mxu0 }
 0x142   : > { %v1345_v40 = vadd.f32 %v1344_v39, %v1343_v37  ;;  %v1350_v41 = vpop.f32.mrb[9].mxu1  ;;  %v1346_v42 = vpop.f32.mrb[10].mxu0  ;;  %v1044_v37 = vld [vmem:[%s1708_s3] sm:$0x1] (!%p1265_p11) }
 0x143   : > { %v1351_v44 = vadd.f32 %v1350_v41, %v1349_v38  ;;  %v1352_v45 = vpop.f32.mrb[10].mxu1  ;;  %v1347_v46 = vpop.f32.mrb[11].mxu0  ;;  %v1048_v41 = vld [vmem:[%s1709_s4] sm:$0x1] (!%p1265_p11) }
 0x144   : > { %v955_v47 = vadd.f32 %v1345_v40, %v906_v20  ;;  %v1348_v49 = vadd.f32 %v1347_v46, %v1346_v42  ;;  %v1353_v50 = vpop.f32.mrb[11].mxu1 }
 0x145   : > { %v963_v51 = vadd.f32 %v1351_v44, %v914_v34  ;;  %v1354_v53 = vadd.f32 %v1353_v50, %v1352_v45  ;;  %980 = sbr.rel (%p1265_p11) target bundleno = 393 (0x189), region = 71 }
 0x146   : > { %v969_v54 = vadd.f32 %v955_v47, %v362_v43  ;;  %v958_v55 = vadd.f32 %v1348_v49, %v909_v22 }
 0x147   : > { %v971_v57 = vadd.f32 %v963_v51, %v364_v48  ;;  %v966_v58 = vadd.f32 %v1354_v53, %v917_v36  ;;  %v1053_v36 = vshrl.u32 (!%p1265_p11), %v1052_v35, 7 }
 0x148   : > { %973 = vst [vmem:[#allocation2] sm:$0xff] %v969_v54  ;;  %v970_v59 = vadd.f32 %v958_v55, %v363_v52 }
 0x149   : > { %975 = vst [vmem:[#allocation2 + $0x10] sm:$0xff] %v971_v57  ;;  %v972_v60 = vadd.f32 %v966_v58, %v365_v56  ;;  %v1054_v38 = vsub.s32 (!%p1265_p11), 0, %v1053_v36 }
 0x14a   : > { %974 = vst [vmem:[#allocation2 + $0x8] sm:$0xff] %v970_v59 }
 0x14b   : > { %976 = vst [vmem:[#allocation2 + $0x18] sm:$0xff] %v972_v60 }
 0x14f   : > { %v981_v61 = vld [vmem:[#allocation2] sm:$0xff] }
 0x150   : > { %v983_v63 = vld [vmem:[#allocation2 + $0x10] sm:$0xff]  ;;  %v992_v2 = vadd.f32 %v1266_v1, %v981_v61 }
 0x151   : > { %v982_v62 = vld [vmem:[#allocation2 + $0x8] sm:$0xff]  ;;  %v994_v4 = vadd.f32 %v1266_v1, %v983_v63 }
 0x152   : > { %v984_v0 = vld [vmem:[#allocation2 + $0x18] sm:$0xff]  ;;  %v993_v3 = vadd.f32 %v1266_v1, %v982_v62  ;;  %v1027_v8 = vmul.f32 %v992_v2, %v992_v2 }
 0x153   : > { %v995_v5 = vadd.f32 %v1266_v1, %v984_v0  ;;  %v1029_v10 = vmul.f32 %v994_v4, %v994_v4 }
 0x154   : > { %v1017_v7 = vadd.f32 %v993_v3, %v992_v2  ;;  %v1028_v9 = vmul.f32 %v993_v3, %v993_v3 }
 0x155   : > { %v1016_v6 = vmul.f32 0.0, %v995_v5 }
 0x156   : > { %v1018_v11 = vadd.f32 %v1017_v7, %v994_v4  ;;  %v1031_v13 = vadd.f32 %v1028_v9, %v1027_v8 }
 0x157   : > { %v1030_v12 = vmul.f32 %v1016_v6, %v1016_v6 }
 0x158   : > { %v1019_v14 = vadd.f32 %v1018_v11, %v1016_v6  ;;  %v1032_v15 = vadd.f32 %v1031_v13, %v1029_v10 }
 0x15a   : > { %v1020_v16 = vrot.slane %v1019_v14, 4  ;;  %v1033_v17 = vadd.f32 %v1032_v15, %v1030_v12 }
 0x15c   : > { %v1021_v18 = vadd.f32 %v1020_v16, %v1019_v14  ;;  %v1034_v19 = vrot.slane %v1033_v17, 4 }
 0x15e   : > { %v1022_v20 = vrot.slane %v1021_v18, 2  ;;  %v1035_v21 = vadd.f32 %v1034_v19, %v1033_v17 }
 0x160   : > { %v1023_v22 = vadd.f32 %v1022_v20, %v1021_v18  ;;  %v1036_v23 = vrot.slane %v1035_v21, 2 }
 0x162   : > { %v1024_v24 = vrot.slane %v1023_v22, 1  ;;  %v1037_v25 = vadd.f32 %v1036_v23, %v1035_v21 }
 0x164   : > { %v1025_v26 = vadd.f32 %v1024_v24, %v1023_v22  ;;  %v1038_v27 = vrot.slane %v1037_v25, 1 }
 0x166   : > { %v1026_v28 = vmul.f32 0.041666668, %v1025_v26  ;;  %v1039_v29 = vadd.f32 %v1038_v27, %v1037_v25 }
 0x168   : > { %v1040_v30 = vmul.f32 0.041666668, %v1039_v29  ;;  %v1041_v31 = vmul.f32 %v1026_v28, %v1026_v28 }
 0x16a   : > { %v1042_v32 = vsub.f32 %v1040_v30, %v1041_v31 }
 0x16c   : > { %v1043_v33 = vmax.f32 %v1042_v32, 0.0 }
 0x16e   : > { %v1045_v34 = vadd.f32 1e-05, %v1043_v33 }
 0x170   : > { %1480 = vrsqrt.f32 %v1045_v34 }
 0x17a   : > { %v1481_v39 = vpop.eup %1480 }
 0x17b   : > { %v1047_v40 = vmul.f32 %v1481_v39, %v1044_v37 }
 0x17d   : > { %v1049_v42 = vmul.f32 %v1047_v40, %v1026_v28  ;;  %v1055_v43 = vrot.slane %v1047_v40, %v1054_v38 }
 0x17f   : > { %v1050_v44 = vsub.f32 %v1048_v41, %v1049_v42  ;;  %v1057_v45 = vmul.f32 %v1055_v43, %v992_v2  ;;  %v1058_v46 = vmul.f32 %v1055_v43, %v993_v3  ;;  %v1059_v47 = vmul.f32 %v1055_v43, %v994_v4 }
 0x180   : > { %v1060_v48 = vmul.f32 %v1055_v43, %v995_v5 }
 0x181   : > { %v1065_v49 = vrot.slane %v1050_v44, %v1054_v38 }
 0x183   : > { %v1067_v50 = vadd.f32 %v1065_v49, %v1057_v45  ;;  %v1068_v51 = vadd.f32 %v1065_v49, %v1058_v46  ;;  %v1069_v52 = vadd.f32 %v1065_v49, %v1059_v47  ;;  %v1070_v53 = vadd.f32 %v1065_v49, %v1060_v48 }
 0x185   : > { %v1071_v54 = vmax.f32 %v1067_v50, 0.0  ;;  %v1072_v55 = vmax.f32 %v1068_v51, 0.0  ;;  %v1073_v56 = vmax.f32 %v1069_v52, 0.0  ;;  %v1074_v57 = vmax.f32 %v1070_v53, 0.0 }
 0x187   : > { %1075 = vst [vmem:[%s1710_s5] sm:$0xff] %v1071_v54  ;;  %1076 = vst [vmem:[%s1710_s5 + $0x8] sm:$0xff] %v1072_v55 }
 0x188   : > { %1077 = vst [vmem:[%s1710_s5 + $0x10] sm:$0xff] %v1073_v56  ;;  %1078 = vst [vmem:[%s1710_s5 + $0x18] sm:$0xff] %v1074_v57 }
 0x189 PF: > { %s15_s22 = sadd.s32 1, %s1520_s22   ;;  %s1711_s18 = smov %s1508_s19 }
 0x18a   : > { %p12_p12 = scmp.ge.s32.totalorder %s15_s22, 5   ;;  %s1712_s19 = smov %s1588_s26 }
 0x18b   : > { %s1713_s20 = smov %s1516_s21  ;;  %s1714_s21 = smov %s1716_s23 }
 0x18c   :  { %14 = sbr.rel (!%p12_p12) target bundleno = 3 (0x3), region = 118 }

// kernel: _lambda_.8
= control target key start
LH: loop header
LB: loop body
LE: loop exit
PB: predicated region body
PF: predicated region fallthrough
CT: control target
= control target key end

     0   :  { %s1187_s18 = smov 0   ;;  %s1189_s19 = smov 0   ;;  %s1309_s0 = inlined_call_operand.vmem [shape: bf16[32,1152], index: 0, kind: input, shape index: {}]   ;;  %s1310_s1 = inlined_call_operand.vmem [shape: bf16[1152,128], index: 1, kind: input, shape index: {}]   ;;  %s1311_s2 = inlined_call_operand.vmem [shape: f32[1,128], index: 2, kind: input, shape index: {}]   ;;  %s1312_s3 = inlined_call_operand.vmem [shape: f32[1,128], index: 3, kind: input, shape index: {}]   ;;  %s1313_s4 = inlined_call_operand.vmem [shape: f32[1,128], index: 4, kind: input, shape index: {}]   ;;  %s1314_s5 = inlined_call_operand.vmem [shape: f32[32,128], index: 5, kind: output, shape index: {}]  }
   0x1   :  { %s1191_s20 = smov 0   ;;  %s1193_s21 = smov 0  }
   0x2   :  { %s1195_s22 = smov 0  }
   0x3 LB: > { %s24_s23 = sadd.s32 1, %s1150_s21  ;;  %p41_p1 = scmp.ne.s32.totalorder %s1142_s19, %s1138_s18  ;;  %s1154_s22 = sphi %s1195_s22, %s15_s22   ;;  %s1150_s21 = sphi %s1193_s21, %s1318_s21   ;;  %s1146_s20 = sphi %s1191_s20, %s1317_s20   ;;  %s1142_s19 = sphi %s1189_s19, %s1316_s19   ;;  %s1138_s18 = sphi %s1187_s18, %s1315_s18  }
   0x4   : > { %p25_p0 = scmp.ge.s32.totalorder %s24_s23, 3  ;;  %p42_p2 = scmp.eq.s32.totalorder %s1154_s22, 0 }
   0x5   : > { %s34_s25 = sadd.s32 1, %s1142_s19  ;;  %p932_p5 = scmp.ge.s32.totalorder %s1154_s22, 3 }
   0x6   : > { %s1320_s23 = smov (%p25_p0, %s24_s23), 0  ;;  %p43_p3 = por %p42_p2, %p41_p1 }
   0x7   : > { %s31_s24 = ssub.s32 %s1150_s21, %s1320_s23  ;;  %217 = sbr.rel (%p932_p5) target bundleno = 23 (0x17), region = 28 }
   0x8   : > { %p32_p4 = scmp.eq.s32.totalorder %s31_s24, 0 }
   0xa   : > { %s1222_s26 = scalar_select %p32_p4, %s1142_s19, %s34_s25  }
   0xe   : > { %220 = sbr.rel (!%p43_p3) target bundleno = 23 (0x17), region = 32  ;;  %s222_s27 = sand.u32 (%p43_p3), 1, %s1142_s19  }
   0xf   : > { %s980_s28 = smul.u32 (%p43_p3), 12, %s1150_s21 }
  0x10   : > { %s1039_s29 = smul.u32 (%p43_p3), 48, %s222_s27 }
  0x11   : > { %s227_s7 = scalar_lea.vmem (%p43_p3), %s1309_s0, %s980_s28 }
  0x12   : > { %v242_v0 = vld [vmem:[%s227_s7] sm:$0xff] (%p43_p3)  ;;  %v246_v2 = vld [vmem:[%s227_s7 + $0x48] sm:$0xff] (%p43_p3)  ;;  %s224_s8 = scalar_lea.vmem (%p43_p3), [#allocation3], %s1039_s29  ;;  %v938_v6 = vld [vmem:[%s227_s7 + $0x50] sm:$0xf] (%p43_p3) }
  0x13   : > { %v244_v1 = vld [vmem:[%s227_s7 + $0x24] sm:$0xff] (%p43_p3)  ;;  %243 = vst [vmem:[%s224_s8] sm:$0xff] (%p43_p3), %v242_v0  ;;  %247 = vst [vmem:[%s224_s8 + $0x18] sm:$0xff] (%p43_p3), %v246_v2  ;;  %v248_v3 = vld [vmem:[%s227_s7 + $0x6c] sm:$0xff] (%p43_p3) }
  0x14   : > { %245 = vst [vmem:[%s224_s8 + $0xc] sm:$0xff] (%p43_p3), %v244_v1  ;;  %v934_v4 = vld [vmem:[%s227_s7 + $0x8] sm:$0xf] (%p43_p3)  ;;  %v936_v5 = vld [vmem:[%s227_s7 + $0x2c] sm:$0xf] (%p43_p3)  ;;  %249 = vst [vmem:[%s224_s8 + $0x24] sm:$0xff] (%p43_p3), %v248_v3 }
  0x15   : > { %935 = vst [vmem:[%s224_s8 + $0x8] sm:$0xf] %v934_v4  ;;  %937 = vst [vmem:[%s224_s8 + $0x14] sm:$0xf] %v936_v5  ;;  %v940_v7 = vld [vmem:[%s227_s7 + $0x74] sm:$0xf] }
  0x16   : > { %939 = vst [vmem:[%s224_s8 + $0x20] sm:$0xf] %v938_v6  ;;  %941 = vst [vmem:[%s224_s8 + $0x2c] sm:$0xf] %v940_v7 }
  0x17 PF: > { %p942_p6 = scmp.ge.s32.totalorder %s1154_s22, 1  ;;  %p281_p7 = scmp.lt.s32.totalorder %s1154_s22, 4 }
  0x19   : > { %p282_p8 = pnand %p942_p6, %p281_p7 }
  0x1a   : > { %s288_s9 = sand.u32 (!%p282_p8), 1, %s1138_s18   ;;  %s332_s10 = smul.u32 (!%p282_p8), 48, %s1146_s20 }
  0x1b   : > { %285 = sbr.rel (%p282_p8) target bundleno = 364 (0x16c), region = 62  ;;  %p944_p10 = scmp.ne.s32.totalorder (!%p282_p8), %s1146_s20, 0 }
  0x1c   : > { %s1040_s11 = smul.u32 (!%p282_p8), 48, %s288_s9  ;;  %p333_p9 = scmp.lt.s32.totalorder (!%p282_p8), %s332_s10, 143 }
  0x1e   : > { %s1239_s16 = scalar_lea.vmem (!%p282_p8), [#allocation3], %s1040_s11 }
  0x22   : > { %s1322_s10 = smov (!%p333_p9, %s332_s10), 143  ;;  %358 = sbr.rel (%p944_p10) target bundleno = 41 (0x29), region = 70 }
  0x23   : > { %s943_s12 = sshll.u32 %s1322_s10, 2  ;;  %v1156_v8 = vmov (!%p944_p10), 0.0  }
  0x24   : > { %s1237_s15 = scalar_lea.vmem %s1310_s1, %s943_s12  ;;  %359 = vst [vmem:[#allocation2] sm:$0xff] (!%p944_p10), %v1156_v8  ;;  %360 = vst [vmem:[#allocation2 + $0x8] sm:$0xff] (!%p944_p10), %v1156_v8 }
  0x25   : > { %361 = vst [vmem:[#allocation2 + $0x10] sm:$0xff] (!%p944_p10), %v1156_v8  ;;  %362 = vst [vmem:[#allocation2 + $0x18] sm:$0xff] (!%p944_p10), %v1156_v8 }
  0x29 PF: > { %v1082_v9 = vld [vmem:[%s1237_s15 + $0x40] sm:$0xff]   ;;  %v1085_v12 = vld [vmem:[%s1237_s15 + $0x48] sm:$0xff]   ;;  %v1088_v15 = vld [vmem:[%s1237_s15 + $0x50] sm:$0xff]   ;;  %p975_p11 = scmp.ne.s32.totalorder %s1146_s20, 2 }
  0x2a   : > { %v1083_v10 = vld [vmem:[%s1237_s15] sm:$0xff]   ;;  %981 = vmatprep.subr.bf16.mxu0 %v1082_v9  ;;  %v1086_v13 = vld [vmem:[%s1237_s15 + $0x8] sm:$0xff]   ;;  %v1089_v16 = vld [vmem:[%s1237_s15 + $0x10] sm:$0xff]  }
  0x2b   : > { %v1084_v11 = vld [vmem:[%s1237_s15 + $0x80] sm:$0xff]   ;;  %982 = vmatpush3.bf16.msra.mxu0 %v1083_v10  ;;  %v1087_v14 = vld [vmem:[%s1237_s15 + $0x88] sm:$0xff]   ;;  %v1090_v17 = vld [vmem:[%s1237_s15 + $0x90] sm:$0xff]  }
  0x2c   : > { %1019 = vmatprep.subr.bf16.mxu1 %v1084_v11  ;;  %983 = vmatprep.subr.bf16.mxu0 %v1085_v12  ;;  %v1091_v18 = vld [vmem:[%s1237_s15 + $0x58] sm:$0xff]   ;;  %v1094_v21 = vld [vmem:[%s1237_s15 + $0x60] sm:$0xff]   ;;  %v1097_v24 = vld [vmem:[%s1237_s15 + $0x68] sm:$0xff]  }
  0x2d   : > { %1020 = vmatpush3.bf16.msra.mxu1 %v1084_v11  ;;  %v1092_v19 = vld [vmem:[%s1237_s15 + $0x18] sm:$0xff]   ;;  %v1096_v22 = vld [vmem:[%s1237_s15 + $0xa0] sm:$0xff]   ;;  %v1099_v25 = vld [vmem:[%s1237_s15 + $0xa8] sm:$0xff]  }
  0x2e   : > { %1021 = vmatprep.subr.bf16.mxu1 %v1087_v14  ;;  %v1093_v20 = vld [vmem:[%s1237_s15 + $0x98] sm:$0xff]   ;;  %v1095_v23 = vld [vmem:[%s1237_s15 + $0x20] sm:$0xff]   ;;  %v1098_v26 = vld [vmem:[%s1237_s15 + $0x28] sm:$0xff]  }
  0x2f   : > { %984 = vmatpush3.bf16.msra.mxu0 %v1086_v13  ;;  %v1100_v27 = vld [vmem:[%s1237_s15 + $0x70] sm:$0xff]   ;;  %v1103_v30 = vld [vmem:[%s1237_s15 + $0x78] sm:$0xff]   ;;  %v363_v45 = vld [vmem:[#allocation2] sm:$0xff] }
  0x30   : > { %985 = vmatprep.subr.bf16.mxu0 %v1088_v15  ;;  %v1101_v28 = vld [vmem:[%s1237_s15 + $0x30] sm:$0xff]   ;;  %v1105_v31 = vld [vmem:[%s1237_s15 + $0xb8] sm:$0xff]   ;;  %v364_v50 = vld [vmem:[#allocation2 + $0x8] sm:$0xff] }
  0x31   : > { %1022 = vmatpush3.bf16.msra.mxu1 %v1087_v14  ;;  %v1102_v29 = vld [vmem:[%s1237_s15 + $0xb0] sm:$0xff]   ;;  %v1104_v34 = vld [vmem:[%s1237_s15 + $0x38] sm:$0xff]   ;;  %v976_v7 = vld [vmem:[%s1311_s2] ss:$0 sm:$0xff] (!%p975_p11) }
  0x32   : > { %1023 = vmatprep.subr.bf16.mxu1 %v1090_v17  ;;  %v1108_v32 = vld [vmem:[%s1239_s16 + $0x4] ss:$12 sps:$4 sm:$0xff]   ;;  %v1109_v33 = vld [vmem:[%s1239_s16 + $0x8] ss:$12 sps:$4 sm:$0xff]   ;;  %v1106_v35 = vld [vmem:[%s1239_s16] ss:$12 sps:$4 sm:$0xff]  }
  0x33   : > { %986 = vmatpush3.bf16.msra.mxu0 %v1089_v16  ;;  %631 = vmatprep.mubr.bf16.mxu0 %v1108_v32  ;;  %v1111_v36 = vld [vmem:[%s1239_s16 + $0x1c] ss:$12 sps:$4 sm:$0xff]   ;;  %v1110_v37 = vld [vmem:[%s1239_s16 + $0x20] ss:$12 sps:$4 sm:$0xff]   ;;  %v1113_v38 = vld [vmem:[%s1239_s16 + $0x18] ss:$12 sps:$4 sm:$0xff]  }
  0x34   : > { %987 = vmatprep.subr.bf16.mxu0 %v1091_v18  ;;  %1035 = vmatprep.mubr.bf16.mxu1 %v1109_v33  ;;  %v365_v59 = vld [vmem:[#allocation2 + $0x10] sm:$0xff]  ;;  %v366_v63 = vld [vmem:[#allocation2 + $0x18] sm:$0xff] }
  0x35   : > { %1024 = vmatpush3.bf16.msra.mxu1 %v1090_v17 }
  0x36   : > { %1025 = vmatprep.subr.bf16.mxu1 %v1093_v20 }
  0x37   : > { %988 = vmatpush3.bf16.msra.mxu0 %v1092_v19 }
  0x38   : > { %989 = vmatprep.subr.bf16.mxu0 %v1094_v21 }
  0x39   : > { %1026 = vmatpush3.bf16.msra.mxu1 %v1093_v20 }
  0x3a   : > { %1027 = vmatprep.subr.bf16.mxu1 %v1096_v22 }
  0x3b   : > { %990 = vmatpush3.bf16.msra.mxu0 %v1095_v23 }
  0x3c   : > { %991 = vmatprep.subr.bf16.mxu0 %v1097_v24 }
  0x3d   : > { %1028 = vmatpush3.bf16.msra.mxu1 %v1096_v22 }
  0x3e   : > { %1029 = vmatprep.subr.bf16.mxu1 %v1099_v25 }
  0x3f   : > { %992 = vmatpush3.bf16.msra.mxu0 %v1098_v26 }
  0x40   : > { %993 = vmatprep.subr.bf16.mxu0 %v1100_v27 }
  0x41   : > { %1030 = vmatpush3.bf16.msra.mxu1 %v1099_v25 }
  0x42   : > { %1031 = vmatprep.subr.bf16.mxu1 %v1102_v29 }
  0x43   : > { %994 = vmatpush3.bf16.msra.mxu0 %v1101_v28 }
  0x44   : > { %995 = vmatprep.subr.bf16.mxu0 %v1103_v30 }
  0x45   : > { %1032 = vmatpush3.bf16.msra.mxu1 %v1102_v29 }
  0x46   : > { %1033 = vmatprep.subr.bf16.mxu1 %v1105_v31 }
  0x47   : > { %996 = vmatpush3.bf16.msra.mxu0 %v1104_v34 }
  0x49   : > { %1034 = vmatpush3.bf16.msra.mxu1 %v1105_v31 }
  0x4a   : > { %632 = vmatmul.mubr.bf16.vlgmr.msra.gmra.mrb[0].mxu0 %v1106_v35 }
  0x4b   : > { %639 = vmatprep.mubr.bf16.mxu0 %v1111_v36 }
  0x4c   : > { %1036 = vmatmul.mubr.bf16.vlgmr.msra.gmra.mrb[0].mxu1 %v1110_v37 }
  0x52   : > { %640 = vmatmul.mubr.bf16.gmra.mrb[4].mxu0 %v1113_v38 }
 0x11d   : > { %v997_v39 = vpop.f32.mrb[0].mxu0 }
 0x11e   : > { %v998_v40 = vpop.f32.mrb[1].mxu0 }
 0x11f   : > { %v999_v41 = vadd.f32 %v998_v40, %v997_v39  ;;  %v1000_v42 = vpop.f32.mrb[2].mxu0  ;;  %v1037_v43 = vpop.f32.mrb[0].mxu1 }
 0x120   : > { %v1001_v44 = vpop.f32.mrb[3].mxu0  ;;  %v682_v46 = vpop.f32.mrb[1].mxu1 }
 0x121   : > { %v1002_v47 = vadd.f32 %v1001_v44, %v1000_v42  ;;  %v683_v48 = vadd.f32 %v999_v41, %v682_v46  ;;  %v1038_v49 = vpop.f32.mrb[2].mxu1  ;;  %v780_v41 = vlaneseq (!%p975_p11) }
 0x122   : > { %v685_v51 = vpop.f32.mrb[3].mxu1 }
 0x123   : > { %v697_v52 = vadd.f32 %v683_v48, %v363_v45  ;;  %v686_v53 = vadd.f32 %v1002_v47, %v685_v51  ;;  %v781_v42 = vshrl.u32 (!%p975_p11), %v780_v41, 7  ;;  %v776_v47 = vld [vmem:[%s1313_s4] sm:$0x1] (!%p975_p11) }
 0x125   : > { %701 = vst [vmem:[#allocation2] sm:$0xff] %v697_v52  ;;  %v698_v54 = vadd.f32 %v686_v53, %v364_v50  ;;  %v1003_v55 = vpop.f32.mrb[4].mxu0  ;;  %v782_v44 = vsub.s32 (!%p975_p11), 0, %v781_v42 }
 0x126   : > { %v1004_v56 = vpop.f32.mrb[5].mxu0 }
 0x127   : > { %702 = vst [vmem:[#allocation2 + $0x8] sm:$0xff] %v698_v54  ;;  %v1005_v57 = vadd.f32 %v1004_v56, %v1003_v55  ;;  %v1006_v58 = vpop.f32.mrb[6].mxu0 }
 0x128   : > { %v1007_v60 = vpop.f32.mrb[7].mxu0 }
 0x129   : > { %v691_v61 = vadd.f32 %v1037_v43, %v1005_v57  ;;  %v1008_v62 = vadd.f32 %v1007_v60, %v1006_v58  ;;  %708 = sbr.rel (%p975_p11) target bundleno = 364 (0x16c), region = 74  ;;  %v772_v43 = vld [vmem:[%s1312_s3] sm:$0x1] (!%p975_p11) }
 0x12b   : > { %v699_v0 = vadd.f32 %v691_v61, %v365_v59  ;;  %v694_v1 = vadd.f32 %v1038_v49, %v1008_v62 }
 0x12c   : > { %v709_v3 = vld [vmem:[#allocation2] sm:$0xff] (!%p975_p11) }
 0x12d   : > { %703 = vst [vmem:[#allocation2 + $0x10] sm:$0xff] %v699_v0  ;;  %v700_v2 = vadd.f32 %v694_v1, %v366_v63  ;;  %v720_v8 = vadd.f32 (!%p975_p11), %v976_v7, %v709_v3 }
 0x12e   : > { %v710_v4 = vld [vmem:[#allocation2 + $0x8] sm:$0xff] (!%p975_p11) }
 0x12f   : > { %704 = vst [vmem:[#allocation2 + $0x18] sm:$0xff] %v700_v2  ;;  %v721_v9 = vadd.f32 (!%p975_p11), %v976_v7, %v710_v4  ;;  %v755_v14 = vmul.f32 (!%p975_p11), %v720_v8, %v720_v8 }
 0x131   : > { %v745_v13 = vadd.f32 %v721_v9, %v720_v8  ;;  %v756_v15 = vmul.f32 %v721_v9, %v721_v9 }
 0x133   : > { %v759_v19 = vadd.f32 %v756_v15, %v755_v14 }
 0x134   : > { %v711_v5 = vld [vmem:[#allocation2 + $0x10] sm:$0xff] }
 0x135   : > { %v722_v10 = vadd.f32 %v976_v7, %v711_v5 }
 0x136   : > { %v712_v6 = vld [vmem:[#allocation2 + $0x18] sm:$0xff] }
 0x137   : > { %v723_v11 = vadd.f32 %v976_v7, %v712_v6  ;;  %v757_v16 = vmul.f32 %v722_v10, %v722_v10  ;;  %v746_v17 = vadd.f32 %v745_v13, %v722_v10 }
 0x139   : > { %v744_v12 = vmul.f32 0.0, %v723_v11  ;;  %v760_v21 = vadd.f32 %v759_v19, %v757_v16 }
 0x13b   : > { %v758_v18 = vmul.f32 %v744_v12, %v744_v12  ;;  %v747_v20 = vadd.f32 %v746_v17, %v744_v12 }
 0x13d   : > { %v748_v22 = vrot.slane %v747_v20, 4  ;;  %v761_v23 = vadd.f32 %v760_v21, %v758_v18 }
 0x13f   : > { %v749_v24 = vadd.f32 %v748_v22, %v747_v20  ;;  %v762_v25 = vrot.slane %v761_v23, 4 }
 0x141   : > { %v750_v26 = vrot.slane %v749_v24, 2  ;;  %v763_v27 = vadd.f32 %v762_v25, %v761_v23 }
 0x143   : > { %v751_v28 = vadd.f32 %v750_v26, %v749_v24  ;;  %v764_v29 = vrot.slane %v763_v27, 2 }
 0x145   : > { %v752_v30 = vrot.slane %v751_v28, 1  ;;  %v765_v31 = vadd.f32 %v764_v29, %v763_v27 }
 0x147   : > { %v753_v32 = vadd.f32 %v752_v30, %v751_v28  ;;  %v766_v33 = vrot.slane %v765_v31, 1 }
 0x149   : > { %v754_v34 = vmul.f32 0.041666668, %v753_v32  ;;  %v767_v35 = vadd.f32 %v766_v33, %v765_v31 }
 0x14b   : > { %v768_v36 = vmul.f32 0.041666668, %v767_v35  ;;  %v769_v37 = vmul.f32 %v754_v34, %v754_v34 }
 0x14d   : > { %v770_v38 = vsub.f32 %v768_v36, %v769_v37 }
 0x14f   : > { %v771_v39 = vmax.f32 %v770_v38, 0.0 }
 0x151   : > { %v773_v40 = vadd.f32 1e-05, %v771_v39 }
 0x153   : > { %1114 = vrsqrt.f32 %v773_v40 }
 0x15d   : > { %v1115_v45 = vpop.eup %1114 }
 0x15e   : > { %v775_v46 = vmul.f32 %v1115_v45, %v772_v43 }
 0x160   : > { %v777_v48 = vmul.f32 %v775_v46, %v754_v34  ;;  %v783_v49 = vrot.slane %v775_v46, %v782_v44 }
 0x162   : > { %v778_v50 = vsub.f32 %v776_v47, %v777_v48  ;;  %v785_v51 = vmul.f32 %v783_v49, %v720_v8  ;;  %v786_v52 = vmul.f32 %v783_v49, %v721_v9  ;;  %v787_v53 = vmul.f32 %v783_v49, %v722_v10 }
 0x163   : > { %v788_v54 = vmul.f32 %v783_v49, %v723_v11 }
 0x164   : > { %v793_v55 = vrot.slane %v778_v50, %v782_v44 }
 0x166   : > { %v795_v56 = vadd.f32 %v793_v55, %v785_v51  ;;  %v796_v57 = vadd.f32 %v793_v55, %v786_v52  ;;  %v797_v58 = vadd.f32 %v793_v55, %v787_v53  ;;  %v798_v59 = vadd.f32 %v793_v55, %v788_v54 }
 0x168   : > { %v799_v60 = vmax.f32 %v795_v56, 0.0  ;;  %v800_v61 = vmax.f32 %v796_v57, 0.0  ;;  %v801_v62 = vmax.f32 %v797_v58, 0.0  ;;  %v802_v63 = vmax.f32 %v798_v59, 0.0 }
 0x16a   : > { %803 = vst [vmem:[%s1314_s5] sm:$0xff] %v799_v60  ;;  %804 = vst [vmem:[%s1314_s5 + $0x8] sm:$0xff] %v800_v61 }
 0x16b   : > { %805 = vst [vmem:[%s1314_s5 + $0x10] sm:$0xff] %v801_v62  ;;  %806 = vst [vmem:[%s1314_s5 + $0x18] sm:$0xff] %v802_v63 }
 0x16c PF: > { %s15_s22 = sadd.s32 1, %s1154_s22   ;;  %s1315_s18 = smov %s1142_s19 }
 0x16d   : > { %p12_p12 = scmp.ge.s32.totalorder %s15_s22, 5   ;;  %s1316_s19 = smov %s1222_s26 }
 0x16e   : > { %s1317_s20 = smov %s1150_s21  ;;  %s1318_s21 = smov %s1320_s23 }
 0x16f   :  { %14 = sbr.rel (!%p12_p12) target bundleno = 3 (0x3), region = 127 }

// kernel: _lambda_.9
= control target key start
LH: loop header
LB: loop body
LE: loop exit
PB: predicated region body
PF: predicated region fallthrough
CT: control target
= control target key end

     0   :  { %s940_s1 = inlined_call_operand.vmem [shape: bf16[768,128], index: 1, kind: input, shape index: {}]   ;;  %s941_s0 = inlined_call_operand.vmem [shape: bf16[16,768], index: 0, kind: input, shape index: {}]   ;;  %s942_s2 = inlined_call_operand.vmem [shape: f32[1,128], index: 2, kind: input, shape index: {}]   ;;  %s943_s3 = inlined_call_operand.vmem [shape: f32[16,128], index: 3, kind: output, shape index: {}]  }
   0x1   :  { %v692_v0 = vld [vmem:[%s940_s1 + $0x40] sm:$0xff]   ;;  %v696_v4 = vld [vmem:[%s940_s1 + $0x48] sm:$0xff]   ;;  %v700_v8 = vld [vmem:[%s940_s1 + $0x50] sm:$0xff]  }
   0x2   :  { %v693_v1 = vld [vmem:[%s940_s1] sm:$0xff]   ;;  %626 = vmatprep.subr.bf16.mxu0 %v692_v0  ;;  %v697_v5 = vld [vmem:[%s940_s1 + $0x8] sm:$0xff]   ;;  %v701_v9 = vld [vmem:[%s940_s1 + $0x10] sm:$0xff]  }
   0x3   :  { %v694_v2 = vld [vmem:[%s940_s1 + $0xc0] sm:$0xff]   ;;  %627 = vmatpush3.bf16.msra.mxu0 %v693_v1  ;;  %v698_v6 = vld [vmem:[%s940_s1 + $0xc8] sm:$0xff]   ;;  %v702_v10 = vld [vmem:[%s940_s1 + $0xd0] sm:$0xff]  }
   0x4   :  { %v695_v3 = vld [vmem:[%s940_s1 + $0x80] sm:$0xff]   ;;  %648 = vmatprep.subr.bf16.mxu1 %v694_v2  ;;  %628 = vmatprep.subr.bf16.mxu0 %v696_v4  ;;  %v699_v7 = vld [vmem:[%s940_s1 + $0x88] sm:$0xff]   ;;  %v703_v11 = vld [vmem:[%s940_s1 + $0x90] sm:$0xff]  }
   0x5   :  { %649 = vmatpush3.bf16.msra.mxu1 %v695_v3  ;;  %v704_v12 = vld [vmem:[%s940_s1 + $0x58] sm:$0xff]   ;;  %v708_v16 = vld [vmem:[%s940_s1 + $0x60] sm:$0xff]   ;;  %v712_v20 = vld [vmem:[%s940_s1 + $0x68] sm:$0xff]  }
   0x6   :  { %650 = vmatprep.subr.bf16.mxu1 %v698_v6  ;;  %v705_v13 = vld [vmem:[%s940_s1 + $0x18] sm:$0xff]   ;;  %v709_v17 = vld [vmem:[%s940_s1 + $0x20] sm:$0xff]   ;;  %v713_v21 = vld [vmem:[%s940_s1 + $0x28] sm:$0xff]  }
   0x7   :  { %629 = vmatpush3.bf16.msra.mxu0 %v697_v5  ;;  %v706_v14 = vld [vmem:[%s940_s1 + $0xd8] sm:$0xff]   ;;  %v710_v18 = vld [vmem:[%s940_s1 + $0xe0] sm:$0xff]   ;;  %v714_v22 = vld [vmem:[%s940_s1 + $0xe8] sm:$0xff]  }
   0x8   :  { %630 = vmatprep.subr.bf16.mxu0 %v700_v8  ;;  %v707_v15 = vld [vmem:[%s940_s1 + $0x98] sm:$0xff]   ;;  %v711_v19 = vld [vmem:[%s940_s1 + $0xa0] sm:$0xff]   ;;  %v715_v23 = vld [vmem:[%s940_s1 + $0xa8] sm:$0xff]  }
   0x9   :  { %651 = vmatpush3.bf16.msra.mxu1 %v699_v7  ;;  %v716_v24 = vld [vmem:[%s940_s1 + $0x70] sm:$0xff]   ;;  %v720_v28 = vld [vmem:[%s940_s1 + $0x78] sm:$0xff]   ;;  %v727_v34 = vld [vmem:[%s940_s1 + $0x140] sm:$0xff]  }
   0xa   :  { %652 = vmatprep.subr.bf16.mxu1 %v702_v10  ;;  %v717_v25 = vld [vmem:[%s940_s1 + $0x30] sm:$0xff]   ;;  %v721_v29 = vld [vmem:[%s940_s1 + $0x38] sm:$0xff]   ;;  %v728_v35 = vld [vmem:[%s941_s0 + $0x8] ss:$24 sps:$4 sm:$0xff]  }
   0xb   :  { %631 = vmatpush3.bf16.msra.mxu0 %v701_v9  ;;  %v718_v26 = vld [vmem:[%s940_s1 + $0xf0] sm:$0xff]   ;;  %v722_v30 = vld [vmem:[%s940_s1 + $0xf8] sm:$0xff]   ;;  %v730_v36 = vld [vmem:[%s941_s0 + $0xc] ss:$24 sps:$4 sm:$0xff]  }
   0xc   :  { %632 = vmatprep.subr.bf16.mxu0 %v704_v12  ;;  %v719_v27 = vld [vmem:[%s940_s1 + $0xb0] sm:$0xff]   ;;  %v723_v31 = vld [vmem:[%s941_s0] ss:$24 sps:$4 sm:$0xff]   ;;  %v725_v32 = vld [vmem:[%s941_s0 + $0x4] ss:$24 sps:$4 sm:$0xff]   ;;  %515 = vmatprep.mubr.bf16.mxu1 %v730_v36 }
   0xd   :  { %653 = vmatpush3.bf16.msra.mxu1 %v703_v11  ;;  %v726_v33 = vld [vmem:[%s940_s1 + $0xb8] sm:$0xff]   ;;  %474 = vmatprep.mubr.bf16.mxu0 %v725_v32  ;;  %v731_v37 = vld [vmem:[%s940_s1 + $0x100] sm:$0xff]   ;;  %v732_v38 = vld [vmem:[%s940_s1 + $0x148] sm:$0xff]  }
   0xe   :  { %654 = vmatprep.subr.bf16.mxu1 %v706_v14  ;;  %v733_v39 = vld [vmem:[%s940_s1 + $0x108] sm:$0xff]   ;;  %v734_v40 = vld [vmem:[%s940_s1 + $0x150] sm:$0xff]   ;;  %v736_v42 = vld [vmem:[%s940_s1 + $0x158] sm:$0xff]  }
   0xf   :  { %633 = vmatpush3.bf16.msra.mxu0 %v705_v13  ;;  %v735_v41 = vld [vmem:[%s940_s1 + $0x110] sm:$0xff]   ;;  %v737_v43 = vld [vmem:[%s940_s1 + $0x118] sm:$0xff]   ;;  %v738_v44 = vld [vmem:[%s940_s1 + $0x160] sm:$0xff]  }
  0x10   :  { %634 = vmatprep.subr.bf16.mxu0 %v708_v16  ;;  %v739_v45 = vld [vmem:[%s940_s1 + $0x120] sm:$0xff]   ;;  %v740_v46 = vld [vmem:[%s940_s1 + $0x168] sm:$0xff]   ;;  %v742_v49 = vld [vmem:[%s940_s1 + $0x170] sm:$0xff]  }
  0x11   :  { %655 = vmatpush3.bf16.msra.mxu1 %v707_v15  ;;  %v748_v47 = vld [vmem:[%s941_s0 + $0x14] ss:$24 sps:$4 sm:$0xff]   ;;  %v744_v51 = vld [vmem:[%s940_s1 + $0x178] sm:$0xff]   ;;  %v746_v53 = vld [vmem:[%s941_s0 + $0x10] ss:$24 sps:$4 sm:$0xff]  }
  0x12   :  { %656 = vmatprep.subr.bf16.mxu1 %v710_v18  ;;  %v741_v48 = vld [vmem:[%s940_s1 + $0x128] sm:$0xff]   ;;  %v743_v50 = vld [vmem:[%s940_s1 + $0x130] sm:$0xff]   ;;  %v745_v52 = vld [vmem:[%s940_s1 + $0x138] sm:$0xff]  }
  0x13   :  { %635 = vmatpush3.bf16.msra.mxu0 %v709_v17  ;;  %v571_v55 = vld [vmem:[%s942_s2] ss:$0 sm:$0xff] }
  0x14   :  { %636 = vmatprep.subr.bf16.mxu0 %v712_v20 }
  0x15   :  { %657 = vmatpush3.bf16.msra.mxu1 %v711_v19 }
  0x16   :  { %658 = vmatprep.subr.bf16.mxu1 %v714_v22 }
  0x17   :  { %637 = vmatpush3.bf16.msra.mxu0 %v713_v21 }
  0x18   :  { %638 = vmatprep.subr.bf16.mxu0 %v716_v24 }
  0x19   :  { %659 = vmatpush3.bf16.msra.mxu1 %v715_v23 }
  0x1a   :  { %660 = vmatprep.subr.bf16.mxu1 %v718_v26 }
  0x1b   :  { %639 = vmatpush3.bf16.msra.mxu0 %v717_v25 }
  0x1c   :  { %640 = vmatprep.subr.bf16.mxu0 %v720_v28 }
  0x1d   :  { %661 = vmatpush3.bf16.msra.mxu1 %v719_v27 }
  0x1e   :  { %662 = vmatprep.subr.bf16.mxu1 %v722_v30 }
  0x1f   :  { %641 = vmatpush3.bf16.msra.mxu0 %v721_v29 }
  0x20   :  { %670 = vmatprep.subr.bf16.mxu0 %v727_v34 }
  0x21   :  { %663 = vmatpush3.bf16.msra.mxu1 %v726_v33 }
  0x22   :  { %475 = vmatmul.mubr.bf16.vlgmr.msra.gmra.mrb[0].mxu0 %v723_v31 }
  0x23   :  { %671 = vmatpush3.bf16.msra.mxu0 %v731_v37  ;;  %556 = vmatprep.mubr.bf16.mxu0 %v748_v47 }
  0x24   :  { %516 = vmatmul.mubr.bf16.vlgmr.msra.gmra.mrb[0].mxu1 %v728_v35  ;;  %672 = vmatprep.subr.bf16.mxu0 %v732_v38 }
  0x27   :  { %673 = vmatpush3.bf16.msra.mxu0 %v733_v39 }
  0x28   :  { %674 = vmatprep.subr.bf16.mxu0 %v734_v40 }
  0x2b   :  { %675 = vmatpush3.bf16.msra.mxu0 %v735_v41 }
  0x2c   :  { %676 = vmatprep.subr.bf16.mxu0 %v736_v42 }
  0x2f   :  { %677 = vmatpush3.bf16.msra.mxu0 %v737_v43 }
  0x30   :  { %678 = vmatprep.subr.bf16.mxu0 %v738_v44 }
  0x33   :  { %679 = vmatpush3.bf16.msra.mxu0 %v739_v45 }
  0x34   :  { %680 = vmatprep.subr.bf16.mxu0 %v740_v46 }
  0x37   :  { %681 = vmatpush3.bf16.msra.mxu0 %v741_v48 }
  0x38   :  { %682 = vmatprep.subr.bf16.mxu0 %v742_v49 }
  0x3b   :  { %683 = vmatpush3.bf16.msra.mxu0 %v743_v50 }
  0x3c   :  { %684 = vmatprep.subr.bf16.mxu0 %v744_v51 }
  0x3f   :  { %685 = vmatpush3.bf16.msra.mxu0 %v745_v52 }
  0x42   :  { %557 = vmatmul.mubr.bf16.vlgmr.msra.gmra.mrb[4].mxu0 %v746_v53 }
  0xf5   :  { %v642_v54 = vpop.f32.mrb[0].mxu0 }
  0xf6   :  { %v643_v56 = vpop.f32.mrb[1].mxu0 }
  0xf7   :  { %v644_v57 = vadd.f32 %v643_v56, %v642_v54  ;;  %v645_v58 = vpop.f32.mrb[2].mxu0  ;;  %v664_v59 = vpop.f32.mrb[0].mxu1 }
  0xf8   :  { %v646_v60 = vpop.f32.mrb[3].mxu0  ;;  %v665_v63 = vpop.f32.mrb[1].mxu1 }
  0xf9   :  { %v477_v61 = vadd.f32 %v644_v57, %v571_v55  ;;  %v647_v62 = vadd.f32 %v646_v60, %v645_v58  ;;  %v666_v0 = vadd.f32 %v665_v63, %v664_v59  ;;  %v667_v1 = vpop.f32.mrb[2].mxu1 }
  0xfa   :  { %v668_v3 = vpop.f32.mrb[3].mxu1 }
  0xfb   :  { %v480_v2 = vadd.f32 %v647_v62, %v571_v55  ;;  %v518_v4 = vadd.f32 %v666_v0, %v477_v61  ;;  %v669_v5 = vadd.f32 %v668_v3, %v667_v1 }
  0xfd   :  { %v521_v6 = vadd.f32 %v669_v5, %v480_v2 }
 0x115   :  { %v686_v7 = vpop.f32.mrb[4].mxu0 }
 0x116   :  { %v687_v8 = vpop.f32.mrb[5].mxu0 }
 0x117   :  { %v688_v9 = vadd.f32 %v687_v8, %v686_v7  ;;  %v689_v10 = vpop.f32.mrb[6].mxu0 }
 0x118   :  { %v690_v11 = vpop.f32.mrb[7].mxu0 }
 0x119   :  { %v559_v12 = vadd.f32 %v688_v9, %v518_v4  ;;  %v691_v13 = vadd.f32 %v690_v11, %v689_v10 }
 0x11b   :  { %565 = vst [vmem:[%s943_s3] sm:$0xff] %v559_v12  ;;  %v562_v14 = vadd.f32 %v691_v13, %v521_v6 }
 0x11d   :  { %566 = vst [vmem:[%s943_s3 + $0x8] sm:$0xff] %v562_v14 }

</bundles_post_ra>
